<compile_context>
chip_gen: v7x
topology: tpu7x:2x2x1
jax: 0.10.0
libtpu: 0.0.40
codegen_flags: <defaults>
</compile_context>

<pallas_src>
import jax
import jax.numpy as jnp
import numpy as np
from jax import lax
from jax.experimental import pallas as pl
from jax.experimental.pallas import tpu as pltpu


# =============================================================================
# The fused kernel
# =============================================================================
def _lenet5_kernel(x_ref,                                    # (TB, 32, 32)
                   w1_ref, b1_ref, sel14_ref,                # C1 + pool1
                   w2a_ref, b2a_ref, w2b_ref, b2b_ref, sel5_ref,  # C2 a/b + pool2
                   w3_ref, b3_ref,                           # C3
                   w4_ref, b4_ref,                           # F4
                   w5_ref, b5_ref,                           # F5 (padded to 128)
                   out_ref):                                 # (TB, 1, 128)

    def dot(a, b):
        return jnp.dot(a, b, preferred_element_type=jnp.float32)

    def conv_banded(inp, w_ref, b_ref, out_rows):
        # conv2d (valid, 5x5) as 5 row-shifted matmuls against banded weights.
        acc = dot(inp[0:out_rows, :], w_ref[0])
        for i in range(1, 5):
            acc = acc + dot(inp[i:i + out_rows, :], w_ref[i])
        return jnp.maximum(acc + b_ref[...], 0.0)            # + bias, ReLU

    def maxpool(h, sel_ref, group):
        # rows: max of adjacent rows, then 0/1 selection matmul keeps even rows
        v = jnp.maximum(h[:-1, :], h[1:, :])
        r = dot(sel_ref[...], v)
        # cols: max of `group`-lane shifted copies; pooled values sit at even
        # column groups (the decimation is folded into the next banded weights)
        return jnp.maximum(r[:, :-group], r[:, group:])

    def one_image(t, carry):
        x = x_ref[t]                                                   # (32, 32)
        h1 = conv_banded(x, w1_ref, b1_ref, 28)                        # (28, 168)
        p1 = maxpool(h1, sel14_ref, 6)                                 # (14, 162)
        p2a = maxpool(conv_banded(p1, w2a_ref, b2a_ref, 10), sel5_ref, 16)  # (5,144)
        p2b = maxpool(conv_banded(p1, w2b_ref, b2b_ref, 10), sel5_ref, 16)  # (5,144)
        s = p2a + p2b                                                  # branch add
        h3 = conv_banded(s, w3_ref, b3_ref, 1)                         # (1, 120)
        h4 = jnp.maximum(dot(h3, w4_ref[...]) + b4_ref[...], 0.0)      # (1, 84)
        a5 = dot(h4, w5_ref[...]) + b5_ref[...]                        # (1, 128)
        z = a5 - jnp.max(a5, axis=-1, keepdims=True)
        out_ref[t] = z - jnp.log(jnp.sum(jnp.exp(z), axis=-1, keepdims=True))
        return carry

    lax.fori_loop(0, x_ref.shape[0], one_image, 0)


# =============================================================================
# Host-side one-time weight repacking (PyTorch layout -> banded matmul layout)
# =============================================================================
def pack_params(p):
    f32 = jnp.float32

    # C1: banded weight (5, 32, 168): [i, wo + j, wo*6 + co] = w1[co, 0, i, j]
    co, i, j, wo = np.meshgrid(np.arange(6), np.arange(5), np.arange(5),
                               np.arange(28), indexing="ij")
    w1b = jnp.zeros((5, 32, 168), f32).at[i, wo + j, wo * 6 + co].set(
        p["w1"][co, 0, i, j])

    # C2: banded weight (5, 162, 160):
    #   input lane layout (pool1, uncompacted): 12*q + c  (q=0..13, c=0..5)
    #   output lane layout:                     16*wo2 + co
    def conv2_banded(w):
        co2, c2, i2, j2, wo2 = np.meshgrid(np.arange(16), np.arange(6),
                                           np.arange(5), np.arange(5),
                                           np.arange(10), indexing="ij")
        return jnp.zeros((5, 162, 160), f32).at[
            i2, (wo2 + j2) * 12 + c2, wo2 * 16 + co2].set(w[co2, c2, i2, j2])

    # C3: (5, 144, 120): input lane layout (pool2, uncompacted): 32*j + cin
    co3, c3, i3, j3 = np.meshgrid(np.arange(120), np.arange(16),
                                  np.arange(5), np.arange(5), indexing="ij")
    w3b = jnp.zeros((5, 144, 120), f32).at[i3, 32 * j3 + c3, co3].set(
        p["w3"][co3, c3, i3, j3])

    # 0/1 row-decimation matrices for the 2x2 max-pools
    sel14 = np.zeros((14, 27), np.float32)
    sel14[np.arange(14), 2 * np.arange(14)] = 1.0
    sel5 = np.zeros((5, 9), np.float32)
    sel5[np.arange(5), 2 * np.arange(5)] = 1.0

    # F5 padded to a 128-lane slab (unmasked stores); pad biases = -1e30 so the
    # pad lanes vanish in the log-softmax.
    w5p = jnp.zeros((84, 128), f32).at[:, :10].set(p["w5"].T)
    b5p = jnp.full((128,), -1e30, f32).at[:10].set(p["b5"]).reshape(1, 128)

    return {
        "w1b": w1b, "b1r": jnp.tile(p["b1"], 28).reshape(1, 168),
        "sel14": jnp.asarray(sel14),
        "w2ab": conv2_banded(p["w2a"]), "b2ar": jnp.tile(p["b2a"], 10).reshape(1, 160),
        "w2bb": conv2_banded(p["w2b"]), "b2br": jnp.tile(p["b2b"], 10).reshape(1, 160),
        "sel5": jnp.asarray(sel5),
        "w3b": w3b, "b3r": p["b3"].reshape(1, 120),
        "w4t": p["w4"].T, "b4r": p["b4"].reshape(1, 84),
        "w5p": w5p, "b5p": b5p,
    }


# =============================================================================
# Forward wrapper: one pallas_call for the whole network
# =============================================================================
def lenet5_forward(packed, img, *, block_batch=8):
    B = img.shape[0]
    x = img.reshape(B, 32, 32).astype(jnp.float32)
    pad = (-B) % block_batch
    if pad:
        x = jnp.concatenate([x, jnp.zeros((pad, 32, 32), jnp.float32)], axis=0)
    Bp = B + pad
    grid = (Bp // block_batch,)

    operands = (x, packed["w1b"], packed["b1r"], packed["sel14"],
                packed["w2ab"], packed["b2ar"], packed["w2bb"], packed["b2br"],
                packed["sel5"], packed["w3b"], packed["b3r"],
                packed["w4t"], packed["b4r"], packed["w5p"], packed["b5p"])

    def resident_spec(arr):
        # full-array block, constant index_map -> stays in VMEM across the grid
        return pl.BlockSpec(arr.shape, lambda b: (0,) * arr.ndim)

    in_specs = [pl.BlockSpec((block_batch, 32, 32), lambda b: (b, 0, 0))]
    in_specs += [resident_spec(a) for a in operands[1:]]
    out_spec = pl.BlockSpec((block_batch, 1, 128), lambda b: (b, 0, 0))

    out = pl.pallas_call(
        _lenet5_kernel,
        out_shape=jax.ShapeDtypeStruct((Bp, 1, 128), jnp.float32),
        grid_spec=pltpu.PrefetchScalarGridSpec(
            num_scalar_prefetch=0,
            grid=grid,
            in_specs=in_specs,
            out_specs=out_spec),
        compiler_params=pltpu.CompilerParams(
            dimension_semantics=("parallel",)),
    )(*operands)

    return out.reshape(Bp, 128)[:B, :10]


# =============================================================================
# Deterministic parameter init (PyTorch layouts / PyTorch-style uniform bounds)
# =============================================================================
def _uniform(key, shape, fan_in):
    bound = 1.0 / float(np.sqrt(fan_in))
    return jax.random.uniform(key, shape, jnp.float32, -bound, bound)


def init_params(key):
    ks = jax.random.split(key, 12)
    return {
        "w1": _uniform(ks[0], (6, 1, 5, 5), 25),   "b1": _uniform(ks[1], (6,), 25),
        "w2a": _uniform(ks[2], (16, 6, 5, 5), 150), "b2a": _uniform(ks[3], (16,), 150),
        "w2b": _uniform(ks[4], (16, 6, 5, 5), 150), "b2b": _uniform(ks[5], (16,), 150),
        "w3": _uniform(ks[6], (120, 16, 5, 5), 400), "b3": _uniform(ks[7], (120,), 400),
        "w4": _uniform(ks[8], (84, 120), 120),      "b4": _uniform(ks[9], (84,), 120),
        "w5": _uniform(ks[10], (10, 84), 84),       "b5": _uniform(ks[11], (10,), 84),
    }


# =============================================================================
# Pure-JAX (XLA) reference of the PyTorch module, for a correctness check
# =============================================================================
def lenet5_reference(p, img):
    prec = lax.Precision.HIGHEST

    def conv_relu(x, w, b):
        y = lax.conv_general_dilated(
            x, w, (1, 1), "VALID",
            dimension_numbers=("NCHW", "OIHW", "NCHW"), precision=prec)
        return jax.nn.relu(y + b.reshape(1, -1, 1, 1))

    def pool(x):
        B, C, H, W = x.shape
        return x.reshape(B, C, H // 2, 2, W // 2, 2).max(axis=(3, 5))

    out = pool(conv_relu(img, p["w1"], p["b1"]))
    xa = pool(conv_relu(out, p["w2a"], p["b2a"]))
    xb = pool(conv_relu(out, p["w2b"], p["b2b"]))
    s = xb + xa
    h3 = conv_relu(s, p["w3"], p["b3"]).reshape(img.shape[0], -1)      # (B, 120)
    h4 = jax.nn.relu(jnp.dot(h3, p["w4"].T, precision=prec) + p["b4"])  # (B, 84)
    logits = jnp.dot(h4, p["w5"].T, precision=prec) + p["b5"]           # (B, 10)
    return jax.nn.log_softmax(logits, axis=-1)


# =============================================================================
if __name__ == "__main__":
    key = jax.random.PRNGKey(0)
    k_param, k_img = jax.random.split(key)
    params = init_params(k_param)
    # LeNet-5 expects 32x32 single-channel images.
    img = jax.random.normal(k_img, (16, 1, 32, 32), dtype=jnp.float32)

    packed = pack_params(params)            # one-time host-side weight repack

    fwd = jax.jit(lenet5_forward)
    out = jax.block_until_ready(fwd(packed, img))

    assert out.shape == (16, 10), out.shape
    assert bool(jnp.all(jnp.isfinite(out)))
    row_sums = jnp.exp(out).sum(axis=-1)
    assert bool(jnp.all(jnp.abs(row_sums - 1.0) < 1e-4)), row_sums

    ref = jax.block_until_ready(jax.jit(lenet5_reference)(params, img))
    max_err = float(jnp.max(jnp.abs(out - ref)))
    assert max_err < 5e-2, max_err

    print("KERNEL_OK")
</pallas_src>

<mosaic_0001>
module attributes {stable_mosaic.version = 11 : i64} {
  func.func @_lenet5_kernel(%arg0: i32, %arg1: memref<8x32x32xf32, #tpu.memory_space<vmem>>, %arg2: memref<5x32x168xf32, #tpu.memory_space<vmem>>, %arg3: memref<1x168xf32, #tpu.memory_space<vmem>>, %arg4: memref<14x27xf32, #tpu.memory_space<vmem>>, %arg5: memref<5x162x160xf32, #tpu.memory_space<vmem>>, %arg6: memref<1x160xf32, #tpu.memory_space<vmem>>, %arg7: memref<5x162x160xf32, #tpu.memory_space<vmem>>, %arg8: memref<1x160xf32, #tpu.memory_space<vmem>>, %arg9: memref<5x9xf32, #tpu.memory_space<vmem>>, %arg10: memref<5x144x120xf32, #tpu.memory_space<vmem>>, %arg11: memref<1x120xf32, #tpu.memory_space<vmem>>, %arg12: memref<120x84xf32, #tpu.memory_space<vmem>>, %arg13: memref<1x84xf32, #tpu.memory_space<vmem>>, %arg14: memref<84x128xf32, #tpu.memory_space<vmem>>, %arg15: memref<1x128xf32, #tpu.memory_space<vmem>>, %arg16: memref<8x1x128xf32, #tpu.memory_space<vmem>>) attributes {dimension_semantics = [#tpu.dimension_semantics<parallel>], iteration_bounds = array<i64: 2>, scalar_prefetch = 0 : i64, scratch_operands = 0 : i64, tpu.core_type = #tpu.core_type<tc>, window_params = [{transform_indices = @transform_0, window_bounds = array<i64: 8, 32, 32>}, {pipeline_mode = #tpu.pipeline_mode<synchronous>, transform_indices = @transform_1, window_bounds = array<i64: 5, 32, 168>}, {pipeline_mode = #tpu.pipeline_mode<synchronous>, transform_indices = @transform_2, window_bounds = array<i64: 1, 168>}, {pipeline_mode = #tpu.pipeline_mode<synchronous>, transform_indices = @transform_3, window_bounds = array<i64: 14, 27>}, {pipeline_mode = #tpu.pipeline_mode<synchronous>, transform_indices = @transform_4, window_bounds = array<i64: 5, 162, 160>}, {pipeline_mode = #tpu.pipeline_mode<synchronous>, transform_indices = @transform_5, window_bounds = array<i64: 1, 160>}, {pipeline_mode = #tpu.pipeline_mode<synchronous>, transform_indices = @transform_6, window_bounds = array<i64: 5, 162, 160>}, {pipeline_mode = #tpu.pipeline_mode<synchronous>, transform_indices = @transform_7, window_bounds = array<i64: 1, 160>}, {pipeline_mode = #tpu.pipeline_mode<synchronous>, transform_indices = @transform_8, window_bounds = array<i64: 5, 9>}, {pipeline_mode = #tpu.pipeline_mode<synchronous>, transform_indices = @transform_9, window_bounds = array<i64: 5, 144, 120>}, {pipeline_mode = #tpu.pipeline_mode<synchronous>, transform_indices = @transform_10, window_bounds = array<i64: 1, 120>}, {pipeline_mode = #tpu.pipeline_mode<synchronous>, transform_indices = @transform_11, window_bounds = array<i64: 120, 84>}, {pipeline_mode = #tpu.pipeline_mode<synchronous>, transform_indices = @transform_12, window_bounds = array<i64: 1, 84>}, {pipeline_mode = #tpu.pipeline_mode<synchronous>, transform_indices = @transform_13, window_bounds = array<i64: 84, 128>}, {pipeline_mode = #tpu.pipeline_mode<synchronous>, transform_indices = @transform_14, window_bounds = array<i64: 1, 128>}, {transform_indices = @transform_15, window_bounds = array<i64: 8, 1, 128>}]} {
    %c0_i32 = arith.constant 0 : i32
    %c8_i32 = arith.constant 8 : i32
    %0 = arith.addi %c0_i32, %c8_i32 : i32
    %c1_i32 = arith.constant 1 : i32
    scf.for %arg17 = %c0_i32 to %0 step %c1_i32  : i32 {
      %1 = arith.index_cast %arg17 : i32 to index
      %c0 = arith.constant 0 : index
      %c0_1 = arith.constant 0 : index
      %2 = vector.load %arg1[%1, %c0, %c0_1] : memref<8x32x32xf32, #tpu.memory_space<vmem>>, vector<1x32x32xf32>
      %3 = vector.shape_cast %2 : vector<1x32x32xf32> to vector<32x32xf32>
      %4 = vector.extract_strided_slice %3 {offsets = [0, 0], sizes = [28, 32], strides = [1, 1]} : vector<32x32xf32> to vector<28x32xf32>
      %c0_2 = arith.constant 0 : index
      %c0_3 = arith.constant 0 : index
      %c0_4 = arith.constant 0 : index
      %5 = vector.load %arg2[%c0_2, %c0_3, %c0_4] : memref<5x32x168xf32, #tpu.memory_space<vmem>>, vector<1x32x168xf32>
      %6 = vector.shape_cast %5 : vector<1x32x168xf32> to vector<32x168xf32>
      %cst = arith.constant dense<0.000000e+00> : vector<28x168xf32>
      %7 = tpu.matmul %4, %6, %cst {dimension_numbers = #tpu.dot_dimension_numbers<[1], [0], [0], [1], [0, 0, 1, 1], [], []>} : vector<28x32xf32>, vector<32x168xf32>, vector<28x168xf32> -> vector<28x168xf32>
      %8 = vector.extract_strided_slice %3 {offsets = [1, 0], sizes = [28, 32], strides = [1, 1]} : vector<32x32xf32> to vector<28x32xf32>
      %c1 = arith.constant 1 : index
      %c0_5 = arith.constant 0 : index
      %c0_6 = arith.constant 0 : index
      %9 = vector.load %arg2[%c1, %c0_5, %c0_6] : memref<5x32x168xf32, #tpu.memory_space<vmem>>, vector<1x32x168xf32>
      %10 = vector.shape_cast %9 : vector<1x32x168xf32> to vector<32x168xf32>
      %cst_7 = arith.constant dense<0.000000e+00> : vector<28x168xf32>
      %11 = tpu.matmul %8, %10, %cst_7 {dimension_numbers = #tpu.dot_dimension_numbers<[1], [0], [0], [1], [0, 0, 1, 1], [], []>} : vector<28x32xf32>, vector<32x168xf32>, vector<28x168xf32> -> vector<28x168xf32>
      %12 = arith.addf %7, %11 : vector<28x168xf32>
      %13 = vector.extract_strided_slice %3 {offsets = [2, 0], sizes = [28, 32], strides = [1, 1]} : vector<32x32xf32> to vector<28x32xf32>
      %c2 = arith.constant 2 : index
      %c0_8 = arith.constant 0 : index
      %c0_9 = arith.constant 0 : index
      %14 = vector.load %arg2[%c2, %c0_8, %c0_9] : memref<5x32x168xf32, #tpu.memory_space<vmem>>, vector<1x32x168xf32>
      %15 = vector.shape_cast %14 : vector<1x32x168xf32> to vector<32x168xf32>
      %cst_10 = arith.constant dense<0.000000e+00> : vector<28x168xf32>
      %16 = tpu.matmul %13, %15, %cst_10 {dimension_numbers = #tpu.dot_dimension_numbers<[1], [0], [0], [1], [0, 0, 1, 1], [], []>} : vector<28x32xf32>, vector<32x168xf32>, vector<28x168xf32> -> vector<28x168xf32>
      %17 = arith.addf %12, %16 : vector<28x168xf32>
      %18 = vector.extract_strided_slice %3 {offsets = [3, 0], sizes = [28, 32], strides = [1, 1]} : vector<32x32xf32> to vector<28x32xf32>
      %c3 = arith.constant 3 : index
      %c0_11 = arith.constant 0 : index
      %c0_12 = arith.constant 0 : index
      %19 = vector.load %arg2[%c3, %c0_11, %c0_12] : memref<5x32x168xf32, #tpu.memory_space<vmem>>, vector<1x32x168xf32>
      %20 = vector.shape_cast %19 : vector<1x32x168xf32> to vector<32x168xf32>
      %cst_13 = arith.constant dense<0.000000e+00> : vector<28x168xf32>
      %21 = tpu.matmul %18, %20, %cst_13 {dimension_numbers = #tpu.dot_dimension_numbers<[1], [0], [0], [1], [0, 0, 1, 1], [], []>} : vector<28x32xf32>, vector<32x168xf32>, vector<28x168xf32> -> vector<28x168xf32>
      %22 = arith.addf %17, %21 : vector<28x168xf32>
      %23 = vector.extract_strided_slice %3 {offsets = [4, 0], sizes = [28, 32], strides = [1, 1]} : vector<32x32xf32> to vector<28x32xf32>
      %c4 = arith.constant 4 : index
      %c0_14 = arith.constant 0 : index
      %c0_15 = arith.constant 0 : index
      %24 = vector.load %arg2[%c4, %c0_14, %c0_15] : memref<5x32x168xf32, #tpu.memory_space<vmem>>, vector<1x32x168xf32>
      %25 = vector.shape_cast %24 : vector<1x32x168xf32> to vector<32x168xf32>
      %cst_16 = arith.constant dense<0.000000e+00> : vector<28x168xf32>
      %26 = tpu.matmul %23, %25, %cst_16 {dimension_numbers = #tpu.dot_dimension_numbers<[1], [0], [0], [1], [0, 0, 1, 1], [], []>} : vector<28x32xf32>, vector<32x168xf32>, vector<28x168xf32> -> vector<28x168xf32>
      %27 = arith.addf %22, %26 : vector<28x168xf32>
      %c0_17 = arith.constant 0 : index
      %c0_18 = arith.constant 0 : index
      %28 = vector.load %arg3[%c0_17, %c0_18] : memref<1x168xf32, #tpu.memory_space<vmem>>, vector<1x168xf32>
      %29 = vector.broadcast %28 : vector<1x168xf32> to vector<28x168xf32>
      %30 = arith.addf %27, %29 : vector<28x168xf32>
      %cst_19 = arith.constant 0.000000e+00 : f32
      %31 = vector.broadcast %cst_19 : f32 to vector<28x168xf32>
      %32 = arith.maximumf %30, %31 : vector<28x168xf32>
      %33 = vector.extract_strided_slice %32 {offsets = [0, 0], sizes = [27, 168], strides = [1, 1]} : vector<28x168xf32> to vector<27x168xf32>
      %34 = vector.extract_strided_slice %32 {offsets = [1, 0], sizes = [27, 168], strides = [1, 1]} : vector<28x168xf32> to vector<27x168xf32>
      %35 = arith.maximumf %33, %34 : vector<27x168xf32>
      %c0_20 = arith.constant 0 : index
      %c0_21 = arith.constant 0 : index
      %36 = vector.load %arg4[%c0_20, %c0_21] : memref<14x27xf32, #tpu.memory_space<vmem>>, vector<14x27xf32>
      %cst_22 = arith.constant dense<0.000000e+00> : vector<14x168xf32>
      %37 = tpu.matmul %36, %35, %cst_22 {dimension_numbers = #tpu.dot_dimension_numbers<[1], [0], [0], [1], [0, 0, 1, 1], [], []>} : vector<14x27xf32>, vector<27x168xf32>, vector<14x168xf32> -> vector<14x168xf32>
      %38 = vector.extract_strided_slice %37 {offsets = [0, 0], sizes = [14, 162], strides = [1, 1]} : vector<14x168xf32> to vector<14x162xf32>
      %39 = vector.extract_strided_slice %37 {offsets = [0, 6], sizes = [14, 162], strides = [1, 1]} : vector<14x168xf32> to vector<14x162xf32>
      %40 = arith.maximumf %38, %39 : vector<14x162xf32>
      %41 = vector.extract_strided_slice %40 {offsets = [0, 0], sizes = [10, 162], strides = [1, 1]} : vector<14x162xf32> to vector<10x162xf32>
      %c0_23 = arith.constant 0 : index
      %c0_24 = arith.constant 0 : index
      %c0_25 = arith.constant 0 : index
      %42 = vector.load %arg5[%c0_23, %c0_24, %c0_25] : memref<5x162x160xf32, #tpu.memory_space<vmem>>, vector<1x162x160xf32>
      %43 = vector.shape_cast %42 : vector<1x162x160xf32> to vector<162x160xf32>
      %cst_26 = arith.constant dense<0.000000e+00> : vector<10x160xf32>
      %44 = tpu.matmul %41, %43, %cst_26 {dimension_numbers = #tpu.dot_dimension_numbers<[1], [0], [0], [1], [0, 0, 1, 1], [], []>} : vector<10x162xf32>, vector<162x160xf32>, vector<10x160xf32> -> vector<10x160xf32>
      %45 = vector.extract_strided_slice %40 {offsets = [1, 0], sizes = [10, 162], strides = [1, 1]} : vector<14x162xf32> to vector<10x162xf32>
      %c1_27 = arith.constant 1 : index
      %c0_28 = arith.constant 0 : index
      %c0_29 = arith.constant 0 : index
      %46 = vector.load %arg5[%c1_27, %c0_28, %c0_29] : memref<5x162x160xf32, #tpu.memory_space<vmem>>, vector<1x162x160xf32>
      %47 = vector.shape_cast %46 : vector<1x162x160xf32> to vector<162x160xf32>
      %cst_30 = arith.constant dense<0.000000e+00> : vector<10x160xf32>
      %48 = tpu.matmul %45, %47, %cst_30 {dimension_numbers = #tpu.dot_dimension_numbers<[1], [0], [0], [1], [0, 0, 1, 1], [], []>} : vector<10x162xf32>, vector<162x160xf32>, vector<10x160xf32> -> vector<10x160xf32>
      %49 = arith.addf %44, %48 : vector<10x160xf32>
      %50 = vector.extract_strided_slice %40 {offsets = [2, 0], sizes = [10, 162], strides = [1, 1]} : vector<14x162xf32> to vector<10x162xf32>
      %c2_31 = arith.constant 2 : index
      %c0_32 = arith.constant 0 : index
      %c0_33 = arith.constant 0 : index
      %51 = vector.load %arg5[%c2_31, %c0_32, %c0_33] : memref<5x162x160xf32, #tpu.memory_space<vmem>>, vector<1x162x160xf32>
      %52 = vector.shape_cast %51 : vector<1x162x160xf32> to vector<162x160xf32>
      %cst_34 = arith.constant dense<0.000000e+00> : vector<10x160xf32>
      %53 = tpu.matmul %50, %52, %cst_34 {dimension_numbers = #tpu.dot_dimension_numbers<[1], [0], [0], [1], [0, 0, 1, 1], [], []>} : vector<10x162xf32>, vector<162x160xf32>, vector<10x160xf32> -> vector<10x160xf32>
      %54 = arith.addf %49, %53 : vector<10x160xf32>
      %55 = vector.extract_strided_slice %40 {offsets = [3, 0], sizes = [10, 162], strides = [1, 1]} : vector<14x162xf32> to vector<10x162xf32>
      %c3_35 = arith.constant 3 : index
      %c0_36 = arith.constant 0 : index
      %c0_37 = arith.constant 0 : index
      %56 = vector.load %arg5[%c3_35, %c0_36, %c0_37] : memref<5x162x160xf32, #tpu.memory_space<vmem>>, vector<1x162x160xf32>
      %57 = vector.shape_cast %56 : vector<1x162x160xf32> to vector<162x160xf32>
      %cst_38 = arith.constant dense<0.000000e+00> : vector<10x160xf32>
      %58 = tpu.matmul %55, %57, %cst_38 {dimension_numbers = #tpu.dot_dimension_numbers<[1], [0], [0], [1], [0, 0, 1, 1], [], []>} : vector<10x162xf32>, vector<162x160xf32>, vector<10x160xf32> -> vector<10x160xf32>
      %59 = arith.addf %54, %58 : vector<10x160xf32>
      %60 = vector.extract_strided_slice %40 {offsets = [4, 0], sizes = [10, 162], strides = [1, 1]} : vector<14x162xf32> to vector<10x162xf32>
      %c4_39 = arith.constant 4 : index
      %c0_40 = arith.constant 0 : index
      %c0_41 = arith.constant 0 : index
      %61 = vector.load %arg5[%c4_39, %c0_40, %c0_41] : memref<5x162x160xf32, #tpu.memory_space<vmem>>, vector<1x162x160xf32>
      %62 = vector.shape_cast %61 : vector<1x162x160xf32> to vector<162x160xf32>
      %cst_42 = arith.constant dense<0.000000e+00> : vector<10x160xf32>
      %63 = tpu.matmul %60, %62, %cst_42 {dimension_numbers = #tpu.dot_dimension_numbers<[1], [0], [0], [1], [0, 0, 1, 1], [], []>} : vector<10x162xf32>, vector<162x160xf32>, vector<10x160xf32> -> vector<10x160xf32>
      %64 = arith.addf %59, %63 : vector<10x160xf32>
      %c0_43 = arith.constant 0 : index
      %c0_44 = arith.constant 0 : index
      %65 = vector.load %arg6[%c0_43, %c0_44] : memref<1x160xf32, #tpu.memory_space<vmem>>, vector<1x160xf32>
      %66 = vector.broadcast %65 : vector<1x160xf32> to vector<10x160xf32>
      %67 = arith.addf %64, %66 : vector<10x160xf32>
      %cst_45 = arith.constant 0.000000e+00 : f32
      %68 = vector.broadcast %cst_45 : f32 to vector<10x160xf32>
      %69 = arith.maximumf %67, %68 : vector<10x160xf32>
      %70 = vector.extract_strided_slice %69 {offsets = [0, 0], sizes = [9, 160], strides = [1, 1]} : vector<10x160xf32> to vector<9x160xf32>
      %71 = vector.extract_strided_slice %69 {offsets = [1, 0], sizes = [9, 160], strides = [1, 1]} : vector<10x160xf32> to vector<9x160xf32>
      %72 = arith.maximumf %70, %71 : vector<9x160xf32>
      %c0_46 = arith.constant 0 : index
      %c0_47 = arith.constant 0 : index
      %73 = vector.load %arg9[%c0_46, %c0_47] : memref<5x9xf32, #tpu.memory_space<vmem>>, vector<5x9xf32>
      %cst_48 = arith.constant dense<0.000000e+00> : vector<5x160xf32>
      %74 = tpu.matmul %73, %72, %cst_48 {dimension_numbers = #tpu.dot_dimension_numbers<[1], [0], [0], [1], [0, 0, 1, 1], [], []>} : vector<5x9xf32>, vector<9x160xf32>, vector<5x160xf32> -> vector<5x160xf32>
      %75 = vector.extract_strided_slice %74 {offsets = [0, 0], sizes = [5, 144], strides = [1, 1]} : vector<5x160xf32> to vector<5x144xf32>
      %76 = vector.extract_strided_slice %74 {offsets = [0, 16], sizes = [5, 144], strides = [1, 1]} : vector<5x160xf32> to vector<5x144xf32>
      %77 = arith.maximumf %75, %76 : vector<5x144xf32>
      %78 = vector.extract_strided_slice %40 {offsets = [0, 0], sizes = [10, 162], strides = [1, 1]} : vector<14x162xf32> to vector<10x162xf32>
      %c0_49 = arith.constant 0 : index
      %c0_50 = arith.constant 0 : index
      %c0_51 = arith.constant 0 : index
      %79 = vector.load %arg7[%c0_49, %c0_50, %c0_51] : memref<5x162x160xf32, #tpu.memory_space<vmem>>, vector<1x162x160xf32>
      %80 = vector.shape_cast %79 : vector<1x162x160xf32> to vector<162x160xf32>
      %cst_52 = arith.constant dense<0.000000e+00> : vector<10x160xf32>
      %81 = tpu.matmul %78, %80, %cst_52 {dimension_numbers = #tpu.dot_dimension_numbers<[1], [0], [0], [1], [0, 0, 1, 1], [], []>} : vector<10x162xf32>, vector<162x160xf32>, vector<10x160xf32> -> vector<10x160xf32>
      %82 = vector.extract_strided_slice %40 {offsets = [1, 0], sizes = [10, 162], strides = [1, 1]} : vector<14x162xf32> to vector<10x162xf32>
      %c1_53 = arith.constant 1 : index
      %c0_54 = arith.constant 0 : index
      %c0_55 = arith.constant 0 : index
      %83 = vector.load %arg7[%c1_53, %c0_54, %c0_55] : memref<5x162x160xf32, #tpu.memory_space<vmem>>, vector<1x162x160xf32>
      %84 = vector.shape_cast %83 : vector<1x162x160xf32> to vector<162x160xf32>
      %cst_56 = arith.constant dense<0.000000e+00> : vector<10x160xf32>
      %85 = tpu.matmul %82, %84, %cst_56 {dimension_numbers = #tpu.dot_dimension_numbers<[1], [0], [0], [1], [0, 0, 1, 1], [], []>} : vector<10x162xf32>, vector<162x160xf32>, vector<10x160xf32> -> vector<10x160xf32>
      %86 = arith.addf %81, %85 : vector<10x160xf32>
      %87 = vector.extract_strided_slice %40 {offsets = [2, 0], sizes = [10, 162], strides = [1, 1]} : vector<14x162xf32> to vector<10x162xf32>
      %c2_57 = arith.constant 2 : index
      %c0_58 = arith.constant 0 : index
      %c0_59 = arith.constant 0 : index
      %88 = vector.load %arg7[%c2_57, %c0_58, %c0_59] : memref<5x162x160xf32, #tpu.memory_space<vmem>>, vector<1x162x160xf32>
      %89 = vector.shape_cast %88 : vector<1x162x160xf32> to vector<162x160xf32>
      %cst_60 = arith.constant dense<0.000000e+00> : vector<10x160xf32>
      %90 = tpu.matmul %87, %89, %cst_60 {dimension_numbers = #tpu.dot_dimension_numbers<[1], [0], [0], [1], [0, 0, 1, 1], [], []>} : vector<10x162xf32>, vector<162x160xf32>, vector<10x160xf32> -> vector<10x160xf32>
      %91 = arith.addf %86, %90 : vector<10x160xf32>
      %92 = vector.extract_strided_slice %40 {offsets = [3, 0], sizes = [10, 162], strides = [1, 1]} : vector<14x162xf32> to vector<10x162xf32>
      %c3_61 = arith.constant 3 : index
      %c0_62 = arith.constant 0 : index
      %c0_63 = arith.constant 0 : index
      %93 = vector.load %arg7[%c3_61, %c0_62, %c0_63] : memref<5x162x160xf32, #tpu.memory_space<vmem>>, vector<1x162x160xf32>
      %94 = vector.shape_cast %93 : vector<1x162x160xf32> to vector<162x160xf32>
      %cst_64 = arith.constant dense<0.000000e+00> : vector<10x160xf32>
      %95 = tpu.matmul %92, %94, %cst_64 {dimension_numbers = #tpu.dot_dimension_numbers<[1], [0], [0], [1], [0, 0, 1, 1], [], []>} : vector<10x162xf32>, vector<162x160xf32>, vector<10x160xf32> -> vector<10x160xf32>
      %96 = arith.addf %91, %95 : vector<10x160xf32>
      %97 = vector.extract_strided_slice %40 {offsets = [4, 0], sizes = [10, 162], strides = [1, 1]} : vector<14x162xf32> to vector<10x162xf32>
      %c4_65 = arith.constant 4 : index
      %c0_66 = arith.constant 0 : index
      %c0_67 = arith.constant 0 : index
      %98 = vector.load %arg7[%c4_65, %c0_66, %c0_67] : memref<5x162x160xf32, #tpu.memory_space<vmem>>, vector<1x162x160xf32>
      %99 = vector.shape_cast %98 : vector<1x162x160xf32> to vector<162x160xf32>
      %cst_68 = arith.constant dense<0.000000e+00> : vector<10x160xf32>
      %100 = tpu.matmul %97, %99, %cst_68 {dimension_numbers = #tpu.dot_dimension_numbers<[1], [0], [0], [1], [0, 0, 1, 1], [], []>} : vector<10x162xf32>, vector<162x160xf32>, vector<10x160xf32> -> vector<10x160xf32>
      %101 = arith.addf %96, %100 : vector<10x160xf32>
      %c0_69 = arith.constant 0 : index
      %c0_70 = arith.constant 0 : index
      %102 = vector.load %arg8[%c0_69, %c0_70] : memref<1x160xf32, #tpu.memory_space<vmem>>, vector<1x160xf32>
      %103 = vector.broadcast %102 : vector<1x160xf32> to vector<10x160xf32>
      %104 = arith.addf %101, %103 : vector<10x160xf32>
      %cst_71 = arith.constant 0.000000e+00 : f32
      %105 = vector.broadcast %cst_71 : f32 to vector<10x160xf32>
      %106 = arith.maximumf %104, %105 : vector<10x160xf32>
      %107 = vector.extract_strided_slice %106 {offsets = [0, 0], sizes = [9, 160], strides = [1, 1]} : vector<10x160xf32> to vector<9x160xf32>
      %108 = vector.extract_strided_slice %106 {offsets = [1, 0], sizes = [9, 160], strides = [1, 1]} : vector<10x160xf32> to vector<9x160xf32>
      %109 = arith.maximumf %107, %108 : vector<9x160xf32>
      %c0_72 = arith.constant 0 : index
      %c0_73 = arith.constant 0 : index
      %110 = vector.load %arg9[%c0_72, %c0_73] : memref<5x9xf32, #tpu.memory_space<vmem>>, vector<5x9xf32>
      %cst_74 = arith.constant dense<0.000000e+00> : vector<5x160xf32>
      %111 = tpu.matmul %110, %109, %cst_74 {dimension_numbers = #tpu.dot_dimension_numbers<[1], [0], [0], [1], [0, 0, 1, 1], [], []>} : vector<5x9xf32>, vector<9x160xf32>, vector<5x160xf32> -> vector<5x160xf32>
      %112 = vector.extract_strided_slice %111 {offsets = [0, 0], sizes = [5, 144], strides = [1, 1]} : vector<5x160xf32> to vector<5x144xf32>
      %113 = vector.extract_strided_slice %111 {offsets = [0, 16], sizes = [5, 144], strides = [1, 1]} : vector<5x160xf32> to vector<5x144xf32>
      %114 = arith.maximumf %112, %113 : vector<5x144xf32>
      %115 = arith.addf %77, %114 : vector<5x144xf32>
      %116 = vector.extract_strided_slice %115 {offsets = [0, 0], sizes = [1, 144], strides = [1, 1]} : vector<5x144xf32> to vector<1x144xf32>
      %c0_75 = arith.constant 0 : index
      %c0_76 = arith.constant 0 : index
      %c0_77 = arith.constant 0 : index
      %117 = vector.load %arg10[%c0_75, %c0_76, %c0_77] : memref<5x144x120xf32, #tpu.memory_space<vmem>>, vector<1x144x120xf32>
      %118 = vector.shape_cast %117 : vector<1x144x120xf32> to vector<144x120xf32>
      %cst_78 = arith.constant dense<0.000000e+00> : vector<1x120xf32>
      %119 = tpu.matmul %116, %118, %cst_78 {dimension_numbers = #tpu.dot_dimension_numbers<[1], [0], [0], [1], [0, 0, 1, 1], [], []>} : vector<1x144xf32>, vector<144x120xf32>, vector<1x120xf32> -> vector<1x120xf32>
      %120 = vector.extract_strided_slice %115 {offsets = [1, 0], sizes = [1, 144], strides = [1, 1]} : vector<5x144xf32> to vector<1x144xf32>
      %c1_79 = arith.constant 1 : index
      %c0_80 = arith.constant 0 : index
      %c0_81 = arith.constant 0 : index
      %121 = vector.load %arg10[%c1_79, %c0_80, %c0_81] : memref<5x144x120xf32, #tpu.memory_space<vmem>>, vector<1x144x120xf32>
      %122 = vector.shape_cast %121 : vector<1x144x120xf32> to vector<144x120xf32>
      %cst_82 = arith.constant dense<0.000000e+00> : vector<1x120xf32>
      %123 = tpu.matmul %120, %122, %cst_82 {dimension_numbers = #tpu.dot_dimension_numbers<[1], [0], [0], [1], [0, 0, 1, 1], [], []>} : vector<1x144xf32>, vector<144x120xf32>, vector<1x120xf32> -> vector<1x120xf32>
      %124 = arith.addf %119, %123 : vector<1x120xf32>
      %125 = vector.extract_strided_slice %115 {offsets = [2, 0], sizes = [1, 144], strides = [1, 1]} : vector<5x144xf32> to vector<1x144xf32>
      %c2_83 = arith.constant 2 : index
      %c0_84 = arith.constant 0 : index
      %c0_85 = arith.constant 0 : index
      %126 = vector.load %arg10[%c2_83, %c0_84, %c0_85] : memref<5x144x120xf32, #tpu.memory_space<vmem>>, vector<1x144x120xf32>
      %127 = vector.shape_cast %126 : vector<1x144x120xf32> to vector<144x120xf32>
      %cst_86 = arith.constant dense<0.000000e+00> : vector<1x120xf32>
      %128 = tpu.matmul %125, %127, %cst_86 {dimension_numbers = #tpu.dot_dimension_numbers<[1], [0], [0], [1], [0, 0, 1, 1], [], []>} : vector<1x144xf32>, vector<144x120xf32>, vector<1x120xf32> -> vector<1x120xf32>
      %129 = arith.addf %124, %128 : vector<1x120xf32>
      %130 = vector.extract_strided_slice %115 {offsets = [3, 0], sizes = [1, 144], strides = [1, 1]} : vector<5x144xf32> to vector<1x144xf32>
      %c3_87 = arith.constant 3 : index
      %c0_88 = arith.constant 0 : index
      %c0_89 = arith.constant 0 : index
      %131 = vector.load %arg10[%c3_87, %c0_88, %c0_89] : memref<5x144x120xf32, #tpu.memory_space<vmem>>, vector<1x144x120xf32>
      %132 = vector.shape_cast %131 : vector<1x144x120xf32> to vector<144x120xf32>
      %cst_90 = arith.constant dense<0.000000e+00> : vector<1x120xf32>
      %133 = tpu.matmul %130, %132, %cst_90 {dimension_numbers = #tpu.dot_dimension_numbers<[1], [0], [0], [1], [0, 0, 1, 1], [], []>} : vector<1x144xf32>, vector<144x120xf32>, vector<1x120xf32> -> vector<1x120xf32>
      %134 = arith.addf %129, %133 : vector<1x120xf32>
      %135 = vector.extract_strided_slice %115 {offsets = [4, 0], sizes = [1, 144], strides = [1, 1]} : vector<5x144xf32> to vector<1x144xf32>
      %c4_91 = arith.constant 4 : index
      %c0_92 = arith.constant 0 : index
      %c0_93 = arith.constant 0 : index
      %136 = vector.load %arg10[%c4_91, %c0_92, %c0_93] : memref<5x144x120xf32, #tpu.memory_space<vmem>>, vector<1x144x120xf32>
      %137 = vector.shape_cast %136 : vector<1x144x120xf32> to vector<144x120xf32>
      %cst_94 = arith.constant dense<0.000000e+00> : vector<1x120xf32>
      %138 = tpu.matmul %135, %137, %cst_94 {dimension_numbers = #tpu.dot_dimension_numbers<[1], [0], [0], [1], [0, 0, 1, 1], [], []>} : vector<1x144xf32>, vector<144x120xf32>, vector<1x120xf32> -> vector<1x120xf32>
      %139 = arith.addf %134, %138 : vector<1x120xf32>
      %c0_95 = arith.constant 0 : index
      %c0_96 = arith.constant 0 : index
      %140 = vector.load %arg11[%c0_95, %c0_96] : memref<1x120xf32, #tpu.memory_space<vmem>>, vector<1x120xf32>
      %141 = arith.addf %139, %140 : vector<1x120xf32>
      %cst_97 = arith.constant 0.000000e+00 : f32
      %142 = vector.broadcast %cst_97 : f32 to vector<1x120xf32>
      %143 = arith.maximumf %141, %142 : vector<1x120xf32>
      %c0_98 = arith.constant 0 : index
      %c0_99 = arith.constant 0 : index
      %144 = vector.load %arg12[%c0_98, %c0_99] : memref<120x84xf32, #tpu.memory_space<vmem>>, vector<120x84xf32>
      %cst_100 = arith.constant dense<0.000000e+00> : vector<1x84xf32>
      %145 = tpu.matmul %143, %144, %cst_100 {dimension_numbers = #tpu.dot_dimension_numbers<[1], [0], [0], [1], [0, 0, 1, 1], [], []>} : vector<1x120xf32>, vector<120x84xf32>, vector<1x84xf32> -> vector<1x84xf32>
      %c0_101 = arith.constant 0 : index
      %c0_102 = arith.constant 0 : index
      %146 = vector.load %arg13[%c0_101, %c0_102] : memref<1x84xf32, #tpu.memory_space<vmem>>, vector<1x84xf32>
      %147 = arith.addf %145, %146 : vector<1x84xf32>
      %cst_103 = arith.constant 0.000000e+00 : f32
      %148 = vector.broadcast %cst_103 : f32 to vector<1x84xf32>
      %149 = arith.maximumf %147, %148 : vector<1x84xf32>
      %c0_104 = arith.constant 0 : index
      %c0_105 = arith.constant 0 : index
      %150 = vector.load %arg14[%c0_104, %c0_105] : memref<84x128xf32, #tpu.memory_space<vmem>>, vector<84x128xf32>
      %cst_106 = arith.constant dense<0.000000e+00> : vector<1x128xf32>
      %151 = tpu.matmul %149, %150, %cst_106 {dimension_numbers = #tpu.dot_dimension_numbers<[1], [0], [0], [1], [0, 0, 1, 1], [], []>} : vector<1x84xf32>, vector<84x128xf32>, vector<1x128xf32> -> vector<1x128xf32>
      %c0_107 = arith.constant 0 : index
      %c0_108 = arith.constant 0 : index
      %152 = vector.load %arg15[%c0_107, %c0_108] : memref<1x128xf32, #tpu.memory_space<vmem>>, vector<1x128xf32>
      %153 = arith.addf %151, %152 : vector<1x128xf32>
      %cst_109 = arith.constant dense<0xFF800000> : vector<1xf32>
      %154 = vector.multi_reduction <maximumf>, %153, %cst_109 [1] : vector<1x128xf32> to vector<1xf32>
      %155 = vector.shape_cast %154 : vector<1xf32> to vector<1x1xf32>
      %156 = vector.broadcast %155 : vector<1x1xf32> to vector<1x128xf32>
      %157 = arith.subf %153, %156 : vector<1x128xf32>
      %158 = math.exp %157 : vector<1x128xf32>
      %cst_110 = arith.constant dense<0.000000e+00> : vector<1xf32>
      %159 = vector.multi_reduction <add>, %158, %cst_110 [1] : vector<1x128xf32> to vector<1xf32>
      %160 = vector.shape_cast %159 : vector<1xf32> to vector<1x1xf32>
      %161 = math.log %160 : vector<1x1xf32>
      %162 = vector.broadcast %161 : vector<1x1xf32> to vector<1x128xf32>
      %163 = arith.subf %157, %162 : vector<1x128xf32>
      %164 = arith.index_cast %arg17 : i32 to index
      %c0_111 = arith.constant 0 : index
      %c0_112 = arith.constant 0 : index
      %165 = vector.load %arg16[%164, %c0_111, %c0_112] : memref<8x1x128xf32, #tpu.memory_space<vmem>>, vector<1x1x128xf32>
      %166 = vector.shape_cast %165 : vector<1x1x128xf32> to vector<1x128xf32>
      %167 = vector.shape_cast %163 : vector<1x128xf32> to vector<1x1x128xf32>
      tpu.vector_store %arg16[%164, %c0_111, %c0_112], %167 {strides = array<i32>} : memref<8x1x128xf32, #tpu.memory_space<vmem>>, vector<1x1x128xf32>,
    }
    %c8_i32_0 = arith.constant 8 : i32
    return
  }
  func.func @transform_0(%arg0: i32) -> (i32, i32, i32) {
    %c0_i32 = arith.constant 0 : i32
    %c0_i32_0 = arith.constant 0 : i32
    %c0_i32_1 = arith.constant 0 : i32
    return %arg0, %c0_i32, %c0_i32_0 : i32, i32, i32
  }
  func.func @transform_1(%arg0: i32) -> (i32, i32, i32) {
    %c0_i32 = arith.constant 0 : i32
    %c0_i32_0 = arith.constant 0 : i32
    %c0_i32_1 = arith.constant 0 : i32
    %c0_i32_2 = arith.constant 0 : i32
    return %c0_i32, %c0_i32_0, %c0_i32_1 : i32, i32, i32
  }
  func.func @transform_2(%arg0: i32) -> (i32, i32) {
    %c0_i32 = arith.constant 0 : i32
    %c0_i32_0 = arith.constant 0 : i32
    %c0_i32_1 = arith.constant 0 : i32
    return %c0_i32, %c0_i32_0 : i32, i32
  }
  func.func @transform_3(%arg0: i32) -> (i32, i32) {
    %c0_i32 = arith.constant 0 : i32
    %c0_i32_0 = arith.constant 0 : i32
    %c0_i32_1 = arith.constant 0 : i32
    return %c0_i32, %c0_i32_0 : i32, i32
  }
  func.func @transform_4(%arg0: i32) -> (i32, i32, i32) {
    %c0_i32 = arith.constant 0 : i32
    %c0_i32_0 = arith.constant 0 : i32
    %c0_i32_1 = arith.constant 0 : i32
    %c0_i32_2 = arith.constant 0 : i32
    return %c0_i32, %c0_i32_0, %c0_i32_1 : i32, i32, i32
  }
  func.func @transform_5(%arg0: i32) -> (i32, i32) {
    %c0_i32 = arith.constant 0 : i32
    %c0_i32_0 = arith.constant 0 : i32
    %c0_i32_1 = arith.constant 0 : i32
    return %c0_i32, %c0_i32_0 : i32, i32
  }
  func.func @transform_6(%arg0: i32) -> (i32, i32, i32) {
    %c0_i32 = arith.constant 0 : i32
    %c0_i32_0 = arith.constant 0 : i32
    %c0_i32_1 = arith.constant 0 : i32
    %c0_i32_2 = arith.constant 0 : i32
    return %c0_i32, %c0_i32_0, %c0_i32_1 : i32, i32, i32
  }
  func.func @transform_7(%arg0: i32) -> (i32, i32) {
    %c0_i32 = arith.constant 0 : i32
    %c0_i32_0 = arith.constant 0 : i32
    %c0_i32_1 = arith.constant 0 : i32
    return %c0_i32, %c0_i32_0 : i32, i32
  }
  func.func @transform_8(%arg0: i32) -> (i32, i32) {
    %c0_i32 = arith.constant 0 : i32
    %c0_i32_0 = arith.constant 0 : i32
    %c0_i32_1 = arith.constant 0 : i32
    return %c0_i32, %c0_i32_0 : i32, i32
  }
  func.func @transform_9(%arg0: i32) -> (i32, i32, i32) {
    %c0_i32 = arith.constant 0 : i32
    %c0_i32_0 = arith.constant 0 : i32
    %c0_i32_1 = arith.constant 0 : i32
    %c0_i32_2 = arith.constant 0 : i32
    return %c0_i32, %c0_i32_0, %c0_i32_1 : i32, i32, i32
  }
  func.func @transform_10(%arg0: i32) -> (i32, i32) {
    %c0_i32 = arith.constant 0 : i32
    %c0_i32_0 = arith.constant 0 : i32
    %c0_i32_1 = arith.constant 0 : i32
    return %c0_i32, %c0_i32_0 : i32, i32
  }
  func.func @transform_11(%arg0: i32) -> (i32, i32) {
    %c0_i32 = arith.constant 0 : i32
    %c0_i32_0 = arith.constant 0 : i32
    %c0_i32_1 = arith.constant 0 : i32
    return %c0_i32, %c0_i32_0 : i32, i32
  }
  func.func @transform_12(%arg0: i32) -> (i32, i32) {
    %c0_i32 = arith.constant 0 : i32
    %c0_i32_0 = arith.constant 0 : i32
    %c0_i32_1 = arith.constant 0 : i32
    return %c0_i32, %c0_i32_0 : i32, i32
  }
  func.func @transform_13(%arg0: i32) -> (i32, i32) {
    %c0_i32 = arith.constant 0 : i32
    %c0_i32_0 = arith.constant 0 : i32
    %c0_i32_1 = arith.constant 0 : i32
    return %c0_i32, %c0_i32_0 : i32, i32
  }
  func.func @transform_14(%arg0: i32) -> (i32, i32) {
    %c0_i32 = arith.constant 0 : i32
    %c0_i32_0 = arith.constant 0 : i32
    %c0_i32_1 = arith.constant 0 : i32
    return %c0_i32, %c0_i32_0 : i32, i32
  }
  func.func @transform_15(%arg0: i32) -> (i32, i32, i32) {
    %c0_i32 = arith.constant 0 : i32
    %c0_i32_0 = arith.constant 0 : i32
    %c0_i32_1 = arith.constant 0 : i32
    return %arg0, %c0_i32, %c0_i32_0 : i32, i32, i32
  }
}

</mosaic_0001>

<bundles_post_ra>
// kernel: lenet5_forward.1
= control target key start
LH: loop header
LB: loop body
LE: loop exit
PB: predicated region body
PF: predicated region fallthrough
CT: control target
= control target key end

     0   :  { %s7447_s0 = inlined_call_operand.vmem [shape: f32[16,32,32], index: 0, kind: input, shape index: {}]   ;;  %s7448_s1 = inlined_call_operand.vmem [shape: f32[5,32,168], index: 1, kind: input, shape index: {}]   ;;  %s7449_s2 = inlined_call_operand.vmem [shape: f32[1,168], index: 2, kind: input, shape index: {}]   ;;  %s7450_s3 = inlined_call_operand.vmem [shape: f32[14,27], index: 3, kind: input, shape index: {}]   ;;  %s7451_s4 = inlined_call_operand.vmem [shape: f32[5,162,160], index: 4, kind: input, shape index: {}]   ;;  %s7452_s5 = inlined_call_operand.vmem [shape: f32[1,160], index: 5, kind: input, shape index: {}]   ;;  %s7453_s6 = inlined_call_operand.vmem [shape: f32[5,162,160], index: 6, kind: input, shape index: {}]   ;;  %s7454_s7 = inlined_call_operand.vmem [shape: f32[1,160], index: 7, kind: input, shape index: {}]   ;;  %s7455_s8 = inlined_call_operand.vmem [shape: f32[5,9], index: 8, kind: input, shape index: {}]   ;;  %s7456_s9 = inlined_call_operand.vmem [shape: f32[5,144,120], index: 9, kind: input, shape index: {}]   ;;  %s7457_s10 = inlined_call_operand.vmem [shape: f32[1,120], index: 10, kind: input, shape index: {}]   ;;  %s7458_s11 = inlined_call_operand.vmem [shape: f32[120,84], index: 11, kind: input, shape index: {}]   ;;  %s7459_s12 = inlined_call_operand.vmem [shape: f32[1,84], index: 12, kind: input, shape index: {}]   ;;  %s7460_s13 = inlined_call_operand.vmem [shape: f32[84,128], index: 13, kind: input, shape index: {}]   ;;  %s7461_s14 = inlined_call_operand.vmem [shape: f32[1,128], index: 14, kind: input, shape index: {}]   ;;  %s7462_s15 = inlined_call_operand.hbm [shape: f32[16,1,128], index: 15, kind: output, shape index: {}]  }
   0x1   :  { %7470 = sst [smem:[#allocation11_spill]] %s7447_s0 }
   0x2   :  { %7471 = sst [smem:[#allocation12_spill]] %s7448_s1 }
   0x3   :  { %20 = vsyncpa [#allocation3], 0 }
   0x4   :  { %22 = vsyncpa [#allocation3 + $0x1], 0  ;;  %s5179_s18 = smov 0   ;;  %s5181_s19 = smov 0  }
   0x5   :  { %s5183_s20 = smov 0   ;;  %s5185_s21 = smov 0  }
   0x6 LB: > { %7472 = sst [smem:[#allocation5_spill]] %s5072_s18  ;;  %s5200_s22 = sadd.s32 4294967295, %s5084_s21   ;;  %s5084_s21 = sphi %s5185_s21, %s7490_s21   ;;  %s5080_s20 = sphi %s5183_s20, %s7492_s20   ;;  %s5076_s19 = sphi %s5181_s19, %s7494_s19   ;;  %s5072_s18 = sphi %s5179_s18, %s7493_s18  }
   0x7   : > { %7473 = sst [smem:[#allocation6_spill]] %s5080_s20  ;;  %s3637_s23 = sadd.s32 4294967294, %s5084_s21  }
   0x8   : > { %7474 = sst [smem:[#allocation7_spill]] %s5084_s21  ;;  %s5204_s24 = sadd.s32 1, %s5084_s21  }
   0x9   : > { %7475 = sst [smem:[#allocation8_spill]] %s5204_s24  ;;  %s355_s25 = sadd.s32 1, %s5080_s20 }
   0xa   : > { %s352_s26 = ssub.s32 %s5084_s21, %s5204_s24  ;;  %p365_p0 = scmp.ne.s32.totalorder %s5080_s20, %s5076_s19 }
   0xb   : > { %p353_p1 = scmp.eq.s32.totalorder %s352_s26, 0  ;;  %p366_p2 = scmp.eq.s32.totalorder %s5200_s22, 1 }
   0xc   : > { %p371_p3 = scmp.ne.s32.totalorder %s5076_s19, %s5072_s18  ;;  %p372_p4 = scmp.eq.s32.totalorder %s3637_s23, 1 }
   0xd   : > { %s5215_s27 = scalar_select %p353_p1, %s5080_s20, %s355_s25  }
   0xe   : > { %p5217_p5 = por %p366_p2, %p365_p0  ;;  %p5221_p6 = por %p372_p4, %p371_p3 }
   0xf   : > { %7476 = sst [smem:[#allocation9_spill]] %s5215_s27  ;;  %p3640_p7 = scmp.ge.s32.totalorder %s5084_s21, 1 }
  0x10   : > { %s7478_s29 = scalar_select %p5221_p6, 1, 0 }
  0x11   : > { %p442_p8 = scmp.lt.s32.totalorder %s5084_s21, 3 }
  0x12   : > { %7479 = sst [smem:[#allocation10_spill]] %s7478_s29 }
  0x13   : > { %p443_p9 = pnand %p3640_p7, %p442_p8 }
  0x14   : > { %s7467_s30 = sand.u32 (!%p443_p9), 1, %s5076_s19   ;;  %s3642_s16 = sshll.u32 (!%p443_p9), %s5200_s22, 3 }
  0x15   : > { %446 = sbr.rel (%p443_p9) target bundleno = 2925 (0xb6d), region = 80  ;;  %s5231_s17 = sshll.u32 (!%p443_p9), %s7467_s30, 3 }
  0x16   : > { %p492_p10 = scmp.lt.s32.totalorder (!%p443_p9), %s3642_s16, 15  ;;  %s7480_s0 = sld [smem:[#allocation11_spill]] (!%p443_p9) }
  0x17   : > { %s5239_s24 = smov (!%p443_p9), 0  }
  0x1c   : > { %s7496_s16 = smov (!%p492_p10, %s3642_s16), 15 }
  0x1d   : > { %s4169_s23 = sshll.u32 %s7496_s16, 5 }
  0x1e   : > { %s5236_s27 = scalar_lea.vmem %s7480_s0, %s4169_s23 }
  0x1f LB: >> { %s7481_s1 = sld [smem:[#allocation12_spill]]  ;;  %v5090_v7 = vmov 0.0   ;;  %s3645_s25 = sshll.u32 %s5088_s24, 5  ;;  %vm532_vm0 = vcmask 1046528   ;;  %vm540_vm1 = vcmask 261120   ;;  %vm988_vm2 = vcmask 1043456   ;;  %s5088_s24 = sphi %s5239_s24, %s504_s24  }
  0x20   : >> { %613 = vmatprep.mubr.f32.mxu0 %v5090_v7  ;;  %s506_s26 = scalar_lea.vmem %s5236_s27, %s3645_s25  ;;  %vm744_vm3 = vcmask 1045504   ;;  %vm866_vm4 = vcmask 1044480   ;;  %vm1176_vm5 = vcmask 1042432   ;;  %vm5091_vm6 = vmmov 1   ;;  %s7484_s16 = scalar_lea.vmem [#allocation2], %s5231_s17 }
  0x21   : >> { %v5277_v15 = vld [vmem:[%s506_s26] sm:$0xff]  ;;  %v5279_v16 = vld [vmem:[%s506_s26 + $0x8] sm:$0xff]  ;;  %v5283_v19 = vld [vmem:[%s506_s26 + $0x10] sm:$0xff]  ;;  %vm1169_vm8 = vcmask 220160   ;;  %vm1385_vm9 = vcmask 1041408   ;;  %vm1272_vm10 = vcmask 998400   ;;  %s3551_s23 = scalar_lea.vmem %s7484_s16, %s5088_s24 [#allocation2] }
  0x22   : >> { %v533_v17 = vrot.slane %v5277_v15, 1  ;;  %v534_v18 = vrot.slane %v5279_v16, 1  ;;  %v536_v26 = vrot.slane %v5283_v19, 1  ;;  %v5299_v28 = vld [vmem:[%s506_s26 + $0x18] sm:$0xff]  ;;  %v989_v34 = vrot.slane %v5277_v15, 4  ;;  %vm4302_vm7 = vmpackc.low %vm1176_vm5, %vm5091_vm6  ;;  %s5092_s26 = smov 122  }
  0x23   : >> { %v538_v36 = vrot.slane %v5299_v28, 1  ;;  %v990_v38 = vrot.slane %v5279_v16, 4  ;;  %v992_v40 = vrot.slane %v5283_v19, 4  ;;  %v994_v42 = vrot.slane %v5299_v28, 4  ;;  %s504_s24 = sadd.s32 1, %s5088_s24  }
  0x24   : >> { %v535_v25 = vsel %vm532_vm0, %v533_v17, %v534_v18  ;;  %v537_v35 = vsel %vm532_vm0, %v534_v18, %v536_v26  ;;  %v745_v58 = vrot.slane %v5277_v15, 2  ;;  %v746_v59 = vrot.slane %v5279_v16, 2  ;;  %p501_p11 = scmp.ge.s32.totalorder %s504_s24, 8  }
  0x25   : >> { %v3647_v0 = vld [vmem:[%s7481_s1 + $0x48] sm:$0xff]  ;;  %v3649_v1 = vld [vmem:[%s7481_s1 + $0x58] sm:$0xff]  ;;  %v3646_v2 = vld [vmem:[%s7481_s1 + $0x40] sm:$0xff]  ;;  %v5321_v41 = vsel %vm988_vm2, %v989_v34, %v990_v38  ;;  %v5326_v43 = vsel %vm988_vm2, %v990_v38, %v992_v40  ;;  %v539_v44 = vsel %vm532_vm0, %v536_v26, %v538_v36  ;;  %v5333_v45 = vsel %vm988_vm2, %v992_v40, %v994_v42  ;;  %s4170_s20 = sshll.u32 (%p501_p11), %s5200_s22, 7  ;;  %s7485_s21 = scalar_lea.vmem (%p501_p11), [#allocation2], %s5231_s17 }
  0x26   : >> { %v4257_v3 = vpack.c.bf16 %v3649_v1, %v3647_v0  ;;  %v3648_v4 = vld [vmem:[%s7481_s1 + $0x50] sm:$0xff]  ;;  %v3651_v5 = vld [vmem:[%s7481_s1 + $0x68] sm:$0xff]  ;;  %v3653_v6 = vld [vmem:[%s7481_s1 + $0x78] sm:$0xff]  ;;  %v747_v0 = vsel %vm744_vm3, %v745_v58, %v746_v59  ;;  %v748_v1 = vrot.slane %v5283_v19, 2  ;;  %v868_v17 = vrot.slane %v5279_v16, 3  ;;  %s7398_s0 = scalar_lea.hbm (%p501_p11), %s7462_s15, %s4170_s20  ;;  %s7486_s29 = sand.u32 (%p501_p11), 1, %s5076_s19  }
  0x27   : >> { %v4259_v8 = vpack.c.bf16 %v3648_v4, %v3646_v2  ;;  %v4261_v9 = vpack.c.bf16 %v3653_v6, %v3651_v5  ;;  %v3650_v10 = vld [vmem:[%s7481_s1 + $0x60] sm:$0xff]  ;;  %v3652_v11 = vld [vmem:[%s7481_s1 + $0x70] sm:$0xff]  ;;  %v512_v12 = vld [vmem:[%s7481_s1 + $0x8] sm:$0xff]  ;;  %vm1380_vm11 = vcmask 277504   ;;  %vm2025_vm12 = vcmask 1040384   ;;  %s7406_s24 = scalar_lea.sflag (%p501_p11), [#allocation3], %s7486_s29 }
  0x28   : >> { %4258 = vmatprep.subr.bf16.mxu0 %v4257_v3  ;;  %v514_v13 = vld [vmem:[%s7481_s1 + $0x18] sm:$0xff]  ;;  %v4263_v14 = vpack.c.bf16 %v3652_v11, %v3650_v10  ;;  %v511_v21 = vld [vmem:[%s7481_s1] sm:$0xff]  ;;  %v513_v22 = vld [vmem:[%s7481_s1 + $0x10] sm:$0xff]  ;;  %v750_v10 = vrot.slane %v5299_v28, 2  ;;  %vm2021_vm14 = vcmask 72704   ;;  %vm2109_vm15 = vcmask 916480  }
  0x29   : >> { %4260 = vmatpush1.bf16.msra.mxu0 %v4259_v8  ;;  %v4265_v20 = vpack.c.bf16 %v514_v13, %v512_v12  ;;  %v516_v23 = vld [vmem:[%s7481_s1 + $0x28] sm:$0xff]  ;;  %v518_v24 = vld [vmem:[%s7481_s1 + $0x38] sm:$0xff]  ;;  %v4267_v27 = vpack.c.bf16 %v513_v22, %v511_v21  ;;  %v515_v30 = vld [vmem:[%s7481_s1 + $0x20] sm:$0xff]  ;;  %s5096_s22 = smov (%p501_p11), [#allocation2]  }
  0x2a   : >> { %4262 = vmatprep.subr.bf16.mxu0 %v4261_v9  ;;  %v4269_v29 = vpack.c.bf16 %v518_v24, %v516_v23  ;;  %v517_v31 = vld [vmem:[%s7481_s1 + $0x30] sm:$0xff]  ;;  %v3663_v32 = vld [vmem:[%s7481_s1 + $0x88] sm:$0xff]  ;;  %v3665_v33 = vld [vmem:[%s7481_s1 + $0x98] sm:$0xff]  ;;  %v749_v9 = vsel %vm744_vm3, %v746_v59, %v748_v1  ;;  %v751_v13 = vsel %vm744_vm3, %v748_v1, %v750_v10  ;;  %s5022_s30 = sshll.u32 (%p501_p11), %s5096_s22, 4  ;;  %s5023_s30 = int_to_ptr.vmem [resolvable:$false] %s5022_s30 }
  0x2b   : >> { %v4271_v37 = vpack.c.bf16 %v517_v31, %v515_v30  ;;  %v4273_v39 = vpack.c.bf16 %v3665_v33, %v3663_v32  ;;  %v3662_v46 = vld [vmem:[%s7481_s1 + $0x80] sm:$0xff]  ;;  %v3664_v47 = vld [vmem:[%s7481_s1 + $0x90] sm:$0xff]  ;;  %v3667_v48 = vld [vmem:[%s7481_s1 + $0xa8] sm:$0xff]  ;;  %v1103_v31 = vlaneseq  ;;  %s5024_s18 = scalar_lea.vmem (%p501_p11), %s5023_s30, 256 }
  0x2c   : >> { %v3669_v49 = vld [vmem:[%s7481_s1 + $0xb8] sm:$0xff]  ;;  %v4275_v50 = vpack.c.bf16 %v3664_v47, %v3662_v46  ;;  %v3666_v52 = vld [vmem:[%s7481_s1 + $0xa0] sm:$0xff]  ;;  %v3668_v53 = vld [vmem:[%s7481_s1 + $0xb0] sm:$0xff] }
  0x2d   : >> { %4264 = vmatpush1.bf16.msra.mxu0 %v4263_v14  ;;  %v4277_v51 = vpack.c.bf16 %v3669_v49, %v3667_v48  ;;  %v3675_v54 = vld [vmem:[%s7481_s1 + $0xc8] sm:$0xff]  ;;  %v3677_v55 = vld [vmem:[%s7481_s1 + $0xd8] sm:$0xff]  ;;  %v4279_v56 = vpack.c.bf16 %v3668_v53, %v3666_v52  ;;  %v3674_v60 = vld [vmem:[%s7481_s1 + $0xc0] sm:$0xff]  ;;  %v867_v14 = vrot.slane %v5277_v15, 3  ;;  %v1104_v32 = vshrl.u32 %v1103_v31, 7 }
  0x2e   : >> { %4266 = vmatprep.subr.bf16.mxu0 %v4265_v20  ;;  %v4281_v57 = vpack.c.bf16 %v3677_v55, %v3675_v54  ;;  %v3676_v61 = vld [vmem:[%s7481_s1 + $0xd0] sm:$0xff]  ;;  %v3679_v62 = vld [vmem:[%s7481_s1 + $0xe8] sm:$0xff]  ;;  %v3681_v63 = vld [vmem:[%s7481_s1 + $0xf8] sm:$0xff] }
  0x2f   : >> { %v4283_v2 = vpack.c.bf16 %v3676_v61, %v3674_v60  ;;  %v4285_v3 = vpack.c.bf16 %v3681_v63, %v3679_v62  ;;  %v3678_v4 = vld [vmem:[%s7481_s1 + $0xe0] sm:$0xff]  ;;  %v3680_v5 = vld [vmem:[%s7481_s1 + $0xf0] sm:$0xff]  ;;  %v3687_v6 = vld [vmem:[%s7481_s1 + $0x108] sm:$0xff]  ;;  %v5460_v33 = vsub.s32 0, %v1104_v32 }
  0x30   : >> { %3654 = vmatmul.mubr.msk.f32.vlgmr.msra.gmra.mrb[0].mxu0 %vm540_vm1, %v535_v25  ;;  %v3689_v8 = vld [vmem:[%s7481_s1 + $0x118] sm:$0xff]  ;;  %v4287_v11 = vpack.c.bf16 %v3680_v5, %v3678_v4  ;;  %v3686_v18 = vld [vmem:[%s7481_s1 + $0x100] sm:$0xff]  ;;  %v3688_v20 = vld [vmem:[%s7481_s1 + $0x110] sm:$0xff] }
  0x31   : >> { %619 = vmatprep.mubr.f32.mxu0 %v5090_v7  ;;  %4268 = vmatpush1.bf16.msra.mxu0 %v4267_v27  ;;  %v4289_v12 = vpack.c.bf16 %v3689_v8, %v3687_v6  ;;  %v3691_v21 = vld [vmem:[%s7481_s1 + $0x128] sm:$0xff]  ;;  %v3693_v22 = vld [vmem:[%s7481_s1 + $0x138] sm:$0xff]  ;;  %v4291_v23 = vpack.c.bf16 %v3688_v20, %v3686_v18  ;;  %v3690_v25 = vld [vmem:[%s7481_s1 + $0x120] sm:$0xff] }
  0x32   : >> { %4270 = vmatprep.subr.bf16.mxu0 %v4269_v29  ;;  %v4293_v24 = vpack.c.bf16 %v3693_v22, %v3691_v21  ;;  %v3692_v26 = vld [vmem:[%s7481_s1 + $0x130] sm:$0xff]  ;;  %v872_v29 = vrot.slane %v5299_v28, 3  ;;  %v1101_v34 = vld [vmem:[%s7449_s2] sm:$0x3]  ;;  %vm6242_vm13 = vmpackc.low %vm2025_vm12, %vm5091_vm6  ;;  %s5093_s1 = smov 112  }
  0x33   : >> { %v3704_v31 = vld [vmem:[%s7451_s4 + $0x160] sm:$0xff] }
  0x34   : >> { %3655 = vmatmul.mubr.msk.f32.gmra.mrb[2].mxu0 %vm540_vm1, %v537_v35  ;;  %v5465_v35 = vsub.s32 1, %v1104_v32  ;;  %v3707_v32 = vld [vmem:[%s7451_s4 + $0x178] sm:$0xff] }
  0x35   : >> { %625 = vmatprep.mubr.f32.mxu0 %v5090_v7  ;;  %4272 = vmatpush1.bf16.msra.mxu0 %v4271_v37 }
  0x36   : >> { %4274 = vmatprep.subr.bf16.mxu0 %v4273_v39  ;;  %v1110_v37 = vrot.slane %v1101_v34, %v5465_v35 }
  0x38   : >> { %3656 = vmatmul.mubr.msk.f32.gmra.mrb[4].mxu0 %vm540_vm1, %v539_v44 }
  0x39   : >> { %631 = vmatprep.mubr.f32.mxu0 %v5090_v7 }
  0x3c   : >> { %3657 = vmatmul.mubr.msk.f32.gmra.mrb[6].mxu0 %vm540_vm1, %v538_v36  ;;  %v1106_v36 = vrot.slane %v1101_v34, %v5460_v33  ;;  %v3709_v34 = vld [vmem:[%s7451_s4 + $0x188] sm:$0xff] }
  0x3d   : >> { %710 = vmatprep.mubr.f32.mxu0 %v5090_v7 }
  0x40   : >> { %3658 = vmatmul.mubr.msk.f32.vlgmr.msra.gmra.mrb[0].mxu0 %vm540_vm1, %v5277_v15  ;;  %v869_v15 = vsel %vm866_vm4, %v867_v14, %v868_v17 }
  0x41   : >> { %716 = vmatprep.mubr.f32.mxu0 %v5090_v7  ;;  %4276 = vmatpush1.bf16.msra.mxu0 %v4275_v50 }
  0x42   : >> { %4278 = vmatprep.subr.bf16.mxu0 %v4277_v51 }
  0x44   : >> { %3659 = vmatmul.mubr.msk.f32.gmra.mrb[2].mxu0 %vm540_vm1, %v5279_v16  ;;  %v870_v16 = vrot.slane %v5283_v19, 3 }
  0x45   : >> { %722 = vmatprep.mubr.f32.mxu0 %v5090_v7  ;;  %4280 = vmatpush1.bf16.msra.mxu0 %v4279_v56 }
  0x46   : >> { %4282 = vmatprep.subr.bf16.mxu0 %v4281_v57  ;;  %v871_v27 = vsel %vm866_vm4, %v868_v17, %v870_v16  ;;  %v873_v30 = vsel %vm866_vm4, %v870_v16, %v872_v29 }
  0x48   : >> { %3660 = vmatmul.mubr.msk.f32.gmra.mrb[4].mxu0 %vm540_vm1, %v5283_v19  ;;  %v4295_v19 = vpack.c.bf16 %v3692_v26, %v3690_v25  ;;  %v1167_v25 = vld [vmem:[%s7450_s3] sm:$0xff]  ;;  %v1168_v26 = vld [vmem:[%s7450_s3 + $0x8] sm:$0x3f] }
  0x49   : >> { %728 = vmatprep.mubr.f32.mxu0 %v5090_v7 }
  0x4c   : >> { %3661 = vmatmul.mubr.msk.f32.gmra.mrb[6].mxu0 %vm540_vm1, %v5299_v28 }
  0x4d   : >> { %824 = vmatprep.mubr.f32.mxu0 %v5090_v7 }
  0x50   : >> { %3670 = vmatmul.mubr.msk.f32.vlgmr.msra.gmra.mrb[0].mxu0 %vm540_vm1, %v747_v0 }
  0x51   : >> { %830 = vmatprep.mubr.f32.mxu0 %v5090_v7  ;;  %4284 = vmatpush1.bf16.msra.mxu0 %v4283_v2 }
  0x52   : >> { %4286 = vmatprep.subr.bf16.mxu0 %v4285_v3 }
  0x54   : >> { %3671 = vmatmul.mubr.msk.f32.gmra.mrb[2].mxu0 %vm540_vm1, %v749_v9 }
  0x55   : >> { %836 = vmatprep.mubr.f32.mxu0 %v5090_v7  ;;  %4288 = vmatpush1.bf16.msra.mxu0 %v4287_v11 }
  0x56   : >> { %4290 = vmatprep.subr.bf16.mxu0 %v4289_v12 }
  0x58   : >> { %3672 = vmatmul.mubr.msk.f32.gmra.mrb[4].mxu0 %vm540_vm1, %v751_v13 }
  0x59   : >> { %842 = vmatprep.mubr.f32.mxu0 %v5090_v7 }
  0x5c   : >> { %3673 = vmatmul.mubr.msk.f32.gmra.mrb[6].mxu0 %vm540_vm1, %v750_v10 }
  0x5d   : >> { %946 = vmatprep.mubr.f32.mxu0 %v5090_v7 }
  0x60   : >> { %3682 = vmatmul.mubr.msk.f32.vlgmr.msra.gmra.mrb[0].mxu0 %vm540_vm1, %v869_v15 }
  0x61   : >> { %952 = vmatprep.mubr.f32.mxu0 %v5090_v7  ;;  %4292 = vmatpush1.bf16.msra.mxu0 %v4291_v23 }
  0x62   : >> { %4294 = vmatprep.subr.bf16.mxu0 %v4293_v24 }
  0x64   : >> { %3683 = vmatmul.mubr.msk.f32.gmra.mrb[2].mxu0 %vm540_vm1, %v871_v27  ;;  %v3703_v27 = vld [vmem:[%s7451_s4 + $0x158] sm:$0xff] }
  0x65   : >> { %958 = vmatprep.mubr.f32.mxu0 %v5090_v7  ;;  %4296 = vmatpush1.bf16.msra.mxu0 %v4295_v19  ;;  %v3702_v19 = vld [vmem:[%s7451_s4 + $0x150] sm:$0xff] }
  0x68   : >> { %3684 = vmatmul.mubr.msk.f32.gmra.mrb[4].mxu0 %vm540_vm1, %v873_v30 }
  0x69   : >> { %964 = vmatprep.mubr.f32.mxu0 %v5090_v7 }
  0x6c   : >> { %3685 = vmatmul.mubr.msk.f32.gmra.mrb[6].mxu0 %vm540_vm1, %v872_v29  ;;  %v3705_v29 = vld [vmem:[%s7451_s4 + $0x168] sm:$0xff] }
  0x6d   : >> { %1068 = vmatprep.mubr.f32.mxu0 %v5090_v7  ;;  %v4307_v30 = vpack.c.bf16 %v3705_v29, %v3703_v27  ;;  %v3742_v27 = vld [vmem:[%s7451_s4 + $0x290] sm:$0x3] }
  0x6f   : >> { %4308 = vmatprep.subr.bf16.mxu1 %v4307_v30  ;;  %v1286_v30 = vld [vmem:[%s7451_s4 + $0x18] sm:$0xff] }
  0x70   : >> { %3694 = vmatmul.mubr.msk.f32.vlgmr.msra.gmra.mrb[0].mxu0 %vm540_vm1, %v5321_v41 }
  0x71   : >> { %1074 = vmatprep.mubr.f32.mxu0 %v5090_v7 }
  0x74   : >> { %3695 = vmatmul.mubr.msk.f32.gmra.mrb[2].mxu0 %vm540_vm1, %v5326_v43 }
  0x75   : >> { %1080 = vmatprep.mubr.f32.mxu0 %v5090_v7 }
  0x78   : >> { %3696 = vmatmul.mubr.msk.f32.gmra.mrb[4].mxu0 %vm540_vm1, %v5333_v45 }
  0x79   : >> { %1086 = vmatprep.mubr.f32.mxu0 %v5090_v7 }
  0x7c   : >> { %3697 = vmatmul.mubr.msk.f32.gmra.mrb[6].mxu0 %vm540_vm1, %v994_v42  ;;  %vm5095_vm1 = vmmov 0  }
  0x7d   : >> { %1247 = vmatprep.mubr.f32.mxu0 %v5090_v7 }
 0x143   : >> { %v1070_v38 = vpop.f32.mrb[0].mxu0 }
 0x144   : >> { %v1113_v28 = vadd.f32 %v1106_v36, %v1070_v38  ;;  %v1072_v39 = vpop.f32.mrb[1].mxu0  ;;  %v3706_v38 = vld [vmem:[%s7451_s4 + $0x170] sm:$0xff] }
 0x145   : >> { %v1114_v40 = vadd.f32 %v1110_v37, %v1072_v39  ;;  %v3711_v39 = vld [vmem:[%s7451_s4 + $0x198] sm:$0xff] }
 0x146   : >> { %v1121_v42 = vmax.f32 %v1113_v28, 0.0  ;;  %v3708_v28 = vld [vmem:[%s7451_s4 + $0x180] sm:$0xff] }
 0x147   : >> { %v1076_v41 = vpop.f32.mrb[2].mxu0  ;;  %v1122_v45 = vmax.f32 %v1114_v40, 0.0  ;;  %v3713_v40 = vld [vmem:[%s7451_s4 + $0x1a8] sm:$0xff] }
 0x148   : >> { %v1115_v43 = vadd.f32 %v1106_v36, %v1076_v41  ;;  %v1078_v44 = vpop.f32.mrb[3].mxu0  ;;  %v1137_v50 = vrot.slane %v1121_v42, 1  ;;  %v4313_v41 = vpack.c.bf16 %v3708_v28, %v3706_v38 }
 0x149   : >> { %v1116_v46 = vadd.f32 %v1110_v37, %v1078_v44  ;;  %v1140_v54 = vrot.slane %v1122_v45, 1  ;;  %v3712_v44 = vld [vmem:[%s7451_s4 + $0x1a0] sm:$0xff] }
 0x14a   : >> { %v1123_v47 = vmax.f32 %v1115_v43, 0.0  ;;  %v3710_v43 = vld [vmem:[%s7451_s4 + $0x190] sm:$0xff] }
 0x14b   : >> { %v1124_v48 = vmax.f32 %v1116_v46, 0.0  ;;  %v1082_v49 = vpop.f32.mrb[4].mxu0  ;;  %v3717_v46 = vld [vmem:[%s7451_s4 + $0x1c8] sm:$0xff] }
 0x14c   : >> { %v1138_v51 = vrot.slane %v1123_v47, 1  ;;  %v1117_v52 = vadd.f32 %v1106_v36, %v1082_v49  ;;  %v1084_v53 = vpop.f32.mrb[5].mxu0  ;;  %v3714_v49 = vld [vmem:[%s7451_s4 + $0x1b0] sm:$0xff] }
 0x14d   : >> { %v1141_v55 = vrot.slane %v1124_v48, 1  ;;  %v1118_v56 = vadd.f32 %v1110_v37, %v1084_v53 }
 0x14e   : >> { %v1139_v57 = vsel %vm532_vm0, %v1137_v50, %v1138_v51  ;;  %v1125_v58 = vmax.f32 %v1117_v52, 0.0  ;;  %v3716_v50 = vld [vmem:[%s7451_s4 + $0x1c0] sm:$0xff]  ;;  %v3721_v52 = vld [vmem:[%s7451_s4 + $0x1e8] sm:$0xff] }
 0x14f   : >> { %v1159_v59 = vmax.f32 %v1121_v42, %v1139_v57  ;;  %v1126_v60 = vmax.f32 %v1118_v56, 0.0  ;;  %v1088_v61 = vpop.f32.mrb[6].mxu0  ;;  %v1142_v62 = vsel %vm532_vm0, %v1140_v54, %v1141_v55  ;;  %v4315_v42 = vpack.c.bf16 %v3713_v40, %v3711_v39  ;;  %v3720_v56 = vld [vmem:[%s7451_s4 + $0x1e0] sm:$0xff]  ;;  %v3723_v57 = vld [vmem:[%s7451_s4 + $0x1f8] sm:$0xff] }
 0x150   : >> { %v1143_v63 = vrot.slane %v1125_v58, 1  ;;  %v1119_v0 = vadd.f32 %v1106_v36, %v1088_v61  ;;  %v1090_v1 = vpop.f32.mrb[7].mxu0  ;;  %v1160_v2 = vmax.f32 %v1122_v45, %v1142_v62  ;;  %v4309_v36 = vpack.c.bf16 %v3704_v31, %v3702_v19  ;;  %v3715_v45 = vld [vmem:[%s7451_s4 + $0x1b8] sm:$0xff]  ;;  %v3722_v61 = vld [vmem:[%s7451_s4 + $0x1f0] sm:$0xff]  ;;  %v3724_v62 = vld [vmem:[%s7451_s4 + $0x200] sm:$0xff] }
 0x151   : >> { %v1145_v3 = vrot.slane %v1126_v60, 1  ;;  %v1120_v4 = vadd.f32 %v1110_v37, %v1090_v1  ;;  %v4311_v37 = vpack.c.bf16 %v3709_v34, %v3707_v32  ;;  %v4321_v53 = vpack.c.bf16 %v3716_v50, %v3714_v49  ;;  %v1284_v19 = vld [vmem:[%s7451_s4 + $0x8] sm:$0xff] }
 0x152   : >> { %v1144_v5 = vsel %vm532_vm0, %v1138_v51, %v1143_v63  ;;  %v1127_v6 = vmax.f32 %v1119_v0, 0.0  ;;  %4310 = vmatpush1.bf16.msra.mxu1 %v4309_v36  ;;  %v3719_v51 = vld [vmem:[%s7451_s4 + $0x1d8] sm:$0xff]  ;;  %v3729_v0 = vld [vmem:[%s7451_s4 + $0x228] sm:$0xff]  ;;  %v4329_v1 = vpack.c.bf16 %v3724_v62, %v3722_v61  ;;  %v4347_v32 = vpack.c.bf16 %v1286_v30, %v1284_v19  ;;  %v1309_v19 = vld [vmem:[%s7451_s4 + $0xd0] sm:$0xff] }
 0x153   : >> { %v1161_v8 = vmax.f32 %v1123_v47, %v1144_v5  ;;  %v1128_v9 = vmax.f32 %v1120_v4, 0.0  ;;  %v1146_v10 = vsel %vm532_vm0, %v1141_v55, %v1145_v3  ;;  %4312 = vmatprep.subr.bf16.mxu1 %v4311_v37  ;;  %v4317_v47 = vpack.c.bf16 %v3712_v44, %v3710_v43  ;;  %v3718_v55 = vld [vmem:[%s7451_s4 + $0x1d0] sm:$0xff]  ;;  %v3728_v4 = vld [vmem:[%s7451_s4 + $0x220] sm:$0xff]  ;;  %v3731_v5 = vld [vmem:[%s7451_s4 + $0x238] sm:$0xff] }
 0x154   : >> { %v1147_v11 = vrot.slane %v1127_v6, 1  ;;  %v1162_v12 = vmax.f32 %v1124_v48, %v1146_v10  ;;  %v4319_v48 = vpack.c.bf16 %v3717_v46, %v3715_v45  ;;  %v4323_v54 = vpack.c.bf16 %v3721_v52, %v3719_v51  ;;  %v3730_v10 = vld [vmem:[%s7451_s4 + $0x230] sm:$0xff]  ;;  %v1288_v50 = vld [vmem:[%s7451_s4 + $0x28] sm:$0xff]  ;;  %v1290_v51 = vld [vmem:[%s7451_s4 + $0x38] sm:$0xff] }
 0x155   : >> { %v1149_v13 = vrot.slane %v1128_v9, 1  ;;  %v4299_v14 = vpack.c.bf16 %v1161_v8, %v1159_v59  ;;  %v4325_v59 = vpack.c.bf16 %v3720_v56, %v3718_v55  ;;  %v1292_v62 = vld [vmem:[%s7451_s4 + $0x48] sm:$0xff] }
 0x156   : >> { %v1148_v17 = vsel %vm532_vm0, %v1143_v63, %v1147_v11  ;;  %v1165_v18 = vmax.f32 %v1127_v6, %v1147_v11  ;;  %v4297_v20 = vpack.c.bf16 %v1162_v12, %v1160_v2  ;;  %4314 = vmatpush1.bf16.msra.mxu1 %v4313_v41  ;;  %v3727_v63 = vld [vmem:[%s7451_s4 + $0x218] sm:$0xff]  ;;  %v3733_v6 = vld [vmem:[%s7451_s4 + $0x248] sm:$0xff]  ;;  %v3732_v11 = vld [vmem:[%s7451_s4 + $0x240] sm:$0xff] }
 0x157   : >> { %v1163_v21 = vmax.f32 %v1125_v58, %v1148_v17  ;;  %v1150_v22 = vsel %vm532_vm0, %v1145_v3, %v1149_v13  ;;  %v1166_v15 = vmax.f32 %v1128_v9, %v1149_v13  ;;  %4316 = vmatprep.subr.bf16.mxu1 %v4315_v42  ;;  %v3725_v58 = vld [vmem:[%s7451_s4 + $0x208] sm:$0xff]  ;;  %v4331_v2 = vpack.c.bf16 %v3729_v0, %v3727_v63  ;;  %v3726_v3 = vld [vmem:[%s7451_s4 + $0x210] sm:$0xff]  ;;  %v3735_v13 = vld [vmem:[%s7451_s4 + $0x258] sm:$0xff] }
 0x158   : >> { %v1164_v16 = vmax.f32 %v1126_v60, %v1150_v22  ;;  %4298 = vmatprep.subr.bf16.mxu0 %v4297_v20  ;;  %v4327_v60 = vpack.c.bf16 %v3725_v58, %v3723_v57  ;;  %v4333_v8 = vpack.c.bf16 %v3728_v4, %v3726_v3  ;;  %v4335_v9 = vpack.c.bf16 %v3733_v6, %v3731_v5  ;;  %v3736_v20 = vld [vmem:[%s7451_s4 + $0x260] sm:$0xff]  ;;  %v3739_v22 = vld [vmem:[%s7451_s4 + $0x278] sm:$0xff]  ;;  %v1293_v3 = vld [vmem:[%s7451_s4 + $0x50] sm:$0xff] }
 0x159   : >> { %v4304_v23 = vpack.c.bf16 %v1165_v18, %v1163_v21  ;;  %4300 = vmatpush1.bf16.msra.mxu0 %v4299_v14  ;;  %v4337_v12 = vpack.c.bf16 %v3732_v11, %v3730_v10  ;;  %v3737_v14 = vld [vmem:[%s7451_s4 + $0x268] sm:$0xff]  ;;  %v3734_v18 = vld [vmem:[%s7451_s4 + $0x250] sm:$0xff]  ;;  %v4351_v58 = vpack.c.bf16 %v1290_v51, %v1288_v50  ;;  %v1294_v63 = vld [vmem:[%s7451_s4 + $0x58] sm:$0xff] }
 0x15a   : >> { %v4301_v24 = vpack.c.bf16 %v1166_v15, %v1164_v16  ;;  %4318 = vmatpush1.bf16.msra.mxu1 %v4317_v47  ;;  %v4339_v17 = vpack.c.bf16 %v3737_v14, %v3735_v13  ;;  %v4341_v21 = vpack.c.bf16 %v3736_v20, %v3734_v18  ;;  %v3741_v15 = vld [vmem:[%s7451_s4 + $0x288] sm:$0xff]  ;;  %v1283_v47 = vld [vmem:[%s7451_s4] sm:$0xff]  ;;  %v1298_v5 = vld [vmem:[%s7451_s4 + $0x78] sm:$0xff] }
 0x15b   : >> { %4320 = vmatprep.subr.bf16.mxu1 %v4319_v48  ;;  %v4343_v16 = vpack.c.bf16 %v3741_v15, %v3739_v22  ;;  %v1285_v48 = vld [vmem:[%s7451_s4 + $0x10] sm:$0xff]  ;;  %v1296_v4 = vld [vmem:[%s7451_s4 + $0x68] sm:$0xff]  ;;  %v1319_v51 = vld [vmem:[%s7451_s4 + $0x120] sm:$0xff] }
 0x15c   : >> { %4303 = vmatprep.subr.msk.bf16.mxu0 %vm4302_vm7, %v4301_v24  ;;  %v3740_v24 = vld [vmem:[%s7451_s4 + $0x280] sm:$0xff]  ;;  %v4349_v56 = vpack.c.bf16 %v1285_v48, %v1283_v47  ;;  %v1297_v10 = vld [vmem:[%s7451_s4 + $0x70] sm:$0xff]  ;;  %v1300_v11 = vld [vmem:[%s7451_s4 + $0x88] sm:$0xff] }
 0x15d   : >> { %4306 = vmatpush1.bf16.msk.msra.mxu0 %vm4302_vm7, %v4304_v23  ;;  %v3738_v23 = vld [vmem:[%s7451_s4 + $0x270] sm:$0xff]  ;;  %v1304_v20 = vld [vmem:[%s7451_s4 + $0xa8] sm:$0xff]  ;;  %v1322_v47 = vld [vmem:[%s7451_s4 + $0x138] sm:$0xff] }
 0x15e   : >> { %4322 = vmatpush1.bf16.msra.mxu1 %v4321_v53  ;;  %v1301_v18 = vld [vmem:[%s7451_s4 + $0x90] sm:$0xff]  ;;  %v1312_v30 = vld [vmem:[%s7451_s4 + $0xe8] sm:$0xff] }
 0x15f   : >> { %4324 = vmatprep.subr.bf16.mxu1 %v4323_v54 }
 0x160   : >> { %3700 = vmatmul.mubr.msk.f32.vlgmr.msra.gmra.mrb[8].mxu0 %vm1169_vm8, %v1167_v25  ;;  %v4345_v25 = vpack.c.bf16 %v3740_v24, %v3738_v23  ;;  %v1305_v23 = vld [vmem:[%s7451_s4 + $0xb0] sm:$0xff]  ;;  %v1308_v24 = vld [vmem:[%s7451_s4 + $0xc8] sm:$0xff] }
 0x161   : >> { %1253 = vmatprep.mubr.f32.mxu0 %v5090_v7 }
 0x162   : >> { %4326 = vmatpush1.bf16.msra.mxu1 %v4325_v59  ;;  %v1287_v59 = vld [vmem:[%s7451_s4 + $0x20] sm:$0xff] }
 0x163   : >> { %4328 = vmatprep.subr.bf16.mxu1 %v4327_v60  ;;  %v1289_v60 = vld [vmem:[%s7451_s4 + $0x30] sm:$0xff] }
 0x164   : >> { %3701 = vmatmul.mubr.msk.f32.gmra.mrb[10].mxu0 %vm1169_vm8, %v1168_v26  ;;  %v3743_v26 = vld [vmem:[%s7451_s4 + $0x298] sm:$0x3]  ;;  %v4353_v0 = vpack.c.bf16 %v1289_v60, %v1287_v59  ;;  %v3752_v60 = vld [vmem:[%s7451_s4 + $0x2a0] sm:$0xff] }
 0x165   : >> { %2096 = vmatprep.mubr.f32.mxu0 %v5090_v7  ;;  %v3755_v59 = vld [vmem:[%s7451_s4 + $0x2b8] sm:$0xff] }
 0x166   : >> { %4330 = vmatpush1.bf16.msra.mxu1 %v4329_v1  ;;  %v4355_v1 = vpack.c.bf16 %v1294_v63, %v1292_v62  ;;  %v3754_v62 = vld [vmem:[%s7451_s4 + $0x2b0] sm:$0xff]  ;;  %v3757_v63 = vld [vmem:[%s7451_s4 + $0x2c8] sm:$0xff] }
 0x167   : >> { %4332 = vmatprep.subr.bf16.mxu1 %v4331_v2  ;;  %v1291_v2 = vld [vmem:[%s7451_s4 + $0x40] sm:$0xff] }
 0x168   : >> { %v4357_v6 = vpack.c.bf16 %v1293_v3, %v1291_v2  ;;  %v4389_v3 = vpack.c.bf16 %v3754_v62, %v3752_v60  ;;  %v3784_v60 = vld [vmem:[%s7451_s4 + $0x3a0] sm:$0xff]  ;;  %v3786_v62 = vld [vmem:[%s7451_s4 + $0x3b0] sm:$0xff] }
 0x16a   : >> { %4334 = vmatpush1.bf16.msra.mxu1 %v4333_v8  ;;  %v4359_v8 = vpack.c.bf16 %v1298_v5, %v1296_v4  ;;  %v3756_v5 = vld [vmem:[%s7451_s4 + $0x2c0] sm:$0xff] }
 0x16b   : >> { %4336 = vmatprep.subr.bf16.mxu1 %v4335_v9  ;;  %v1295_v9 = vld [vmem:[%s7451_s4 + $0x60] sm:$0xff] }
 0x16c   : >> { %v4361_v13 = vpack.c.bf16 %v1297_v10, %v1295_v9  ;;  %v3763_v9 = vld [vmem:[%s7451_s4 + $0x2f8] sm:$0xff] }
 0x16e   : >> { %4338 = vmatpush1.bf16.msra.mxu1 %v4337_v12  ;;  %v1302_v12 = vld [vmem:[%s7451_s4 + $0x98] sm:$0xff] }
 0x16f   : >> { %4340 = vmatprep.subr.bf16.mxu1 %v4339_v17  ;;  %v4363_v14 = vpack.c.bf16 %v1302_v12, %v1300_v11  ;;  %v1299_v17 = vld [vmem:[%s7451_s4 + $0x80] sm:$0xff] }
 0x170   : >> { %v4365_v22 = vpack.c.bf16 %v1301_v18, %v1299_v17  ;;  %v3762_v17 = vld [vmem:[%s7451_s4 + $0x2f0] sm:$0xff]  ;;  %v3765_v18 = vld [vmem:[%s7451_s4 + $0x308] sm:$0xff] }
 0x172   : >> { %4342 = vmatpush1.bf16.msra.mxu1 %v4341_v21  ;;  %v1306_v21 = vld [vmem:[%s7451_s4 + $0xb8] sm:$0xff] }
 0x173   : >> { %4344 = vmatprep.subr.bf16.mxu1 %v4343_v16  ;;  %v4367_v15 = vpack.c.bf16 %v1306_v21, %v1304_v20  ;;  %v1303_v16 = vld [vmem:[%s7451_s4 + $0xa0] sm:$0xff]  ;;  %v3767_v20 = vld [vmem:[%s7451_s4 + $0x318] sm:$0xff] }
 0x176   : >> { %4346 = vmatpush1.bf16.msra.mxu1 %v4345_v25  ;;  %v1310_v25 = vld [vmem:[%s7451_s4 + $0xd8] sm:$0xff] }
 0x177   : >> { %3744 = vmatprep.subr.msk.mxu1 %vm1385_vm9, %v3743_v26  ;;  %v4369_v26 = vpack.c.bf16 %v1305_v23, %v1303_v16  ;;  %v3764_v16 = vld [vmem:[%s7451_s4 + $0x300] sm:$0xff]  ;;  %v3766_v23 = vld [vmem:[%s7451_s4 + $0x310] sm:$0xff] }
 0x17a   : >> { %3745 = vmatpush1.msk.msra.mxu1 %vm1385_vm9, %v3742_v27  ;;  %v4371_v27 = vpack.c.bf16 %v1310_v25, %v1308_v24  ;;  %v3769_v24 = vld [vmem:[%s7451_s4 + $0x328] sm:$0xff]  ;;  %v3771_v25 = vld [vmem:[%s7451_s4 + $0x338] sm:$0xff] }
 0x17b   : >> { %4348 = vmatprep.subr.bf16.mxu1 %v4347_v32 }
 0x233   : >> { %v1249_v29 = vpop.f32.mrb[8].mxu0 }
 0x234   : >> { %v1251_v31 = vpop.f32.mrb[9].mxu0 }
 0x237   : >> { %v1255_v34 = vpop.f32.mrb[10].mxu0 }
 0x238   : >> { %v1257_v36 = vpop.f32.mrb[11].mxu0  ;;  %v5009_v37 = vpack.i.bf16 %v1255_v34, %v1249_v29 }
 0x239   : >> { %1270 = vrot.lane.b32.xlu1 %v1257_v36, %s5092_s26 }
 0x23a   : >> { %5010 = vrot.lane.b32.xlu0 %v5009_v37, %s5092_s26  ;;  %v1313_v37 = vld [vmem:[%s7451_s4 + $0xf0] sm:$0xff] }
 0x23e   : >> { %1266 = vrot.lane.b32.xlu0 %v1251_v31, %s5092_s26  ;;  %s3567_s26 = sshll.u32 (%p501_p11), %s7485_s21, 4  ;;  %s7402_s26 = int_to_ptr.vmem [resolvable:$true] %s3567_s26 }
 0x23f   : > { %s5018_s27 = scalar_lea.vmem (%p501_p11), %s7402_s26, 128  ;;  %p5025_p1 = scmp.lt.s32.totalorder (%p501_p11), %s7402_s26, %s5023_s30 }
 0x240   : > { %p5019_p12 = scmp.ne.s32.totalorder (%p501_p11), %s7402_s26, %s5018_s27  ;;  %p5026_p2 = scmp.lt.s32.totalorder (%p501_p11), %s5024_s18, %s5018_s27 }
 0x242   : > { %p5020_p13 = pnand (%p501_p11), %p5019_p12, %p5217_p5  ;;  %p5027_p3 = por (%p501_p11), %p5026_p2, %p5025_p1 }
 0x244   : > { %p5021_p0 = pneg (%p501_p11), %p5020_p13 }
 0x246   : > { %p5028_p4 = pnand (%p501_p11), %p5027_p3, %p5021_p0 }
 0x2ab   : >> { %v1271_v38 = vpop.permute.xlu1 %1270 }
 0x2ac   : >> { %v5011_v28 = vpop.permute.xlu0 %5010  ;;  %v5618_v40 = vmax.f32 %v1257_v36, %v1271_v38  ;;  %v1311_v36 = vld [vmem:[%s7451_s4 + $0xe0] sm:$0xff] }
 0x2ad   : >> { %v5013_v39 = vunpack.i.h.bf16 %v5011_v28  ;;  %v5012_v41 = vunpack.i.l.bf16 %v5011_v28  ;;  %v1318_v28 = vld [vmem:[%s7451_s4 + $0x118] sm:$0xff] }
 0x2ae   : >> { %v5640_v53 = vrot.slane %v5618_v40, 1  ;;  %v5807_v12 = vrot.slane %v5618_v40, 2 }
 0x2af   : >> { %v1274_v42 = vsel %vm1272_vm10, %v5013_v39, %v1271_v38  ;;  %v1316_v38 = vld [vmem:[%s7451_s4 + $0x108] sm:$0xff]  ;;  %v4377_v39 = vpack.c.bf16 %v1313_v37, %v1311_v36  ;;  %v3772_v36 = vld [vmem:[%s7451_s4 + $0x340] sm:$0xff]  ;;  %v3774_v37 = vld [vmem:[%s7451_s4 + $0x350] sm:$0xff] }
 0x2b0   : >> { %v1267_v43 = vpop.permute.xlu0 %1266  ;;  %v5620_v44 = vmax.f32 %v1255_v34, %v1274_v42  ;;  %v1315_v42 = vld [vmem:[%s7451_s4 + $0x100] sm:$0xff] }
 0x2b1   : >> { %v1273_v45 = vsel %vm1272_vm10, %v5012_v41, %v1267_v43  ;;  %v5622_v46 = vmax.f32 %v1251_v31, %v1267_v43  ;;  %v1314_v31 = vld [vmem:[%s7451_s4 + $0xf8] sm:$0xff]  ;;  %v4379_v41 = vpack.c.bf16 %v1318_v28, %v1316_v38  ;;  %v1317_v43 = vld [vmem:[%s7451_s4 + $0x110] sm:$0xff]  ;;  %v3777_v38 = vld [vmem:[%s7451_s4 + $0x368] sm:$0xff] }
 0x2b2   : >> { %v5630_v49 = vmax.f32 %v1249_v29, %v1273_v45  ;;  %v5644_v55 = vrot.slane %v5620_v44, 1  ;;  %v1307_v29 = vld [vmem:[%s7451_s4 + $0xc0] sm:$0xff]  ;;  %v4375_v34 = vpack.c.bf16 %v1314_v31, %v1312_v30  ;;  %v1320_v45 = vld [vmem:[%s7451_s4 + $0x128] sm:$0xff]  ;;  %v4381_v48 = vpack.c.bf16 %v1317_v43, %v1315_v42  ;;  %v3775_v31 = vld [vmem:[%s7451_s4 + $0x358] sm:$0xff] }
 0x2b3   : >> { %v1375_v52 = vrot.slane %v5622_v46, 1  ;;  %v4373_v32 = vpack.c.bf16 %v1309_v19, %v1307_v29  ;;  %v4383_v50 = vpack.c.bf16 %v1322_v47, %v1320_v45  ;;  %v1602_v10 = vrot.slane %v5622_v46, 2  ;;  %v3768_v29 = vld [vmem:[%s7451_s4 + $0x320] sm:$0xff]  ;;  %v3770_v19 = vld [vmem:[%s7451_s4 + $0x330] sm:$0xff]  ;;  %v3773_v30 = vld [vmem:[%s7451_s4 + $0x348] sm:$0xff] }
 0x2b4   : >> { %v1372_v54 = vrot.slane %v5630_v49, 1  ;;  %v3779_v28 = vld [vmem:[%s7451_s4 + $0x378] sm:$0xff]  ;;  %v3776_v42 = vld [vmem:[%s7451_s4 + $0x360] sm:$0xff]  ;;  %v3778_v43 = vld [vmem:[%s7451_s4 + $0x370] sm:$0xff] }
 0x2b5   : >> { %v5648_v57 = vsel %vm532_vm0, %v1375_v52, %v5640_v53  ;;  %v1321_v52 = vld [vmem:[%s7451_s4 + $0x130] sm:$0xff]  ;;  %v5824_v21 = vsel %vm744_vm3, %v1602_v10, %v5807_v12  ;;  %v3781_v45 = vld [vmem:[%s7451_s4 + $0x388] sm:$0xff]  ;;  %v3783_v47 = vld [vmem:[%s7451_s4 + $0x398] sm:$0xff] }
 0x2b6   : >> { %3746 = vmatprep.mubr.msk.f32.mxu1 %vm1380_vm11, %v5648_v57  ;;  %v5660_v61 = vsel %vm532_vm0, %v1372_v54, %v5644_v55  ;;  %v4385_v54 = vpack.c.bf16 %v1321_v52, %v1319_v51  ;;  %v3780_v51 = vld [vmem:[%s7451_s4 + $0x380] sm:$0xff]  ;;  %v3782_v52 = vld [vmem:[%s7451_s4 + $0x390] sm:$0xff] }
 0x2b7   : >> { %1457 = vmatmul.mubr.f32.vlgmr.msra.gmra.mrb[0].mxu1 %v5660_v61  ;;  %v3798_v10 = vld [vmem:[%s7451_s4 + $0x3f0] sm:$0xff] }
 0x2b8   : >> { %4350 = vmatpush1.bf16.msra.mxu1 %v4349_v56  ;;  %3747 = vmatprep.mubr.msk.f32.mxu1 %vm1380_vm11, %v5640_v53  ;;  %v1324_v56 = vld [vmem:[%s7451_s4 + $0x148] sm:$0x3] }
 0x2b9   : >> { %4352 = vmatprep.subr.bf16.mxu1 %v4351_v58  ;;  %v3753_v58 = vld [vmem:[%s7451_s4 + $0x2a8] sm:$0xff] }
 0x2ba   : >> { %v4387_v2 = vpack.c.bf16 %v3755_v59, %v3753_v58  ;;  %v4417_v58 = vpack.c.bf16 %v3782_v52, %v3780_v51  ;;  %v3816_v51 = vld [vmem:[%s7451_s4 + $0x480] sm:$0xff]  ;;  %v3819_v52 = vld [vmem:[%s7451_s4 + $0x498] sm:$0xff] }
 0x2bb   : >> { %1463 = vmatmul.mubr.f32.gmra.mrb[2].mxu1 %v5644_v55 }
 0x2bc   : >> { %4354 = vmatpush1.bf16.msra.mxu1 %v4353_v0  ;;  %3750 = vmatprep.mubr.msk.f32.mxu1 %vm1380_vm11, %v5622_v46  ;;  %v3759_v0 = vld [vmem:[%s7451_s4 + $0x2d8] sm:$0xff] }
 0x2bd   : >> { %4356 = vmatprep.subr.bf16.mxu1 %v4355_v1  ;;  %v1323_v1 = vld [vmem:[%s7451_s4 + $0x140] sm:$0x3]  ;;  %v4391_v4 = vpack.c.bf16 %v3759_v0, %v3757_v63  ;;  %v3789_v63 = vld [vmem:[%s7451_s4 + $0x3c8] sm:$0xff]  ;;  %v3791_v0 = vld [vmem:[%s7451_s4 + $0x3d8] sm:$0xff] }
 0x2c0   : >> { %4358 = vmatpush1.bf16.msra.mxu1 %v4357_v6  ;;  %v3758_v6 = vld [vmem:[%s7451_s4 + $0x2d0] sm:$0xff] }
 0x2c1   : >> { %4360 = vmatprep.subr.bf16.mxu1 %v4359_v8  ;;  %v3761_v8 = vld [vmem:[%s7451_s4 + $0x2e8] sm:$0xff]  ;;  %v4393_v11 = vpack.c.bf16 %v3758_v6, %v3756_v5 }
 0x2c2   : >> { %v3793_v6 = vld [vmem:[%s7451_s4 + $0x3e8] sm:$0x3] }
 0x2c4   : >> { %4362 = vmatpush1.bf16.msra.mxu1 %v4361_v13  ;;  %v4395_v13 = vpack.c.bf16 %v3763_v9, %v3761_v8  ;;  %v3799_v8 = vld [vmem:[%s7451_s4 + $0x3f8] sm:$0xff]  ;;  %v3801_v9 = vld [vmem:[%s7451_s4 + $0x408] sm:$0xff] }
 0x2c5   : >> { %4364 = vmatprep.subr.bf16.mxu1 %v4363_v14  ;;  %v3760_v14 = vld [vmem:[%s7451_s4 + $0x2e0] sm:$0xff] }
 0x2c8   : >> { %4366 = vmatpush1.bf16.msra.mxu1 %v4365_v22  ;;  %v4397_v22 = vpack.c.bf16 %v3762_v17, %v3760_v14  ;;  %v3803_v14 = vld [vmem:[%s7451_s4 + $0x418] sm:$0xff]  ;;  %v3805_v17 = vld [vmem:[%s7451_s4 + $0x428] sm:$0xff] }
 0x2c9   : >> { %4368 = vmatprep.subr.bf16.mxu1 %v4367_v15  ;;  %v4399_v15 = vpack.c.bf16 %v3767_v20, %v3765_v18  ;;  %v3792_v18 = vld [vmem:[%s7451_s4 + $0x3e0] sm:$0x3]  ;;  %v4427_v20 = vpack.c.bf16 %v3801_v9, %v3799_v8  ;;  %v3826_v9 = vld [vmem:[%s7451_s4 + $0x4d0] sm:$0xff] }
 0x2cc   : >> { %4370 = vmatpush1.bf16.msra.mxu1 %v4369_v26  ;;  %v4401_v26 = vpack.c.bf16 %v3766_v23, %v3764_v16  ;;  %v4431_v16 = vpack.c.bf16 %v3805_v17, %v3803_v14  ;;  %v3802_v23 = vld [vmem:[%s7451_s4 + $0x410] sm:$0xff] }
 0x2cd   : >> { %4372 = vmatprep.subr.bf16.mxu1 %v4371_v27  ;;  %v4403_v27 = vpack.c.bf16 %v3771_v25, %v3769_v24  ;;  %v3804_v24 = vld [vmem:[%s7451_s4 + $0x420] sm:$0xff] }
 0x2d0   : >> { %4374 = vmatpush1.bf16.msra.mxu1 %v4373_v32  ;;  %v4405_v32 = vpack.c.bf16 %v3770_v19, %v3768_v29  ;;  %v1744_v29 = vrot.slane %v5622_v46, 3  ;;  %v4433_v19 = vpack.c.bf16 %v3804_v24, %v3802_v23 }
 0x2d1   : >> { %4376 = vmatprep.subr.bf16.mxu1 %v4375_v34  ;;  %v4407_v34 = vpack.c.bf16 %v3775_v31, %v3773_v30  ;;  %v5957_v30 = vrot.slane %v5618_v40, 3 }
 0x2d4   : >> { %4378 = vmatpush1.bf16.msra.mxu1 %v4377_v39  ;;  %v4409_v39 = vpack.c.bf16 %v3774_v37, %v3772_v36  ;;  %v3811_v36 = vld [vmem:[%s7451_s4 + $0x458] sm:$0xff]  ;;  %v3813_v37 = vld [vmem:[%s7451_s4 + $0x468] sm:$0xff] }
 0x2d5   : >> { %4380 = vmatprep.subr.bf16.mxu1 %v4379_v41  ;;  %v4411_v41 = vpack.c.bf16 %v3779_v28, %v3777_v38  ;;  %v5974_v38 = vsel %vm866_vm4, %v1744_v29, %v5957_v30 }
 0x2d8   : >> { %4382 = vmatpush1.bf16.msra.mxu1 %v4381_v48  ;;  %v4413_v48 = vpack.c.bf16 %v3778_v43, %v3776_v42  ;;  %v3812_v42 = vld [vmem:[%s7451_s4 + $0x460] sm:$0xff]  ;;  %v3815_v43 = vld [vmem:[%s7451_s4 + $0x478] sm:$0xff] }
 0x2d9   : >> { %4384 = vmatprep.subr.bf16.mxu1 %v4383_v50  ;;  %v4415_v50 = vpack.c.bf16 %v3783_v47, %v3781_v45  ;;  %v3817_v45 = vld [vmem:[%s7451_s4 + $0x488] sm:$0xff] }
 0x2dc   : >> { %4386 = vmatpush1.bf16.msra.mxu1 %v4385_v54  ;;  %v3785_v54 = vld [vmem:[%s7451_s4 + $0x3a8] sm:$0xff] }
 0x2dd   : >> { %3748 = vmatprep.subr.msk.mxu1 %vm1385_vm9, %v1324_v56  ;;  %v3787_v56 = vld [vmem:[%s7451_s4 + $0x3b8] sm:$0xff] }
 0x2de   : >> { %v4419_v59 = vpack.c.bf16 %v3787_v56, %v3785_v54  ;;  %v3821_v54 = vld [vmem:[%s7451_s4 + $0x4a8] sm:$0xff] }
 0x2e0   : >> { %3749 = vmatpush1.msk.msra.mxu1 %vm1385_vm9, %v1323_v1  ;;  %v4421_v1 = vpack.c.bf16 %v3786_v62, %v3784_v60  ;;  %v3820_v60 = vld [vmem:[%s7451_s4 + $0x4a0] sm:$0xff]  ;;  %v3823_v62 = vld [vmem:[%s7451_s4 + $0x4b8] sm:$0xff] }
 0x2e1   : >> { %1544 = vmatmul.mubr.f32.vlgmr.msra.gmra.mrb[0].mxu1 %v5630_v49  ;;  %4388 = vmatprep.subr.bf16.mxu1 %v4387_v2  ;;  %v4423_v2 = vpack.c.bf16 %v3791_v0, %v3789_v63  ;;  %v3825_v63 = vld [vmem:[%s7451_s4 + $0x4c8] sm:$0xff] }
 0x2e2   : >> { %3751 = vmatprep.mubr.msk.f32.mxu1 %vm1380_vm11, %v5618_v40  ;;  %4390 = vmatpush1.bf16.msra.mxu1 %v4389_v3  ;;  %v3788_v3 = vld [vmem:[%s7451_s4 + $0x3c0] sm:$0xff] }
 0x2e3   : >> { %4392 = vmatprep.subr.bf16.mxu1 %v4391_v4  ;;  %v3790_v4 = vld [vmem:[%s7451_s4 + $0x3d0] sm:$0xff] }
 0x2e4   : >> { %v4425_v5 = vpack.c.bf16 %v3790_v4, %v3788_v3  ;;  %v3824_v3 = vld [vmem:[%s7451_s4 + $0x4c0] sm:$0xff]  ;;  %v3827_v4 = vld [vmem:[%s7451_s4 + $0x4d8] sm:$0xff] }
 0x2e5   : >> { %1550 = vmatmul.mubr.f32.gmra.mrb[2].mxu1 %v5620_v44 }
 0x2e6   : >> { %4394 = vmatpush1.bf16.msra.mxu1 %v4393_v11  ;;  %3796 = vmatprep.mubr.msk.f32.mxu1 %vm1380_vm11, %v5824_v21  ;;  %v3800_v11 = vld [vmem:[%s7451_s4 + $0x400] sm:$0xff] }
 0x2e7   : >> { %4396 = vmatprep.subr.bf16.mxu1 %v4395_v13  ;;  %v1599_v13 = vrot.slane %v5630_v49, 2 }
 0x2ea   : >> { %4398 = vmatpush1.bf16.msra.mxu1 %v4397_v22  ;;  %v5933_v22 = vrot.slane %v5620_v44, 2 }
 0x2eb   : >> { %4400 = vmatprep.subr.bf16.mxu1 %v4399_v15  ;;  %v4429_v15 = vpack.c.bf16 %v3800_v11, %v3798_v10  ;;  %v3828_v10 = vld [vmem:[%s7451_s4 + $0x4e0] sm:$0xff]  ;;  %v3831_v11 = vld [vmem:[%s7451_s4 + $0x4f8] sm:$0xff] }
 0x2ec   : >> { %v5944_v25 = vsel %vm744_vm3, %v1599_v13, %v5933_v22  ;;  %v3833_v13 = vld [vmem:[%s7451_s4 + $0x508] sm:$0xff]  ;;  %v4457_v14 = vpack.c.bf16 %v3828_v10, %v3826_v9  ;;  %v3863_v9 = vld [vmem:[%s7451_s4 + $0x5d8] sm:$0xff]  ;;  %vm3375_vm3 = vcmask 982016  }
 0x2ed   : >> { %v4459_v17 = vpack.c.bf16 %v3833_v13, %v3831_v11  ;;  %v3860_v13 = vld [vmem:[%s7451_s4 + $0x5c0] sm:$0xff] }
 0x2ee   : >> { %4402 = vmatpush1.bf16.msra.mxu1 %v4401_v26  ;;  %v3807_v26 = vld [vmem:[%s7451_s4 + $0x438] sm:$0xff] }
 0x2ef   : >> { %4404 = vmatprep.subr.bf16.mxu1 %v4403_v27  ;;  %v3809_v27 = vld [vmem:[%s7451_s4 + $0x448] sm:$0xff] }
 0x2f0   : >> { %v4435_v31 = vpack.c.bf16 %v3809_v27, %v3807_v26  ;;  %v3834_v26 = vld [vmem:[%s7451_s4 + $0x510] sm:$0xff]  ;;  %v3836_v27 = vld [vmem:[%s7451_s4 + $0x520] sm:$0xff] }
 0x2f1   : >> { %v4465_v29 = vpack.c.bf16 %v3836_v27, %v3834_v26  ;;  %v3871_v26 = vld [vmem:[%s7451_s4 + $0x618] sm:$0xff] }
 0x2f2   : >> { %4406 = vmatpush1.bf16.msra.mxu1 %v4405_v32  ;;  %v3806_v32 = vld [vmem:[%s7451_s4 + $0x430] sm:$0xff] }
 0x2f3   : >> { %4408 = vmatprep.subr.bf16.mxu1 %v4407_v34  ;;  %v3808_v34 = vld [vmem:[%s7451_s4 + $0x440] sm:$0xff] }
 0x2f4   : >> { %v4437_v28 = vpack.c.bf16 %v3808_v34, %v3806_v32  ;;  %v3847_v32 = vld [vmem:[%s7451_s4 + $0x558] sm:$0xff]  ;;  %v3844_v34 = vld [vmem:[%s7451_s4 + $0x540] sm:$0xff] }
 0x2f6   : >> { %4410 = vmatpush1.bf16.msra.mxu1 %v4409_v39  ;;  %v4439_v39 = vpack.c.bf16 %v3813_v37, %v3811_v36  ;;  %v3846_v36 = vld [vmem:[%s7451_s4 + $0x550] sm:$0xff]  ;;  %v1741_v37 = vrot.slane %v5630_v49, 3 }
 0x2f7   : >> { %4412 = vmatprep.subr.bf16.mxu1 %v4411_v41  ;;  %v3810_v41 = vld [vmem:[%s7451_s4 + $0x450] sm:$0xff] }
 0x2f8   : >> { %v4441_v47 = vpack.c.bf16 %v3812_v42, %v3810_v41  ;;  %v3838_v41 = vld [vmem:[%s7451_s4 + $0x530] sm:$0x3] }
 0x2fa   : >> { %4414 = vmatpush1.bf16.msra.mxu1 %v4413_v48  ;;  %v4443_v48 = vpack.c.bf16 %v3817_v45, %v3815_v43  ;;  %v6083_v43 = vrot.slane %v5620_v44, 3  ;;  %v4469_v45 = vpack.c.bf16 %v3846_v36, %v3844_v34  ;;  %v3875_v34 = vld [vmem:[%s7451_s4 + $0x638] sm:$0xff] }
 0x2fb   : >> { %4416 = vmatprep.subr.bf16.mxu1 %v4415_v50  ;;  %v3814_v50 = vld [vmem:[%s7451_s4 + $0x470] sm:$0xff] }
 0x2fc   : >> { %v4445_v56 = vpack.c.bf16 %v3816_v51, %v3814_v50  ;;  %v3850_v50 = vld [vmem:[%s7451_s4 + $0x570] sm:$0xff]  ;;  %v6094_v51 = vsel %vm866_vm4, %v1741_v37, %v6083_v43  ;;  %vm3462_vm4 = vcmask 687104  }
 0x2fe   : >> { %4418 = vmatpush1.bf16.msra.mxu1 %v4417_v58  ;;  %v4447_v58 = vpack.c.bf16 %v3821_v54, %v3819_v52  ;;  %v3853_v52 = vld [vmem:[%s7451_s4 + $0x588] sm:$0xff]  ;;  %v3855_v54 = vld [vmem:[%s7451_s4 + $0x598] sm:$0xff] }
 0x2ff   : >> { %4420 = vmatprep.subr.bf16.mxu1 %v4419_v59  ;;  %v3818_v59 = vld [vmem:[%s7451_s4 + $0x490] sm:$0xff] }
 0x300   : >> { %v4449_v0 = vpack.c.bf16 %v3820_v60, %v3818_v59  ;;  %v6107_v59 = vrot.slane %v5618_v40, 4  ;;  %v4475_v60 = vpack.c.bf16 %v3855_v54, %v3853_v52  ;;  %v3881_v52 = vld [vmem:[%s7451_s4 + $0x668] sm:$0xff]  ;;  %v3883_v54 = vld [vmem:[%s7451_s4 + $0x678] sm:$0xff] }
 0x302   : >> { %4422 = vmatpush1.bf16.msra.mxu1 %v4421_v1  ;;  %v4451_v1 = vpack.c.bf16 %v3825_v63, %v3823_v62  ;;  %v3852_v62 = vld [vmem:[%s7451_s4 + $0x580] sm:$0xff]  ;;  %v3854_v63 = vld [vmem:[%s7451_s4 + $0x590] sm:$0xff] }
 0x303   : >> { %4424 = vmatprep.subr.bf16.mxu1 %v4423_v2  ;;  %v3822_v2 = vld [vmem:[%s7451_s4 + $0x4b0] sm:$0xff] }
 0x306   : >> { %4426 = vmatpush1.bf16.msra.mxu1 %v4425_v5  ;;  %v3829_v5 = vld [vmem:[%s7451_s4 + $0x4e8] sm:$0xff] }
 0x307   : >> { %3794 = vmatprep.subr.msk.mxu1 %vm1385_vm9, %v3793_v6  ;;  %v4453_v6 = vpack.c.bf16 %v3824_v3, %v3822_v2  ;;  %v4455_v8 = vpack.c.bf16 %v3829_v5, %v3827_v4  ;;  %v4477_v3 = vpack.c.bf16 %v3854_v63, %v3852_v62  ;;  %v3856_v5 = vld [vmem:[%s7451_s4 + $0x5a0] sm:$0xff]  ;;  %v3882_v62 = vld [vmem:[%s7451_s4 + $0x670] sm:$0xff] }
 0x30a   : >> { %3795 = vmatpush1.msk.msra.mxu1 %vm1385_vm9, %v3792_v18  ;;  %v3830_v18 = vld [vmem:[%s7451_s4 + $0x4f0] sm:$0xff] }
 0x30b   : >> { %1682 = vmatmul.mubr.f32.vlgmr.msra.gmra.mrb[0].mxu1 %v5944_v25  ;;  %4428 = vmatprep.subr.bf16.mxu1 %v4427_v20  ;;  %v3832_v20 = vld [vmem:[%s7451_s4 + $0x500] sm:$0xff] }
 0x30c   : >> { %3797 = vmatprep.mubr.msk.f32.mxu1 %vm1380_vm11, %v5807_v12  ;;  %4430 = vmatpush1.bf16.msra.mxu1 %v4429_v15  ;;  %v3835_v15 = vld [vmem:[%s7451_s4 + $0x518] sm:$0xff]  ;;  %v4461_v23 = vpack.c.bf16 %v3832_v20, %v3830_v18 }
 0x30d   : >> { %4432 = vmatprep.subr.bf16.mxu1 %v4431_v16  ;;  %v3837_v16 = vld [vmem:[%s7451_s4 + $0x528] sm:$0xff]  ;;  %v3867_v18 = vld [vmem:[%s7451_s4 + $0x5f8] sm:$0xff] }
 0x30e   : >> { %v4463_v24 = vpack.c.bf16 %v3837_v16, %v3835_v15  ;;  %v3864_v16 = vld [vmem:[%s7451_s4 + $0x5e0] sm:$0xff] }
 0x30f   : >> { %1688 = vmatmul.mubr.f32.gmra.mrb[2].mxu1 %v5933_v22 }
 0x310   : >> { %4434 = vmatpush1.bf16.msra.mxu1 %v4433_v19  ;;  %3842 = vmatprep.mubr.msk.f32.mxu1 %vm1380_vm11, %v5974_v38  ;;  %v3839_v19 = vld [vmem:[%s7451_s4 + $0x538] sm:$0x3] }
 0x311   : >> { %4436 = vmatprep.subr.bf16.mxu1 %v4435_v31  ;;  %v3845_v31 = vld [vmem:[%s7451_s4 + $0x548] sm:$0xff] }
 0x312   : >> { %v4467_v42 = vpack.c.bf16 %v3847_v32, %v3845_v31  ;;  %v3870_v31 = vld [vmem:[%s7451_s4 + $0x610] sm:$0xff]  ;;  %v3873_v32 = vld [vmem:[%s7451_s4 + $0x628] sm:$0xff] }
 0x313   : >> { %v4495_v37 = vpack.c.bf16 %v3875_v34, %v3873_v32 }
 0x314   : >> { %4438 = vmatpush1.bf16.msra.mxu1 %v4437_v28  ;;  %v3849_v28 = vld [vmem:[%s7451_s4 + $0x568] sm:$0xff] }
 0x315   : >> { %4440 = vmatprep.subr.bf16.mxu1 %v4439_v39  ;;  %v3851_v39 = vld [vmem:[%s7451_s4 + $0x578] sm:$0xff] }
 0x318   : >> { %4442 = vmatpush1.bf16.msra.mxu1 %v4441_v47  ;;  %v4471_v47 = vpack.c.bf16 %v3851_v39, %v3849_v28  ;;  %v3872_v28 = vld [vmem:[%s7451_s4 + $0x620] sm:$0xff]  ;;  %v3874_v39 = vld [vmem:[%s7451_s4 + $0x630] sm:$0xff] }
 0x319   : >> { %4444 = vmatprep.subr.bf16.mxu1 %v4443_v48  ;;  %v3848_v48 = vld [vmem:[%s7451_s4 + $0x560] sm:$0xff] }
 0x31c   : >> { %4446 = vmatpush1.bf16.msra.mxu1 %v4445_v56  ;;  %v1886_v56 = vrot.slane %v5622_v46, 4 }
 0x31d   : >> { %4448 = vmatprep.subr.bf16.mxu1 %v4447_v58  ;;  %v4473_v58 = vpack.c.bf16 %v3850_v50, %v3848_v48  ;;  %v3876_v48 = vld [vmem:[%s7451_s4 + $0x640] sm:$0xff]  ;;  %v3878_v50 = vld [vmem:[%s7451_s4 + $0x650] sm:$0xff] }
 0x31e   : >> { %v6124_v2 = vsel %vm988_vm2, %v1886_v56, %v6107_v59  ;;  %v4501_v56 = vpack.c.bf16 %v3878_v50, %v3876_v48 }
 0x320   : >> { %4450 = vmatpush1.bf16.msra.mxu1 %v4449_v0  ;;  %v3857_v0 = vld [vmem:[%s7451_s4 + $0x5a8] sm:$0xff] }
 0x321   : >> { %4452 = vmatprep.subr.bf16.mxu1 %v4451_v1  ;;  %v3859_v1 = vld [vmem:[%s7451_s4 + $0x5b8] sm:$0xff] }
 0x322   : >> { %v4479_v4 = vpack.c.bf16 %v3859_v1, %v3857_v0  ;;  %v3885_v0 = vld [vmem:[%s7451_s4 + $0x688] sm:$0x3]  ;;  %v1883_v1 = vrot.slane %v5630_v49, 4 }
 0x324   : >> { %4454 = vmatpush1.bf16.msra.mxu1 %v4453_v6  ;;  %v3858_v6 = vld [vmem:[%s7451_s4 + $0x5b0] sm:$0xff] }
 0x325   : >> { %4456 = vmatprep.subr.bf16.mxu1 %v4455_v8  ;;  %v3861_v8 = vld [vmem:[%s7451_s4 + $0x5c8] sm:$0xff]  ;;  %v4481_v10 = vpack.c.bf16 %v3858_v6, %v3856_v5  ;;  %v1982_v6 = vld [vmem:[%s7452_s5] sm:$0x3] }
 0x326   : >> { %v4483_v11 = vpack.c.bf16 %v3863_v9, %v3861_v8  ;;  %v1987_v8 = vrot.slane %v1982_v6, %v5460_v33  ;;  %v1991_v9 = vrot.slane %v1982_v6, %v5465_v35  ;;  %v3904_v6 = vld [vmem:[%s7453_s6 + $0x1a8] sm:$0xff] }
 0x328   : >> { %4458 = vmatpush1.bf16.msra.mxu1 %v4457_v14  ;;  %v3862_v14 = vld [vmem:[%s7451_s4 + $0x5d0] sm:$0xff] }
 0x329   : >> { %4460 = vmatprep.subr.bf16.mxu1 %v4459_v17  ;;  %v3865_v17 = vld [vmem:[%s7451_s4 + $0x5e8] sm:$0xff]  ;;  %v4485_v20 = vpack.c.bf16 %v3862_v14, %v3860_v13 }
 0x32a   : >> { %v4487_v15 = vpack.c.bf16 %v3867_v18, %v3865_v17 }
 0x32c   : >> { %4462 = vmatpush1.bf16.msra.mxu1 %v4461_v23  ;;  %v3866_v23 = vld [vmem:[%s7451_s4 + $0x5f0] sm:$0xff] }
 0x32d   : >> { %4464 = vmatprep.subr.bf16.mxu1 %v4463_v24  ;;  %v3869_v24 = vld [vmem:[%s7451_s4 + $0x608] sm:$0xff]  ;;  %v4489_v27 = vpack.c.bf16 %v3866_v23, %v3864_v16 }
 0x330   : >> { %4466 = vmatpush1.bf16.msra.mxu1 %v4465_v29  ;;  %v4491_v29 = vpack.c.bf16 %v3871_v26, %v3869_v24 }
 0x331   : >> { %3840 = vmatprep.subr.msk.mxu1 %vm1385_vm9, %v3839_v19  ;;  %v3868_v19 = vld [vmem:[%s7451_s4 + $0x600] sm:$0xff] }
 0x332   : >> { %v4493_v36 = vpack.c.bf16 %v3870_v31, %v3868_v19 }
 0x334   : >> { %3841 = vmatpush1.msk.msra.mxu1 %vm1385_vm9, %v3838_v41  ;;  %v3877_v41 = vld [vmem:[%s7451_s4 + $0x648] sm:$0xff] }
 0x335   : >> { %1824 = vmatmul.mubr.f32.vlgmr.msra.gmra.mrb[0].mxu1 %v6094_v51  ;;  %4468 = vmatprep.subr.bf16.mxu1 %v4467_v42  ;;  %v3879_v42 = vld [vmem:[%s7451_s4 + $0x658] sm:$0xff] }
 0x336   : >> { %3843 = vmatprep.mubr.msk.f32.mxu1 %vm1380_vm11, %v5957_v30  ;;  %4470 = vmatpush1.bf16.msra.mxu1 %v4469_v45  ;;  %v4497_v45 = vpack.c.bf16 %v3874_v39, %v3872_v28  ;;  %v3894_v39 = vld [vmem:[%s7453_s6 + $0x158] sm:$0xff] }
 0x337   : >> { %4472 = vmatprep.subr.bf16.mxu1 %v4471_v47  ;;  %v4499_v47 = vpack.c.bf16 %v3879_v42, %v3877_v41  ;;  %v3896_v41 = vld [vmem:[%s7453_s6 + $0x168] sm:$0xff] }
 0x338   : >> { %v4513_v50 = vpack.c.bf16 %v3896_v41, %v3894_v39 }
 0x339   : >> { %1830 = vmatmul.mubr.f32.gmra.mrb[2].mxu1 %v6083_v43 }
 0x33a   : >> { %4474 = vmatpush1.bf16.msra.mxu1 %v4473_v58  ;;  %3888 = vmatprep.mubr.msk.f32.mxu1 %vm1380_vm11, %v6124_v2  ;;  %v4503_v58 = vpack.c.bf16 %v3883_v54, %v3881_v52  ;;  %v3893_v52 = vld [vmem:[%s7453_s6 + $0x150] sm:$0xff]  ;;  %v3895_v54 = vld [vmem:[%s7453_s6 + $0x160] sm:$0xff] }
 0x33b   : >> { %4476 = vmatprep.subr.bf16.mxu1 %v4475_v60  ;;  %v3880_v60 = vld [vmem:[%s7451_s4 + $0x660] sm:$0xff] }
 0x33c   : >> { %v4505_v63 = vpack.c.bf16 %v3882_v62, %v3880_v60  ;;  %v6265_v60 = vld [vmem:[%s7455_s8] sm:$0x1f]  ;;  %v4515_v62 = vpack.c.bf16 %v3895_v54, %v3893_v52 }
 0x33e   : >> { %4478 = vmatpush1.bf16.msra.mxu1 %v4477_v3  ;;  %v3884_v3 = vld [vmem:[%s7451_s4 + $0x680] sm:$0x3] }
 0x33f   : >> { %4480 = vmatprep.subr.bf16.mxu1 %v4479_v4  ;;  %v6215_v4 = vrot.slane %v5620_v44, 4 }
 0x341   : >> { %v6220_v5 = vsel %vm988_vm2, %v1883_v1, %v6215_v4  ;;  %v3899_v1 = vld [vmem:[%s7453_s6 + $0x180] sm:$0xff] }
 0x342   : >> { %4482 = vmatpush1.bf16.msra.mxu1 %v4481_v10 }
 0x343   : >> { %4484 = vmatprep.subr.bf16.mxu1 %v4483_v11 }
 0x346   : >> { %4486 = vmatpush1.bf16.msra.mxu1 %v4485_v20 }
 0x347   : >> { %4488 = vmatprep.subr.bf16.mxu1 %v4487_v15 }
 0x34a   : >> { %4490 = vmatpush1.bf16.msra.mxu1 %v4489_v27 }
 0x34b   : >> { %4492 = vmatprep.subr.bf16.mxu1 %v4491_v29 }
 0x34e   : >> { %4494 = vmatpush1.bf16.msra.mxu1 %v4493_v36 }
 0x34f   : >> { %4496 = vmatprep.subr.bf16.mxu1 %v4495_v37 }
 0x352   : >> { %4498 = vmatpush1.bf16.msra.mxu1 %v4497_v45 }
 0x353   : >> { %4500 = vmatprep.subr.bf16.mxu1 %v4499_v47 }
 0x356   : >> { %4502 = vmatpush1.bf16.msra.mxu1 %v4501_v56  ;;  %v3898_v56 = vld [vmem:[%s7453_s6 + $0x178] sm:$0xff] }
 0x357   : >> { %4504 = vmatprep.subr.bf16.mxu1 %v4503_v58  ;;  %v3900_v58 = vld [vmem:[%s7453_s6 + $0x188] sm:$0xff] }
 0x35a   : >> { %4506 = vmatpush1.bf16.msra.mxu1 %v4505_v63  ;;  %v4517_v63 = vpack.c.bf16 %v3900_v58, %v3898_v56  ;;  %v3921_v56 = vld [vmem:[%s7453_s6 + $0x230] sm:$0xff]  ;;  %v3923_v58 = vld [vmem:[%s7453_s6 + $0x240] sm:$0xff] }
 0x35b   : >> { %3886 = vmatprep.subr.msk.mxu1 %vm1385_vm9, %v3885_v0  ;;  %v3897_v0 = vld [vmem:[%s7453_s6 + $0x170] sm:$0xff] }
 0x35e   : >> { %3887 = vmatpush1.msk.msra.mxu1 %vm1385_vm9, %v3884_v3  ;;  %v3902_v3 = vld [vmem:[%s7453_s6 + $0x198] sm:$0xff] }
 0x35f   : >> { %1966 = vmatmul.mubr.f32.vlgmr.msra.gmra.mrb[0].mxu1 %v6220_v5 }
 0x360   : >> { %3889 = vmatprep.mubr.msk.f32.mxu1 %vm1380_vm11, %v6107_v59 }
 0x363   : >> { %1972 = vmatmul.mubr.f32.gmra.mrb[2].mxu1 %v6215_v4 }
 0x364   : >> { %2864 = vmatprep.mubr.f32.mxu1 %v5090_v7 }
 0x432   : >> { %v1967_v10 = vpop.f32.mrb[0].mxu1 }
 0x433   : >> { %v1994_v11 = vadd.f32 %v1987_v8, %v1967_v10  ;;  %v1969_v13 = vpop.f32.mrb[1].mxu1  ;;  %v3901_v10 = vld [vmem:[%s7453_s6 + $0x190] sm:$0xff] }
 0x434   : >> { %v1995_v14 = vadd.f32 %v1991_v9, %v1969_v13  ;;  %v3906_v13 = vld [vmem:[%s7453_s6 + $0x1b8] sm:$0xff] }
 0x435   : >> { %v1998_v18 = vmax.f32 %v1994_v11, 0.0  ;;  %v3903_v11 = vld [vmem:[%s7453_s6 + $0x1a0] sm:$0xff] }
 0x436   : >> { %v1973_v17 = vpop.f32.mrb[2].mxu1  ;;  %v1999_v16 = vmax.f32 %v1995_v14, 0.0  ;;  %v3908_v14 = vld [vmem:[%s7453_s6 + $0x1c8] sm:$0xff] }
 0x437   : >> { %v1996_v20 = vadd.f32 %v1987_v8, %v1973_v17  ;;  %v1975_v15 = vpop.f32.mrb[3].mxu1  ;;  %v2006_v27 = vrot.slane %v1998_v18, 1  ;;  %v4519_v8 = vpack.c.bf16 %v3899_v1, %v3897_v0  ;;  %v4525_v17 = vpack.c.bf16 %v3908_v14, %v3906_v13  ;;  %v3929_v13 = vld [vmem:[%s7453_s6 + $0x270] sm:$0xff]  ;;  %v3931_v14 = vld [vmem:[%s7453_s6 + $0x280] sm:$0xff] }
 0x438   : >> { %v1997_v23 = vadd.f32 %v1991_v9, %v1975_v15  ;;  %v2009_v19 = vrot.slane %v1999_v16, 1  ;;  %v4521_v9 = vpack.c.bf16 %v3904_v6, %v3902_v3  ;;  %v3910_v15 = vld [vmem:[%s7453_s6 + $0x1d8] sm:$0xff]  ;;  %v4543_v0 = vpack.c.bf16 %v3923_v58, %v3921_v56  ;;  %v3925_v3 = vld [vmem:[%s7453_s6 + $0x250] sm:$0xff]  ;;  %v3927_v6 = vld [vmem:[%s7453_s6 + $0x260] sm:$0xff] }
 0x439   : >> { %v2000_v24 = vmax.f32 %v1996_v20, 0.0  ;;  %v3907_v20 = vld [vmem:[%s7453_s6 + $0x1c0] sm:$0xff]  ;;  %v2133_v58 = vld [vmem:[%s7453_s6 + $0x90] sm:$0xff] }
 0x43a   : >> { %v2001_v26 = vmax.f32 %v1997_v23, 0.0  ;;  %v2131_v56 = vld [vmem:[%s7453_s6 + $0x80] sm:$0xff] }
 0x43b   : >> { %v2007_v29 = vrot.slane %v2000_v24, 1 }
 0x43c   : >> { %v2010_v31 = vrot.slane %v2001_v26, 1 }
 0x43d   : >> { %v2008_v32 = vsel %vm532_vm0, %v2006_v27, %v2007_v29  ;;  %v2018_v34 = vmax.f32 %v2000_v24, %v2007_v29  ;;  %v3911_v27 = vld [vmem:[%s7453_s6 + $0x1e0] sm:$0xff]  ;;  %v3914_v29 = vld [vmem:[%s7453_s6 + $0x1f8] sm:$0xff] }
 0x43e   : >> { %v2016_v36 = vmax.f32 %v1998_v18, %v2008_v32  ;;  %v2011_v37 = vsel %vm532_vm0, %v2009_v19, %v2010_v31  ;;  %v2019_v28 = vmax.f32 %v2001_v26, %v2010_v31  ;;  %v3905_v18 = vld [vmem:[%s7453_s6 + $0x1b0] sm:$0xff]  ;;  %v3916_v19 = vld [vmem:[%s7453_s6 + $0x208] sm:$0xff] }
 0x43f   : >> { %v2017_v42 = vmax.f32 %v1999_v16, %v2011_v37  ;;  %v3912_v16 = vld [vmem:[%s7453_s6 + $0x1e8] sm:$0xff]  ;;  %v4527_v23 = vpack.c.bf16 %v3907_v20, %v3905_v18  ;;  %v3909_v26 = vld [vmem:[%s7453_s6 + $0x1d0] sm:$0xff]  ;;  %v4533_v32 = vpack.c.bf16 %v3916_v19, %v3914_v29  ;;  %v3918_v37 = vld [vmem:[%s7453_s6 + $0x218] sm:$0xff] }
 0x440   : >> { %v4510_v45 = vpack.c.bf16 %v2018_v34, %v2016_v36  ;;  %v4529_v24 = vpack.c.bf16 %v3912_v16, %v3910_v15  ;;  %v4531_v31 = vpack.c.bf16 %v3911_v27, %v3909_v26  ;;  %v3913_v34 = vld [vmem:[%s7453_s6 + $0x1f0] sm:$0xff]  ;;  %v3915_v36 = vld [vmem:[%s7453_s6 + $0x200] sm:$0xff]  ;;  %v2116_v18 = vld [vmem:[%s7453_s6 + $0x8] sm:$0xff] }
 0x441   : >> { %v4507_v48 = vpack.c.bf16 %v2019_v28, %v2017_v42  ;;  %v3920_v28 = vld [vmem:[%s7453_s6 + $0x228] sm:$0xff]  ;;  %v4535_v39 = vpack.c.bf16 %v3915_v36, %v3913_v34  ;;  %v3917_v42 = vld [vmem:[%s7453_s6 + $0x210] sm:$0xff]  ;;  %v2118_v20 = vld [vmem:[%s7453_s6 + $0x18] sm:$0xff] }
 0x442   : >> { %v4537_v41 = vpack.c.bf16 %v3920_v28, %v3918_v37  ;;  %v2115_v15 = vld [vmem:[%s7453_s6] sm:$0xff]  ;;  %v2117_v16 = vld [vmem:[%s7453_s6 + $0x10] sm:$0xff]  ;;  %v4553_v27 = vpack.c.bf16 %v2118_v20, %v2116_v18  ;;  %v2124_v34 = vld [vmem:[%s7453_s6 + $0x48] sm:$0xff] }
 0x443   : >> { %4509 = vmatprep.subr.msk.bf16.mxu0 %vm6242_vm13, %v4507_v48  ;;  %v3922_v48 = vld [vmem:[%s7453_s6 + $0x238] sm:$0xff]  ;;  %v3933_v26 = vld [vmem:[%s7453_s6 + $0x290] sm:$0x3]  ;;  %v4555_v29 = vpack.c.bf16 %v2117_v16, %v2115_v15  ;;  %v2143_v15 = vld [vmem:[%s7453_s6 + $0xe0] sm:$0xff] }
 0x444   : >> { %4512 = vmatpush1.bf16.msk.msra.mxu0 %vm6242_vm13, %v4510_v45  ;;  %v3919_v45 = vld [vmem:[%s7453_s6 + $0x220] sm:$0xff]  ;;  %v2126_v36 = vld [vmem:[%s7453_s6 + $0x58] sm:$0xff]  ;;  %v2145_v16 = vld [vmem:[%s7453_s6 + $0xf0] sm:$0xff] }
 0x445   : >> { %4514 = vmatprep.subr.bf16.mxu0 %v4513_v50  ;;  %v3924_v50 = vld [vmem:[%s7453_s6 + $0x248] sm:$0xff]  ;;  %v4539_v52 = vpack.c.bf16 %v3919_v45, %v3917_v42  ;;  %v4561_v28 = vpack.c.bf16 %v2126_v36, %v2124_v34 }
 0x446   : >> { %v4541_v54 = vpack.c.bf16 %v3924_v50, %v3922_v48  ;;  %v2127_v48 = vld [vmem:[%s7453_s6 + $0x60] sm:$0xff]  ;;  %v2129_v50 = vld [vmem:[%s7453_s6 + $0x70] sm:$0xff] }
 0x447   : >> { %3892 = vmatmul.mubr.msk.f32.vlgmr.msra.gmra.mrb[12].mxu0 %vm2021_vm14, %v6265_v60 }
 0x448   : >> { %4516 = vmatpush1.bf16.msra.mxu0 %v4515_v62  ;;  %3937 = vmatprep.mubr.msk.f32.mxu0 %vm1380_vm11, %v5648_v57  ;;  %v4523_v57 = vpack.c.bf16 %v3903_v11, %v3901_v10  ;;  %v3926_v62 = vld [vmem:[%s7453_s6 + $0x258] sm:$0xff]  ;;  %v4547_v10 = vpack.c.bf16 %v3927_v6, %v3925_v3  ;;  %v2135_v3 = vld [vmem:[%s7453_s6 + $0xa0] sm:$0xff]  ;;  %v2137_v6 = vld [vmem:[%s7453_s6 + $0xb0] sm:$0xff] }
 0x449   : >> { %4518 = vmatprep.subr.bf16.mxu0 %v4517_v63  ;;  %v3928_v63 = vld [vmem:[%s7453_s6 + $0x268] sm:$0xff] }
 0x44a   : >> { %v4545_v1 = vpack.c.bf16 %v3928_v63, %v3926_v62  ;;  %v2136_v62 = vld [vmem:[%s7453_s6 + $0xa8] sm:$0xff]  ;;  %v2138_v63 = vld [vmem:[%s7453_s6 + $0xb8] sm:$0xff] }
 0x44c   : >> { %4520 = vmatpush1.bf16.msra.mxu0 %v4519_v8  ;;  %v3930_v8 = vld [vmem:[%s7453_s6 + $0x278] sm:$0xff] }
 0x44d   : >> { %4522 = vmatprep.subr.bf16.mxu0 %v4521_v9  ;;  %v3932_v9 = vld [vmem:[%s7453_s6 + $0x288] sm:$0xff] }
 0x44e   : >> { %v4549_v11 = vpack.c.bf16 %v3932_v9, %v3930_v8  ;;  %v2140_v8 = vld [vmem:[%s7453_s6 + $0xc8] sm:$0xff]  ;;  %v2142_v9 = vld [vmem:[%s7453_s6 + $0xd8] sm:$0xff] }
 0x450   : >> { %4524 = vmatpush1.bf16.msra.mxu0 %v4523_v57  ;;  %v4551_v57 = vpack.c.bf16 %v3931_v14, %v3929_v13  ;;  %v2139_v13 = vld [vmem:[%s7453_s6 + $0xc0] sm:$0xff]  ;;  %v2141_v14 = vld [vmem:[%s7453_s6 + $0xd0] sm:$0xff] }
 0x451   : >> { %4526 = vmatprep.subr.bf16.mxu0 %v4525_v17  ;;  %v3934_v17 = vld [vmem:[%s7453_s6 + $0x298] sm:$0x3]  ;;  %v4579_v18 = vpack.c.bf16 %v2141_v14, %v2139_v13  ;;  %v3960_v13 = vld [vmem:[%s7453_s6 + $0x328] sm:$0xff] }
 0x454   : >> { %4528 = vmatpush1.bf16.msra.mxu0 %v4527_v23  ;;  %v2120_v23 = vld [vmem:[%s7453_s6 + $0x28] sm:$0xff] }
 0x455   : >> { %4530 = vmatprep.subr.bf16.mxu0 %v4529_v24  ;;  %v2122_v24 = vld [vmem:[%s7453_s6 + $0x38] sm:$0xff] }
 0x456   : >> { %v4557_v19 = vpack.c.bf16 %v2122_v24, %v2120_v23  ;;  %v2148_v23 = vld [vmem:[%s7453_s6 + $0x108] sm:$0xff]  ;;  %v2150_v24 = vld [vmem:[%s7453_s6 + $0x118] sm:$0xff] }
 0x458   : >> { %4532 = vmatpush1.bf16.msra.mxu0 %v4531_v31  ;;  %v2119_v31 = vld [vmem:[%s7453_s6 + $0x20] sm:$0xff] }
 0x459   : >> { %4534 = vmatprep.subr.bf16.mxu0 %v4533_v32  ;;  %v2121_v32 = vld [vmem:[%s7453_s6 + $0x30] sm:$0xff] }
 0x45a   : >> { %v4559_v37 = vpack.c.bf16 %v2121_v32, %v2119_v31  ;;  %v2152_v31 = vld [vmem:[%s7453_s6 + $0x128] sm:$0xff]  ;;  %v2154_v32 = vld [vmem:[%s7453_s6 + $0x138] sm:$0xff] }
 0x45b   : >> { %v4589_v36 = vpack.c.bf16 %v2154_v32, %v2152_v31  ;;  %v3967_v31 = vld [vmem:[%s7453_s6 + $0x360] sm:$0xff]  ;;  %v3969_v32 = vld [vmem:[%s7453_s6 + $0x370] sm:$0xff] }
 0x45c   : >> { %4536 = vmatpush1.bf16.msra.mxu0 %v4535_v39  ;;  %v2123_v39 = vld [vmem:[%s7453_s6 + $0x40] sm:$0xff] }
 0x45d   : >> { %4538 = vmatprep.subr.bf16.mxu0 %v4537_v41  ;;  %v2125_v41 = vld [vmem:[%s7453_s6 + $0x50] sm:$0xff] }
 0x45e   : >> { %v4563_v42 = vpack.c.bf16 %v2125_v41, %v2123_v39  ;;  %v2156_v41 = vld [vmem:[%s7453_s6 + $0x148] sm:$0x3] }
 0x460   : >> { %4540 = vmatpush1.bf16.msra.mxu0 %v4539_v52  ;;  %v2132_v52 = vld [vmem:[%s7453_s6 + $0x88] sm:$0xff] }
 0x461   : >> { %4542 = vmatprep.subr.bf16.mxu0 %v4541_v54 }
 0x464   : >> { %4544 = vmatpush1.bf16.msra.mxu0 %v4543_v0  ;;  %v4571_v0 = vpack.c.bf16 %v2133_v58, %v2131_v56  ;;  %v3947_v56 = vld [vmem:[%s7453_s6 + $0x2c0] sm:$0xff]  ;;  %v3949_v58 = vld [vmem:[%s7453_s6 + $0x2d0] sm:$0xff] }
 0x465   : >> { %4546 = vmatprep.subr.bf16.mxu0 %v4545_v1  ;;  %v4573_v1 = vpack.c.bf16 %v2138_v63, %v2136_v62  ;;  %v3952_v62 = vld [vmem:[%s7453_s6 + $0x2e8] sm:$0xff]  ;;  %v3954_v63 = vld [vmem:[%s7453_s6 + $0x2f8] sm:$0xff] }
 0x468   : >> { %4548 = vmatpush1.bf16.msra.mxu0 %v4547_v10  ;;  %v4575_v10 = vpack.c.bf16 %v2137_v6, %v2135_v3  ;;  %v3951_v3 = vld [vmem:[%s7453_s6 + $0x2e0] sm:$0xff]  ;;  %v3953_v6 = vld [vmem:[%s7453_s6 + $0x2f0] sm:$0xff] }
 0x469   : >> { %4550 = vmatprep.subr.bf16.mxu0 %v4549_v11  ;;  %v4577_v11 = vpack.c.bf16 %v2142_v9, %v2140_v8  ;;  %v4603_v8 = vpack.c.bf16 %v3953_v6, %v3951_v3  ;;  %v3989_v3 = vld [vmem:[%s7453_s6 + $0x3f0] sm:$0xff]  ;;  %v3991_v6 = vld [vmem:[%s7453_s6 + $0x400] sm:$0xff] }
 0x46c   : >> { %4552 = vmatpush1.bf16.msra.mxu0 %v4551_v57  ;;  %v2144_v57 = vld [vmem:[%s7453_s6 + $0xe8] sm:$0xff] }
 0x46d   : >> { %3935 = vmatprep.subr.msk.mxu0 %vm1385_vm9, %v3934_v17  ;;  %v2146_v17 = vld [vmem:[%s7453_s6 + $0xf8] sm:$0xff] }
 0x46e   : >> { %v4581_v20 = vpack.c.bf16 %v2146_v17, %v2144_v57  ;;  %v3959_v57 = vld [vmem:[%s7453_s6 + $0x320] sm:$0xff]  ;;  %v3961_v17 = vld [vmem:[%s7453_s6 + $0x330] sm:$0xff] }
 0x470   : >> { %3936 = vmatpush1.msk.msra.mxu0 %vm1385_vm9, %v3933_v26  ;;  %v4583_v26 = vpack.c.bf16 %v2145_v16, %v2143_v15  ;;  %v4611_v15 = vpack.c.bf16 %v3961_v17, %v3959_v57 }
 0x471   : >> { %2271 = vmatmul.mubr.f32.vlgmr.msra.gmra.mrb[14].mxu0 %v5660_v61  ;;  %4554 = vmatprep.subr.bf16.mxu0 %v4553_v27  ;;  %v2128_v61 = vld [vmem:[%s7453_s6 + $0x68] sm:$0xff]  ;;  %v4585_v27 = vpack.c.bf16 %v2150_v24, %v2148_v23  ;;  %v3963_v23 = vld [vmem:[%s7453_s6 + $0x340] sm:$0xff]  ;;  %v3965_v24 = vld [vmem:[%s7453_s6 + $0x350] sm:$0xff] }
 0x472   : >> { %3938 = vmatprep.mubr.msk.f32.mxu0 %vm1380_vm11, %v5640_v53  ;;  %4556 = vmatpush1.bf16.msra.mxu0 %v4555_v29  ;;  %v2130_v53 = vld [vmem:[%s7453_s6 + $0x78] sm:$0xff]  ;;  %v2147_v29 = vld [vmem:[%s7453_s6 + $0x100] sm:$0xff] }
 0x473   : >> { %4558 = vmatprep.subr.bf16.mxu0 %v4557_v19  ;;  %v4565_v45 = vpack.c.bf16 %v2130_v53, %v2128_v61  ;;  %v2149_v19 = vld [vmem:[%s7453_s6 + $0x110] sm:$0xff]  ;;  %v3944_v61 = vld [vmem:[%s7453_s6 + $0x2a8] sm:$0xff]  ;;  %v3946_v53 = vld [vmem:[%s7453_s6 + $0x2b8] sm:$0xff] }
 0x474   : >> { %v4587_v34 = vpack.c.bf16 %v2149_v19, %v2147_v29  ;;  %v4615_v29 = vpack.c.bf16 %v3965_v24, %v3963_v23  ;;  %v4001_v23 = vld [vmem:[%s7453_s6 + $0x450] sm:$0xff]  ;;  %v4003_v24 = vld [vmem:[%s7453_s6 + $0x460] sm:$0xff] }
 0x475   : >> { %2277 = vmatmul.mubr.f32.gmra.mrb[16].mxu0 %v5644_v55  ;;  %v2134_v55 = vld [vmem:[%s7453_s6 + $0x98] sm:$0xff] }
 0x476   : >> { %4560 = vmatpush1.bf16.msra.mxu0 %v4559_v37  ;;  %3941 = vmatprep.mubr.msk.f32.mxu0 %vm1380_vm11, %v5622_v46  ;;  %v4567_v46 = vpack.c.bf16 %v2129_v50, %v2127_v48  ;;  %v4569_v54 = vpack.c.bf16 %v2134_v55, %v2132_v52  ;;  %v2151_v37 = vld [vmem:[%s7453_s6 + $0x120] sm:$0xff]  ;;  %v3948_v48 = vld [vmem:[%s7453_s6 + $0x2c8] sm:$0xff]  ;;  %v3950_v50 = vld [vmem:[%s7453_s6 + $0x2d8] sm:$0xff]  ;;  %v4593_v55 = vpack.c.bf16 %v3946_v53, %v3944_v61 }
 0x477   : >> { %4562 = vmatprep.subr.bf16.mxu0 %v4561_v28  ;;  %v2153_v28 = vld [vmem:[%s7453_s6 + $0x130] sm:$0xff]  ;;  %v2155_v52 = vld [vmem:[%s7453_s6 + $0x140] sm:$0x3]  ;;  %v3976_v61 = vld [vmem:[%s7453_s6 + $0x3a8] sm:$0xff] }
 0x478   : >> { %v4591_v39 = vpack.c.bf16 %v2153_v28, %v2151_v37  ;;  %v4619_v37 = vpack.c.bf16 %v3969_v32, %v3967_v31  ;;  %v3978_v53 = vld [vmem:[%s7453_s6 + $0x3b8] sm:$0xff]  ;;  %v4012_v32 = vld [vmem:[%s7453_s6 + $0x4a8] sm:$0xff] }
 0x479   : >> { %v4010_v31 = vld [vmem:[%s7453_s6 + $0x498] sm:$0xff] }
 0x47a   : >> { %4564 = vmatpush1.bf16.msra.mxu0 %v4563_v42  ;;  %v3943_v42 = vld [vmem:[%s7453_s6 + $0x2a0] sm:$0xff] }
 0x47b   : >> { %4566 = vmatprep.subr.bf16.mxu0 %v4565_v45  ;;  %v3945_v45 = vld [vmem:[%s7453_s6 + $0x2b0] sm:$0xff] }
 0x47e   : >> { %4568 = vmatpush1.bf16.msra.mxu0 %v4567_v46  ;;  %v4595_v46 = vpack.c.bf16 %v3945_v45, %v3943_v42  ;;  %v4625_v45 = vpack.c.bf16 %v3978_v53, %v3976_v61 }
 0x47f   : >> { %4570 = vmatprep.subr.bf16.mxu0 %v4569_v54  ;;  %v4597_v54 = vpack.c.bf16 %v3950_v50, %v3948_v48  ;;  %v3975_v48 = vld [vmem:[%s7453_s6 + $0x3a0] sm:$0xff]  ;;  %v3977_v50 = vld [vmem:[%s7453_s6 + $0x3b0] sm:$0xff] }
 0x482   : >> { %4572 = vmatpush1.bf16.msra.mxu0 %v4571_v0  ;;  %v4599_v0 = vpack.c.bf16 %v3949_v58, %v3947_v56  ;;  %v3979_v56 = vld [vmem:[%s7453_s6 + $0x3c0] sm:$0xff]  ;;  %v3981_v58 = vld [vmem:[%s7453_s6 + $0x3d0] sm:$0xff] }
 0x483   : >> { %4574 = vmatprep.subr.bf16.mxu0 %v4573_v1  ;;  %v4601_v1 = vpack.c.bf16 %v3954_v63, %v3952_v62  ;;  %v4631_v62 = vpack.c.bf16 %v3981_v58, %v3979_v56  ;;  %v3984_v63 = vld [vmem:[%s7453_s6 + $0x3e8] sm:$0x3]  ;;  %v4022_v56 = vld [vmem:[%s7453_s6 + $0x4f8] sm:$0xff] }
 0x484   : >> { %v4024_v58 = vld [vmem:[%s7453_s6 + $0x508] sm:$0xff] }
 0x486   : >> { %4576 = vmatpush1.bf16.msra.mxu0 %v4575_v10  ;;  %v3955_v10 = vld [vmem:[%s7453_s6 + $0x300] sm:$0xff] }
 0x487   : >> { %4578 = vmatprep.subr.bf16.mxu0 %v4577_v11  ;;  %v3957_v11 = vld [vmem:[%s7453_s6 + $0x310] sm:$0xff] }
 0x48a   : >> { %4580 = vmatpush1.bf16.msra.mxu0 %v4579_v18  ;;  %v3964_v18 = vld [vmem:[%s7453_s6 + $0x348] sm:$0xff] }
 0x48b   : >> { %4582 = vmatprep.subr.bf16.mxu0 %v4581_v20  ;;  %v3966_v20 = vld [vmem:[%s7453_s6 + $0x358] sm:$0xff] }
 0x48c   : >> { %v4613_v16 = vpack.c.bf16 %v3966_v20, %v3964_v18  ;;  %v3997_v18 = vld [vmem:[%s7453_s6 + $0x430] sm:$0xff]  ;;  %v3999_v20 = vld [vmem:[%s7453_s6 + $0x440] sm:$0xff] }
 0x48e   : >> { %4584 = vmatpush1.bf16.msra.mxu0 %v4583_v26  ;;  %v3968_v26 = vld [vmem:[%s7453_s6 + $0x368] sm:$0xff] }
 0x48f   : >> { %4586 = vmatprep.subr.bf16.mxu0 %v4585_v27  ;;  %v3970_v27 = vld [vmem:[%s7453_s6 + $0x378] sm:$0xff] }
 0x490   : >> { %v4617_v19 = vpack.c.bf16 %v3970_v27, %v3968_v26  ;;  %v4006_v26 = vld [vmem:[%s7453_s6 + $0x478] sm:$0xff] }
 0x492   : >> { %4588 = vmatpush1.bf16.msra.mxu0 %v4587_v34  ;;  %v3972_v34 = vld [vmem:[%s7453_s6 + $0x388] sm:$0xff] }
 0x493   : >> { %4590 = vmatprep.subr.bf16.mxu0 %v4589_v36  ;;  %v3974_v36 = vld [vmem:[%s7453_s6 + $0x398] sm:$0xff] }
 0x494   : >> { %v4621_v28 = vpack.c.bf16 %v3974_v36, %v3972_v34  ;;  %v4653_v36 = vpack.c.bf16 %v4012_v32, %v4010_v31  ;;  %v4047_v31 = vld [vmem:[%s7453_s6 + $0x5a0] sm:$0xff]  ;;  %v4049_v32 = vld [vmem:[%s7453_s6 + $0x5b0] sm:$0xff] }
 0x496   : >> { %4592 = vmatpush1.bf16.msra.mxu0 %v4591_v39  ;;  %v3971_v39 = vld [vmem:[%s7453_s6 + $0x380] sm:$0xff] }
 0x497   : >> { %3939 = vmatprep.subr.msk.mxu0 %vm1385_vm9, %v2156_v41  ;;  %v3973_v41 = vld [vmem:[%s7453_s6 + $0x390] sm:$0xff] }
 0x498   : >> { %v4623_v42 = vpack.c.bf16 %v3973_v41, %v3971_v39  ;;  %v4014_v39 = vld [vmem:[%s7453_s6 + $0x4b8] sm:$0xff]  ;;  %v4016_v41 = vld [vmem:[%s7453_s6 + $0x4c8] sm:$0xff] }
 0x499   : >> { %v4657_v53 = vpack.c.bf16 %v4016_v41, %v4014_v39  ;;  %v4056_v39 = vld [vmem:[%s7453_s6 + $0x5e8] sm:$0xff]  ;;  %v4058_v41 = vld [vmem:[%s7453_s6 + $0x5f8] sm:$0xff] }
 0x49a   : >> { %3940 = vmatpush1.msk.msra.mxu0 %vm1385_vm9, %v2155_v52  ;;  %v3980_v52 = vld [vmem:[%s7453_s6 + $0x3c8] sm:$0xff] }
 0x49b   : >> { %2354 = vmatmul.mubr.f32.vlgmr.msra.gmra.mrb[14].mxu0 %v5630_v49  ;;  %4594 = vmatprep.subr.bf16.mxu0 %v4593_v55  ;;  %v3956_v49 = vld [vmem:[%s7453_s6 + $0x308] sm:$0xff]  ;;  %v3982_v55 = vld [vmem:[%s7453_s6 + $0x3d8] sm:$0xff] }
 0x49c   : >> { %3942 = vmatprep.mubr.msk.f32.mxu0 %vm1380_vm11, %v5618_v40  ;;  %4596 = vmatpush1.bf16.msra.mxu0 %v4595_v46  ;;  %v3958_v40 = vld [vmem:[%s7453_s6 + $0x318] sm:$0xff]  ;;  %v4627_v46 = vpack.c.bf16 %v3977_v50, %v3975_v48  ;;  %v4020_v50 = vld [vmem:[%s7453_s6 + $0x4e8] sm:$0xff] }
 0x49d   : >> { %4598 = vmatprep.subr.bf16.mxu0 %v4597_v54  ;;  %v4605_v9 = vpack.c.bf16 %v3958_v40, %v3956_v49  ;;  %v4629_v54 = vpack.c.bf16 %v3982_v55, %v3980_v52  ;;  %v3994_v49 = vld [vmem:[%s7453_s6 + $0x418] sm:$0xff]  ;;  %v3996_v40 = vld [vmem:[%s7453_s6 + $0x428] sm:$0xff] }
 0x49e   : >> { %v4018_v48 = vld [vmem:[%s7453_s6 + $0x4d8] sm:$0xff] }
 0x49f   : >> { %2360 = vmatmul.mubr.f32.gmra.mrb[16].mxu0 %v5620_v44  ;;  %v3962_v44 = vld [vmem:[%s7453_s6 + $0x338] sm:$0xff]  ;;  %v4661_v55 = vpack.c.bf16 %v4020_v50, %v4018_v48  ;;  %v4060_v48 = vld [vmem:[%s7453_s6 + $0x608] sm:$0xff] }
 0x4a0   : >> { %4600 = vmatpush1.bf16.msra.mxu0 %v4599_v0  ;;  %3987 = vmatprep.mubr.msk.f32.mxu0 %vm1380_vm11, %v5824_v21  ;;  %v4607_v21 = vpack.c.bf16 %v3957_v11, %v3955_v10  ;;  %v4609_v14 = vpack.c.bf16 %v3962_v44, %v3960_v13  ;;  %v3990_v0 = vld [vmem:[%s7453_s6 + $0x3f8] sm:$0xff]  ;;  %v4635_v10 = vpack.c.bf16 %v3991_v6, %v3989_v3  ;;  %v3993_v13 = vld [vmem:[%s7453_s6 + $0x410] sm:$0xff]  ;;  %v3995_v44 = vld [vmem:[%s7453_s6 + $0x420] sm:$0xff] }
 0x4a1   : >> { %4602 = vmatprep.subr.bf16.mxu0 %v4601_v1  ;;  %v3992_v1 = vld [vmem:[%s7453_s6 + $0x408] sm:$0xff]  ;;  %v4637_v11 = vpack.c.bf16 %v3996_v40, %v3994_v49  ;;  %v4639_v57 = vpack.c.bf16 %v3995_v44, %v3993_v13  ;;  %v4026_v3 = vld [vmem:[%s7453_s6 + $0x518] sm:$0xff] }
 0x4a2   : >> { %v4028_v6 = vld [vmem:[%s7453_s6 + $0x528] sm:$0xff]  ;;  %v4038_v44 = vld [vmem:[%s7453_s6 + $0x558] sm:$0xff] }
 0x4a3   : >> { %v4669_v40 = vpack.c.bf16 %v4028_v6, %v4026_v3  ;;  %v4036_v13 = vld [vmem:[%s7453_s6 + $0x548] sm:$0xff]  ;;  %v4062_v50 = vld [vmem:[%s7453_s6 + $0x618] sm:$0xff] }
 0x4a4   : >> { %4604 = vmatpush1.bf16.msra.mxu0 %v4603_v8  ;;  %v3983_v8 = vld [vmem:[%s7453_s6 + $0x3e0] sm:$0x3]  ;;  %v4068_v3 = vld [vmem:[%s7453_s6 + $0x648] sm:$0xff]  ;;  %v4070_v6 = vld [vmem:[%s7453_s6 + $0x658] sm:$0xff] }
 0x4a5   : >> { %4606 = vmatprep.subr.bf16.mxu0 %v4605_v9  ;;  %v4633_v9 = vpack.c.bf16 %v3992_v1, %v3990_v0  ;;  %v4021_v0 = vld [vmem:[%s7453_s6 + $0x4f0] sm:$0xff]  ;;  %v4023_v1 = vld [vmem:[%s7453_s6 + $0x500] sm:$0xff] }
 0x4a6   : >> { %v4667_v49 = vpack.c.bf16 %v4023_v1, %v4021_v0  ;;  %v4063_v0 = vld [vmem:[%s7453_s6 + $0x620] sm:$0xff]  ;;  %v4065_v1 = vld [vmem:[%s7453_s6 + $0x630] sm:$0xff] }
 0x4a8   : >> { %4608 = vmatpush1.bf16.msra.mxu0 %v4607_v21  ;;  %v3998_v21 = vld [vmem:[%s7453_s6 + $0x438] sm:$0xff] }
 0x4a9   : >> { %4610 = vmatprep.subr.bf16.mxu0 %v4609_v14  ;;  %v4000_v14 = vld [vmem:[%s7453_s6 + $0x448] sm:$0xff] }
 0x4aa   : >> { %v4641_v17 = vpack.c.bf16 %v4000_v14, %v3998_v21  ;;  %v4035_v21 = vld [vmem:[%s7453_s6 + $0x540] sm:$0xff]  ;;  %v4037_v14 = vld [vmem:[%s7453_s6 + $0x550] sm:$0xff] }
 0x4ac   : >> { %4612 = vmatpush1.bf16.msra.mxu0 %v4611_v15  ;;  %v4643_v15 = vpack.c.bf16 %v3999_v20, %v3997_v18  ;;  %v4029_v18 = vld [vmem:[%s7453_s6 + $0x530] sm:$0x3]  ;;  %v4673_v20 = vpack.c.bf16 %v4038_v44, %v4036_v13 }
 0x4ad   : >> { %4614 = vmatprep.subr.bf16.mxu0 %v4613_v16 }
 0x4b0   : >> { %4616 = vmatpush1.bf16.msra.mxu0 %v4615_v29  ;;  %v4005_v29 = vld [vmem:[%s7453_s6 + $0x470] sm:$0xff] }
 0x4b1   : >> { %4618 = vmatprep.subr.bf16.mxu0 %v4617_v19  ;;  %v4007_v19 = vld [vmem:[%s7453_s6 + $0x480] sm:$0xff] }
 0x4b2   : >> { %v4651_v34 = vpack.c.bf16 %v4007_v19, %v4005_v29 }
 0x4b4   : >> { %4620 = vmatpush1.bf16.msra.mxu0 %v4619_v37  ;;  %v4009_v37 = vld [vmem:[%s7453_s6 + $0x490] sm:$0xff] }
 0x4b5   : >> { %4622 = vmatprep.subr.bf16.mxu0 %v4621_v28  ;;  %v4011_v28 = vld [vmem:[%s7453_s6 + $0x4a0] sm:$0xff] }
 0x4b6   : >> { %v4655_v61 = vpack.c.bf16 %v4011_v28, %v4009_v37  ;;  %v4051_v37 = vld [vmem:[%s7453_s6 + $0x5c0] sm:$0xff]  ;;  %v4053_v28 = vld [vmem:[%s7453_s6 + $0x5d0] sm:$0xff] }
 0x4b8   : >> { %4624 = vmatpush1.bf16.msra.mxu0 %v4623_v42  ;;  %v4013_v42 = vld [vmem:[%s7453_s6 + $0x4b0] sm:$0xff] }
 0x4b9   : >> { %4626 = vmatprep.subr.bf16.mxu0 %v4625_v45  ;;  %v4015_v45 = vld [vmem:[%s7453_s6 + $0x4c0] sm:$0xff] }
 0x4ba   : >> { %v4659_v52 = vpack.c.bf16 %v4015_v45, %v4013_v42  ;;  %v4055_v42 = vld [vmem:[%s7453_s6 + $0x5e0] sm:$0xff]  ;;  %v4057_v45 = vld [vmem:[%s7453_s6 + $0x5f0] sm:$0xff] }
 0x4bc   : >> { %4628 = vmatpush1.bf16.msra.mxu0 %v4627_v46  ;;  %v4017_v46 = vld [vmem:[%s7453_s6 + $0x4d0] sm:$0xff] }
 0x4bd   : >> { %4630 = vmatprep.subr.bf16.mxu0 %v4629_v54  ;;  %v4019_v54 = vld [vmem:[%s7453_s6 + $0x4e0] sm:$0xff] }
 0x4c0   : >> { %4632 = vmatpush1.bf16.msra.mxu0 %v4631_v62  ;;  %v4663_v62 = vpack.c.bf16 %v4019_v54, %v4017_v46  ;;  %v4059_v46 = vld [vmem:[%s7453_s6 + $0x600] sm:$0xff]  ;;  %v4061_v54 = vld [vmem:[%s7453_s6 + $0x610] sm:$0xff] }
 0x4c1   : >> { %3985 = vmatprep.subr.msk.mxu0 %vm1385_vm9, %v3984_v63  ;;  %v4665_v63 = vpack.c.bf16 %v4024_v58, %v4022_v56  ;;  %v4064_v56 = vld [vmem:[%s7453_s6 + $0x628] sm:$0xff]  ;;  %v4066_v58 = vld [vmem:[%s7453_s6 + $0x638] sm:$0xff] }
 0x4c4   : >> { %3986 = vmatpush1.msk.msra.mxu0 %vm1385_vm9, %v3983_v8  ;;  %v4025_v8 = vld [vmem:[%s7453_s6 + $0x510] sm:$0xff] }
 0x4c5   : >> { %2480 = vmatmul.mubr.f32.vlgmr.msra.gmra.mrb[14].mxu0 %v5944_v25  ;;  %4634 = vmatprep.subr.bf16.mxu0 %v4633_v9  ;;  %v4002_v25 = vld [vmem:[%s7453_s6 + $0x458] sm:$0xff]  ;;  %v4027_v9 = vld [vmem:[%s7453_s6 + $0x520] sm:$0xff] }
 0x4c6   : >> { %3988 = vmatprep.mubr.msk.f32.mxu0 %vm1380_vm11, %v5807_v12  ;;  %4636 = vmatpush1.bf16.msra.mxu0 %v4635_v10  ;;  %v4004_v12 = vld [vmem:[%s7453_s6 + $0x468] sm:$0xff]  ;;  %v4671_v10 = vpack.c.bf16 %v4027_v9, %v4025_v8  ;;  %v4067_v8 = vld [vmem:[%s7453_s6 + $0x640] sm:$0xff]  ;;  %v4069_v9 = vld [vmem:[%s7453_s6 + $0x650] sm:$0xff] }
 0x4c7   : >> { %4638 = vmatprep.subr.bf16.mxu0 %v4637_v11  ;;  %v4645_v16 = vpack.c.bf16 %v4004_v12, %v4002_v25  ;;  %v4030_v11 = vld [vmem:[%s7453_s6 + $0x538] sm:$0x3]  ;;  %v4675_v25 = vpack.c.bf16 %v4037_v14, %v4035_v21  ;;  %v4707_v13 = vpack.c.bf16 %v4069_v9, %v4067_v8  ;;  %v4071_v21 = vld [vmem:[%s7453_s6 + $0x660] sm:$0xff]  ;;  %v4073_v14 = vld [vmem:[%s7453_s6 + $0x670] sm:$0xff] }
 0x4c9   : >> { %2486 = vmatmul.mubr.f32.gmra.mrb[16].mxu0 %v5933_v22  ;;  %v4008_v22 = vld [vmem:[%s7453_s6 + $0x488] sm:$0xff] }
 0x4ca   : >> { %4640 = vmatpush1.bf16.msra.mxu0 %v4639_v57  ;;  %4033 = vmatprep.mubr.msk.f32.mxu0 %vm1380_vm11, %v5974_v38  ;;  %v4647_v38 = vpack.c.bf16 %v4003_v24, %v4001_v23  ;;  %v4649_v27 = vpack.c.bf16 %v4008_v22, %v4006_v26  ;;  %v4040_v57 = vld [vmem:[%s7453_s6 + $0x568] sm:$0xff]  ;;  %v4046_v24 = vld [vmem:[%s7453_s6 + $0x598] sm:$0xff] }
 0x4cb   : >> { %4642 = vmatprep.subr.bf16.mxu0 %v4641_v17  ;;  %v4042_v17 = vld [vmem:[%s7453_s6 + $0x578] sm:$0xff]  ;;  %v4044_v23 = vld [vmem:[%s7453_s6 + $0x588] sm:$0xff] }
 0x4cc   : >> { %v4677_v12 = vpack.c.bf16 %v4042_v17, %v4040_v57  ;;  %v4681_v22 = vpack.c.bf16 %v4046_v24, %v4044_v23  ;;  %v4711_v57 = vpack.c.bf16 %v4073_v14, %v4071_v21  ;;  %v4076_v17 = vld [vmem:[%s7453_s6 + $0x688] sm:$0x3] }
 0x4ce   : >> { %4644 = vmatpush1.bf16.msra.mxu0 %v4643_v15  ;;  %v4039_v15 = vld [vmem:[%s7453_s6 + $0x560] sm:$0xff] }
 0x4cf   : >> { %4646 = vmatprep.subr.bf16.mxu0 %v4645_v16  ;;  %v4041_v16 = vld [vmem:[%s7453_s6 + $0x570] sm:$0xff] }
 0x4d0   : >> { %v4679_v26 = vpack.c.bf16 %v4041_v16, %v4039_v15 }
 0x4d2   : >> { %4648 = vmatpush1.bf16.msra.mxu0 %v4647_v38  ;;  %v4043_v38 = vld [vmem:[%s7453_s6 + $0x580] sm:$0xff] }
 0x4d3   : >> { %4650 = vmatprep.subr.bf16.mxu0 %v4649_v27  ;;  %v4045_v27 = vld [vmem:[%s7453_s6 + $0x590] sm:$0xff] }
 0x4d4   : >> { %v4683_v29 = vpack.c.bf16 %v4045_v27, %v4043_v38 }
 0x4d6   : >> { %4652 = vmatpush1.bf16.msra.mxu0 %v4651_v34  ;;  %v4052_v34 = vld [vmem:[%s7453_s6 + $0x5c8] sm:$0xff] }
 0x4d7   : >> { %4654 = vmatprep.subr.bf16.mxu0 %v4653_v36 }
 0x4da   : >> { %4656 = vmatpush1.bf16.msra.mxu0 %v4655_v61  ;;  %v4691_v61 = vpack.c.bf16 %v4053_v28, %v4051_v37 }
 0x4db   : >> { %4658 = vmatprep.subr.bf16.mxu0 %v4657_v53  ;;  %v4693_v53 = vpack.c.bf16 %v4058_v41, %v4056_v39  ;;  %v4084_v41 = vld [vmem:[%s7456_s9 + $0x90] sm:$0xff] }
 0x4de   : >> { %4660 = vmatpush1.bf16.msra.mxu0 %v4659_v52  ;;  %v4695_v52 = vpack.c.bf16 %v4057_v45, %v4055_v42  ;;  %v5094_v42 = vmov 0.0|0.0   ;;  %v4086_v45 = vld [vmem:[%s7456_s9 + $0xa0] sm:$0xff] }
 0x4df   : >> { %4662 = vmatprep.subr.bf16.mxu0 %v4661_v55  ;;  %v4697_v55 = vpack.c.bf16 %v4062_v50, %v4060_v48  ;;  %v4087_v48 = vld [vmem:[%s7456_s9 + $0xa8] sm:$0xff] }
 0x4e2   : >> { %4664 = vmatpush1.bf16.msra.mxu0 %v4663_v62  ;;  %v4699_v62 = vpack.c.bf16 %v4061_v54, %v4059_v46  ;;  %v4723_v46 = vpack.c.bf16 %v4087_v48, %v4086_v45 }
 0x4e3   : >> { %4666 = vmatprep.subr.bf16.mxu0 %v4665_v63  ;;  %v4701_v63 = vpack.c.bf16 %v4066_v58, %v4064_v56  ;;  %v4088_v56 = vld [vmem:[%s7456_s9 + $0xb0] sm:$0xff]  ;;  %v4089_v58 = vld [vmem:[%s7456_s9 + $0xb8] sm:$0xff] }
 0x4e6   : >> { %4668 = vmatpush1.bf16.msra.mxu0 %v4667_v49  ;;  %v4703_v49 = vpack.c.bf16 %v4065_v1, %v4063_v0  ;;  %v4726_v0 = vpack.c.bf16 %v4089_v58, %v4088_v56 }
 0x4e7   : >> { %4670 = vmatprep.subr.bf16.mxu0 %v4669_v40  ;;  %v4705_v40 = vpack.c.bf16 %v4070_v6, %v4068_v3  ;;  %v4090_v3 = vld [vmem:[%s7456_s9 + $0xc0] sm:$0xff]  ;;  %v4091_v6 = vld [vmem:[%s7456_s9 + $0xc8] sm:$0xff] }
 0x4e8   : >> { %v4729_v8 = vpack.c.bf16 %v4091_v6, %v4090_v3  ;;  %v4144_v3 = vld [vmem:[%s7456_s9 + $0x250] sm:$0xff]  ;;  %v4145_v6 = vld [vmem:[%s7456_s9 + $0x258] sm:$0xff] }
 0x4ea   : >> { %4672 = vmatpush1.bf16.msra.mxu0 %v4671_v10  ;;  %v4072_v10 = vld [vmem:[%s7453_s6 + $0x668] sm:$0xff] }
 0x4eb   : >> { %4031 = vmatprep.subr.msk.mxu0 %vm1385_vm9, %v4030_v11  ;;  %v4074_v11 = vld [vmem:[%s7453_s6 + $0x678] sm:$0xff] }
 0x4ec   : >> { %v4709_v44 = vpack.c.bf16 %v4074_v11, %v4072_v10  ;;  %v4092_v10 = vld [vmem:[%s7456_s9 + $0xd0] sm:$0xff]  ;;  %v4093_v11 = vld [vmem:[%s7456_s9 + $0xd8] sm:$0xff] }
 0x4ed   : >> { %v4732_v21 = vpack.c.bf16 %v4093_v11, %v4092_v10  ;;  %v2889_v10 = vld [vmem:[%s7456_s9 + $0x28] sm:$0xff]  ;;  %v4146_v11 = vld [vmem:[%s7456_s9 + $0x260] sm:$0xff] }
 0x4ee   : >> { %4032 = vmatpush1.msk.msra.mxu0 %vm1385_vm9, %v4029_v18  ;;  %v4075_v18 = vld [vmem:[%s7453_s6 + $0x680] sm:$0x3] }
 0x4ef   : >> { %2610 = vmatmul.mubr.f32.vlgmr.msra.gmra.mrb[14].mxu0 %v6094_v51  ;;  %4674 = vmatprep.subr.bf16.mxu0 %v4673_v20  ;;  %v4048_v51 = vld [vmem:[%s7453_s6 + $0x5a8] sm:$0xff] }
 0x4f0   : >> { %4034 = vmatprep.mubr.msk.f32.mxu0 %vm1380_vm11, %v5957_v30  ;;  %4676 = vmatpush1.bf16.msra.mxu0 %v4675_v25  ;;  %v4050_v30 = vld [vmem:[%s7453_s6 + $0x5b8] sm:$0xff] }
 0x4f1   : >> { %4678 = vmatprep.subr.bf16.mxu0 %v4677_v12  ;;  %v4685_v19 = vpack.c.bf16 %v4050_v30, %v4048_v51 }
 0x4f3   : >> { %2616 = vmatmul.mubr.f32.gmra.mrb[16].mxu0 %v6083_v43  ;;  %v4054_v43 = vld [vmem:[%s7453_s6 + $0x5d8] sm:$0xff] }
 0x4f4   : >> { %4680 = vmatpush1.bf16.msra.mxu0 %v4679_v26  ;;  %4079 = vmatprep.mubr.msk.f32.mxu0 %vm1380_vm11, %v6124_v2  ;;  %v4687_v2 = vpack.c.bf16 %v4049_v32, %v4047_v31  ;;  %v4689_v36 = vpack.c.bf16 %v4054_v43, %v4052_v34 }
 0x4f5   : >> { %4682 = vmatprep.subr.bf16.mxu0 %v4681_v22 }
 0x4f8   : >> { %4684 = vmatpush1.bf16.msra.mxu0 %v4683_v29 }
 0x4f9   : >> { %4686 = vmatprep.subr.bf16.mxu0 %v4685_v19 }
 0x4fc   : >> { %4688 = vmatpush1.bf16.msra.mxu0 %v4687_v2 }
 0x4fd   : >> { %4690 = vmatprep.subr.bf16.mxu0 %v4689_v36 }
 0x500   : >> { %4692 = vmatpush1.bf16.msra.mxu0 %v4691_v61  ;;  %v4085_v61 = vld [vmem:[%s7456_s9 + $0x98] sm:$0xff] }
 0x501   : >> { %4694 = vmatprep.subr.bf16.mxu0 %v4693_v53  ;;  %v4104_v53 = vld [vmem:[%s7456_s9 + $0x120] sm:$0xff]  ;;  %v4720_v47 = vpack.c.bf16 %v4085_v61, %v4084_v41 }
 0x504   : >> { %4696 = vmatpush1.bf16.msra.mxu0 %v4695_v52  ;;  %v4106_v52 = vld [vmem:[%s7456_s9 + $0x130] sm:$0xff] }
 0x505   : >> { %4698 = vmatprep.subr.bf16.mxu0 %v4697_v55  ;;  %v4107_v55 = vld [vmem:[%s7456_s9 + $0x138] sm:$0xff] }
 0x506   : >> { %v4777_v54 = vpack.c.bf16 %v4107_v55, %v4106_v52  ;;  %v4142_v52 = vld [vmem:[%s7456_s9 + $0x240] sm:$0xff] }
 0x508   : >> { %4700 = vmatpush1.bf16.msra.mxu0 %v4699_v62  ;;  %v4108_v62 = vld [vmem:[%s7456_s9 + $0x140] sm:$0xff] }
 0x509   : >> { %4702 = vmatprep.subr.bf16.mxu0 %v4701_v63  ;;  %v4109_v63 = vld [vmem:[%s7456_s9 + $0x148] sm:$0xff] }
 0x50a   : >> { %v4780_v1 = vpack.c.bf16 %v4109_v63, %v4108_v62  ;;  %v2886_v62 = vld [vmem:[%s7456_s9 + $0x10] sm:$0xff] }
 0x50c   : >> { %4704 = vmatpush1.bf16.msra.mxu0 %v4703_v49  ;;  %v4110_v49 = vld [vmem:[%s7456_s9 + $0x150] sm:$0xff] }
 0x50d   : >> { %4706 = vmatprep.subr.bf16.mxu0 %v4705_v40  ;;  %v4111_v40 = vld [vmem:[%s7456_s9 + $0x158] sm:$0xff] }
 0x50e   : >> { %v4783_v9 = vpack.c.bf16 %v4111_v40, %v4110_v49 }
 0x510   : >> { %4708 = vmatpush1.bf16.msra.mxu0 %v4707_v13  ;;  %v4112_v13 = vld [vmem:[%s7456_s9 + $0x160] sm:$0xff] }
 0x511   : >> { %4710 = vmatprep.subr.bf16.mxu0 %v4709_v44  ;;  %v4113_v44 = vld [vmem:[%s7456_s9 + $0x168] sm:$0xff] }
 0x512   : >> { %v4786_v14 = vpack.c.bf16 %v4113_v44, %v4112_v13  ;;  %v4147_v13 = vld [vmem:[%s7456_s9 + $0x268] sm:$0xff] }
 0x514   : >> { %4712 = vmatpush1.bf16.msra.mxu0 %v4711_v57  ;;  %v4094_v57 = vld [vmem:[%s7456_s9 + $0xe0] sm:$0xff] }
 0x515   : >> { %4077 = vmatprep.subr.msk.mxu0 %vm1385_vm9, %v4076_v17  ;;  %v4095_v17 = vld [vmem:[%s7456_s9 + $0xe8] sm:$0xff] }
 0x518   : >> { %4078 = vmatpush1.msk.msra.mxu0 %vm1385_vm9, %v4075_v18  ;;  %v4114_v18 = vld [vmem:[%s7456_s9 + $0x170] sm:$0xff] }
 0x519   : >> { %2740 = vmatmul.mubr.f32.vlgmr.msra.gmra.mrb[14].mxu0 %v6220_v5  ;;  %v2756_v5 = vld [vmem:[%s7454_s7] sm:$0x3]  ;;  %4773 = vmatprep.subr.bf16.mxu0 %v5094_v42 }
 0x51a   : >> { %v6918_v20 = vpop.f32.mrb[12].mxu0  ;;  %4080 = vmatprep.mubr.msk.f32.mxu0 %vm1380_vm11, %v6107_v59  ;;  %v2761_v12 = vrot.slane %v2756_v5, %v5460_v33  ;;  %v2765_v15 = vrot.slane %v2756_v5, %v5465_v35  ;;  %v4115_v5 = vld [vmem:[%s7456_s9 + $0x178] sm:$0xff] }
 0x51b   : >> { %v6922_v25 = vpop.f32.mrb[13].mxu0  ;;  %2105 = vrot.lane.b32.xlu1 %v6918_v20, %s5093_s1 }
 0x51c   : >> { %2107 = vrot.lane.b32.xlu0 %v6922_v25, %s5093_s1 }
 0x51d   : >> { %2746 = vmatmul.mubr.f32.gmra.mrb[16].mxu0 %v6215_v4 }
 0x5ec   : >> { %v2741_v59 = vpop.f32.mrb[14].mxu0 }
 0x5ed   : >> { %v2768_v16 = vadd.f32 %v2761_v12, %v2741_v59  ;;  %v2743_v23 = vpop.f32.mrb[15].mxu0  ;;  %v4096_v59 = vld [vmem:[%s7456_s9 + $0xf0] sm:$0xff] }
 0x5ee   : >> { %v2769_v24 = vadd.f32 %v2765_v15, %v2743_v23  ;;  %v4116_v23 = vld [vmem:[%s7456_s9 + $0x180] sm:$0xff] }
 0x5ef   : >> { %v2772_v22 = vmax.f32 %v2768_v16, 0.0  ;;  %v4097_v16 = vld [vmem:[%s7456_s9 + $0xf8] sm:$0xff] }
 0x5f0   : >> { %v2747_v26 = vpop.f32.mrb[16].mxu0  ;;  %v2773_v51 = vmax.f32 %v2769_v24, 0.0  ;;  %v4117_v24 = vld [vmem:[%s7456_s9 + $0x188] sm:$0xff] }
 0x5f1   : >> { %v2770_v38 = vadd.f32 %v2761_v12, %v2747_v26  ;;  %v2749_v27 = vpop.f32.mrb[17].mxu0  ;;  %v2780_v19 = vrot.slane %v2772_v22, 1  ;;  %v4735_v12 = vpack.c.bf16 %v4095_v17, %v4094_v57  ;;  %v4738_v26 = vpack.c.bf16 %v4097_v16, %v4096_v59  ;;  %v2891_v57 = vld [vmem:[%s7456_s9 + $0x38] sm:$0xff]  ;;  %v4148_v17 = vld [vmem:[%s7456_s9 + $0x270] sm:$0xff]  ;;  %v2893_v59 = vld [vmem:[%s7456_s9 + $0x48] sm:$0xff] }
 0x5f2   : >> { %v2771_v30 = vadd.f32 %v2765_v15, %v2749_v27  ;;  %v2783_v32 = vrot.slane %v2773_v51, 1  ;;  %v4789_v15 = vpack.c.bf16 %v4115_v5, %v4114_v18  ;;  %v4099_v27 = vld [vmem:[%s7456_s9 + $0x108] sm:$0xff]  ;;  %v4149_v18 = vld [vmem:[%s7456_s9 + $0x278] sm:$0xff]  ;;  %v4150_v16 = vld [vmem:[%s7456_s9 + $0x280] sm:$0xff] }
 0x5f3   : >> { %v2774_v29 = vmax.f32 %v2770_v38, 0.0  ;;  %v4098_v38 = vld [vmem:[%s7456_s9 + $0x100] sm:$0xff] }
 0x5f4   : >> { %v2775_v4 = vmax.f32 %v2771_v30, 0.0  ;;  %v4119_v30 = vld [vmem:[%s7456_s9 + $0x198] sm:$0xff] }
 0x5f5   : >> { %v2781_v31 = vrot.slane %v2774_v29, 1 }
 0x5f6   : >> { %v2784_v34 = vrot.slane %v2775_v4, 1 }
 0x5f7   : >> { %v2782_v33 = vsel %vm532_vm0, %v2780_v19, %v2781_v31  ;;  %v2792_v43 = vmax.f32 %v2774_v29, %v2781_v31  ;;  %v4741_v29 = vpack.c.bf16 %v4099_v27, %v4098_v38  ;;  %v4100_v19 = vld [vmem:[%s7456_s9 + $0x110] sm:$0xff]  ;;  %v4101_v31 = vld [vmem:[%s7456_s9 + $0x118] sm:$0xff] }
 0x5f8   : >> { %v2790_v35 = vmax.f32 %v2772_v22, %v2782_v33  ;;  %v2785_v2 = vsel %vm532_vm0, %v2783_v32, %v2784_v34  ;;  %v2793_v36 = vmax.f32 %v2775_v4, %v2784_v34  ;;  %v4792_v22 = vpack.c.bf16 %v4117_v24, %v4116_v23  ;;  %v4120_v32 = vld [vmem:[%s7456_s9 + $0x1a0] sm:$0xff]  ;;  %v4121_v33 = vld [vmem:[%s7456_s9 + $0x1a8] sm:$0xff]  ;;  %v2895_v38 = vld [vmem:[%s7456_s9 + $0x58] sm:$0xff] }
 0x5f9   : >> { %v2791_v37 = vmax.f32 %v2773_v51, %v2785_v2  ;;  %v4118_v51 = vld [vmem:[%s7456_s9 + $0x190] sm:$0xff]  ;;  %v4744_v34 = vpack.c.bf16 %v4101_v31, %v4100_v19  ;;  %vm2926_vm0 = vcmask 130048   ;;  %v4151_v23 = vld [vmem:[%s7456_s9 + $0x288] sm:$0xff]  ;;  %v4154_v31 = vld [vmem:[%s7456_s9 + $0x2a0] sm:$0xff] }
 0x5fa   : >> { %v4716_v28 = vpack.c.bf16 %v2792_v43, %v2790_v35  ;;  %v4795_v4 = vpack.c.bf16 %v4119_v30, %v4118_v51  ;;  %v4798_v43 = vpack.c.bf16 %v4121_v33, %v4120_v32  ;;  %v4152_v27 = vld [vmem:[%s7456_s9 + $0x290] sm:$0xff]  ;;  %v4153_v51 = vld [vmem:[%s7456_s9 + $0x298] sm:$0xff]  ;;  %v2897_v19 = vld [vmem:[%s7456_s9 + $0x68] sm:$0xff] }
 0x5fb   : >> { %v4713_v39 = vpack.c.bf16 %v2793_v36, %v2791_v37  ;;  %v2106_v36 = vpop.permute.xlu1 %2105  ;;  %v2108_v37 = vpop.permute.xlu0 %2107  ;;  %v4155_v32 = vld [vmem:[%s7456_s9 + $0x2a8] sm:$0xff] }
 0x5fc   : >> { %v2114_v61 = vmax.f32 %v6922_v25, %v2108_v37  ;;  %v4143_v25 = vld [vmem:[%s7456_s9 + $0x248] sm:$0xff]  ;;  %v4846_v33 = vpack.c.bf16 %v4155_v32, %v4154_v31  ;;  %v3370_v31 = vld [vmem:[%s7458_s11 + $0x58] sm:$0xff] }
 0x5fd   : >> { %4715 = vmatprep.subr.msk.bf16.mxu1 %vm6242_vm13, %v4713_v39  ;;  %v4828_v58 = vpack.c.bf16 %v4143_v25, %v4142_v52  ;;  %v4125_v25 = vld [vmem:[%s7456_s9 + $0x1c0] sm:$0xff] }
 0x5fe   : >> { %4718 = vmatpush1.bf16.msk.msra.mxu1 %vm6242_vm13, %v4716_v28  ;;  %v2110_v28 = vsel %vm2109_vm15, %v2106_v36, %v2108_v37  ;;  %v4157_v36 = vld [vmem:[%s7456_s9 + $0x2b8] sm:$0xff] }
 0x5ff   : >> { %4719 = vmatprep.subr.bf16.mxu1 %v5094_v42  ;;  %v2113_v45 = vmax.f32 %v6918_v20, %v2110_v28 }
 0x601   : >> { %4083 = vmatmul.mubr.msk.f32.vlgmr.msra.gmra.mrb[4].mxu1 %vm2021_vm14, %v6265_v60  ;;  %v4105_v60 = vld [vmem:[%s7456_s9 + $0x128] sm:$0xff] }
 0x602   : >> { %v4774_v50 = vpack.c.bf16 %v4105_v60, %v4104_v53  ;;  %4721 = vmatpush1.bf16.msra.mxu1 %v4720_v47  ;;  %v2884_v60 = vld [vmem:[%s7456_s9] sm:$0xff] }
 0x603   : >> { %4722 = vmatprep.subr.bf16.mxu1 %v5094_v42 }
 0x604   : >> { %4775 = vmatpush1.bf16.msra.mxu0 %v4774_v50  ;;  %v2885_v50 = vld [vmem:[%s7456_s9 + $0x8] sm:$0xff] }
 0x605   : >> { %4776 = vmatprep.subr.bf16.mxu0 %v5094_v42  ;;  %v4747_v56 = vpack.c.bf16 %v2885_v50, %v2884_v60 }
 0x606   : >> { %4724 = vmatpush1.bf16.msra.mxu1 %v4723_v46 }
 0x607   : >> { %4725 = vmatprep.subr.bf16.mxu1 %v5094_v42 }
 0x608   : >> { %4778 = vmatpush1.bf16.msra.mxu0 %v4777_v54 }
 0x609   : >> { %4779 = vmatprep.subr.bf16.mxu0 %v5094_v42 }
 0x60a   : >> { %4727 = vmatpush1.bf16.msra.mxu1 %v4726_v0 }
 0x60b   : >> { %4728 = vmatprep.subr.bf16.mxu1 %v5094_v42 }
 0x60c   : >> { %4781 = vmatpush1.bf16.msra.mxu0 %v4780_v1  ;;  %v2887_v1 = vld [vmem:[%s7456_s9 + $0x18] sm:$0xff] }
 0x60d   : >> { %4782 = vmatprep.subr.bf16.mxu0 %v5094_v42  ;;  %v4750_v40 = vpack.c.bf16 %v2887_v1, %v2886_v62  ;;  %v4128_v62 = vld [vmem:[%s7456_s9 + $0x1d8] sm:$0xff] }
 0x60e   : >> { %4730 = vmatpush1.bf16.msra.mxu1 %v4729_v8  ;;  %v4831_v8 = vpack.c.bf16 %v4145_v6, %v4144_v3  ;;  %v4131_v3 = vld [vmem:[%s7456_s9 + $0x1f0] sm:$0xff]  ;;  %v4132_v6 = vld [vmem:[%s7456_s9 + $0x1f8] sm:$0xff] }
 0x60f   : >> { %4731 = vmatprep.subr.bf16.mxu1 %v5094_v42 }
 0x610   : >> { %4784 = vmatpush1.bf16.msra.mxu0 %v4783_v9  ;;  %v2888_v9 = vld [vmem:[%s7456_s9 + $0x20] sm:$0xff] }
 0x611   : >> { %4785 = vmatprep.subr.bf16.mxu0 %v5094_v42  ;;  %v4753_v44 = vpack.c.bf16 %v2889_v10, %v2888_v9  ;;  %v4135_v10 = vld [vmem:[%s7456_s9 + $0x210] sm:$0xff] }
 0x612   : >> { %4733 = vmatpush1.bf16.msra.mxu1 %v4732_v21  ;;  %v4834_v21 = vpack.c.bf16 %v4147_v13, %v4146_v11  ;;  %v4136_v11 = vld [vmem:[%s7456_s9 + $0x218] sm:$0xff] }
 0x613   : >> { %4734 = vmatprep.subr.bf16.mxu1 %v5094_v42  ;;  %v4819_v13 = vpack.c.bf16 %v4136_v11, %v4135_v10  ;;  %v3459_v10 = vld [vmem:[%s7460_s13 + $0x48] sm:$0xff] }
 0x614   : >> { %4787 = vmatpush1.bf16.msra.mxu0 %v4786_v14  ;;  %v2890_v14 = vld [vmem:[%s7456_s9 + $0x30] sm:$0xff] }
 0x615   : >> { %4788 = vmatprep.subr.bf16.mxu0 %v5094_v42  ;;  %v4756_v5 = vpack.c.bf16 %v2891_v57, %v2890_v14  ;;  %v4139_v57 = vld [vmem:[%s7456_s9 + $0x230] sm:$0xff] }
 0x616   : >> { %4736 = vmatpush1.bf16.msra.mxu1 %v4735_v12  ;;  %v4837_v12 = vpack.c.bf16 %v4149_v18, %v4148_v17  ;;  %v4140_v17 = vld [vmem:[%s7456_s9 + $0x238] sm:$0xff] }
 0x617   : >> { %4737 = vmatprep.subr.bf16.mxu1 %v5094_v42  ;;  %v4825_v18 = vpack.c.bf16 %v4140_v17, %v4139_v57 }
 0x618   : >> { %4790 = vmatpush1.bf16.msra.mxu0 %v4789_v15  ;;  %v2892_v15 = vld [vmem:[%s7456_s9 + $0x40] sm:$0xff] }
 0x619   : >> { %4791 = vmatprep.subr.bf16.mxu0 %v5094_v42  ;;  %v4759_v24 = vpack.c.bf16 %v2893_v59, %v2892_v15  ;;  %v3360_v15 = vld [vmem:[%s7458_s11 + $0x8] sm:$0xff]  ;;  %v3361_v59 = vld [vmem:[%s7458_s11 + $0x10] sm:$0xff] }
 0x61a   : >> { %4739 = vmatpush1.bf16.msra.mxu1 %v4738_v26  ;;  %v4840_v26 = vpack.c.bf16 %v4151_v23, %v4150_v16 }
 0x61b   : >> { %4740 = vmatprep.subr.bf16.mxu1 %v5094_v42 }
 0x61c   : >> { %4793 = vmatpush1.bf16.msra.mxu0 %v4792_v22  ;;  %v2894_v22 = vld [vmem:[%s7456_s9 + $0x50] sm:$0xff] }
 0x61d   : >> { %4794 = vmatprep.subr.bf16.mxu0 %v5094_v42  ;;  %v4762_v30 = vpack.c.bf16 %v2895_v38, %v2894_v22  ;;  %v3365_v38 = vld [vmem:[%s7458_s11 + $0x30] sm:$0xff] }
 0x61e   : >> { %4742 = vmatpush1.bf16.msra.mxu1 %v4741_v29  ;;  %v4843_v29 = vpack.c.bf16 %v4153_v51, %v4152_v27  ;;  %v3366_v27 = vld [vmem:[%s7458_s11 + $0x38] sm:$0xff] }
 0x61f   : >> { %4743 = vmatprep.subr.bf16.mxu1 %v5094_v42  ;;  %v4864_v51 = vpack.c.bf16 %v3366_v27, %v3365_v38 }
 0x620   : >> { %4796 = vmatpush1.bf16.msra.mxu0 %v4795_v4  ;;  %v2896_v4 = vld [vmem:[%s7456_s9 + $0x60] sm:$0xff] }
 0x621   : >> { %4797 = vmatprep.subr.bf16.mxu0 %v5094_v42 }
 0x622   : >> { %4745 = vmatpush1.bf16.msra.mxu1 %v4744_v34  ;;  %v4765_v34 = vpack.c.bf16 %v2897_v19, %v2896_v4  ;;  %v3369_v19 = vld [vmem:[%s7458_s11 + $0x50] sm:$0xff] }
 0x623   : >> { %4746 = vmatprep.subr.bf16.mxu1 %v5094_v42  ;;  %v4870_v32 = vpack.c.bf16 %v3370_v31, %v3369_v19 }
 0x624   : >> { %4799 = vmatpush1.bf16.msra.mxu0 %v4798_v43  ;;  %v2898_v43 = vld [vmem:[%s7456_s9 + $0x70] sm:$0xff] }
 0x625   : >> { %4827 = vmatprep.subr.bf16.mxu0 %v5094_v42 }
 0x6d4   : >> { %v2866_v35 = vpop.f32.mrb[4].mxu1 }
 0x6d5   : >> { %v2868_v2 = vpop.f32.mrb[5].mxu1  ;;  %2873 = vrot.lane.b32.xlu1 %v2866_v35, %s5093_s1 }
 0x6d6   : >> { %2875 = vrot.lane.b32.xlu0 %v2868_v2, %s5093_s1 }
 0x747   : >> { %v2874_v39 = vpop.permute.xlu1 %2873 }
 0x748   : >> { %v2876_v41 = vpop.permute.xlu0 %2875 }
 0x749   : >> { %v2877_v53 = vsel %vm2109_vm15, %v2874_v39, %v2876_v41  ;;  %v2881_v47 = vmax.f32 %v2868_v2, %v2876_v41  ;;  %v4156_v2 = vld [vmem:[%s7456_s9 + $0x2b0] sm:$0xff]  ;;  %v2900_v39 = vld [vmem:[%s7456_s9 + $0x80] sm:$0xff]  ;;  %v2901_v41 = vld [vmem:[%s7456_s9 + $0x88] sm:$0xff] }
 0x74a   : >> { %v2880_v48 = vmax.f32 %v2866_v35, %v2877_v53  ;;  %v2899_v35 = vld [vmem:[%s7456_s9 + $0x78] sm:$0xff]  ;;  %v4849_v28 = vpack.c.bf16 %v4157_v36, %v4156_v2  ;;  %v4159_v53 = vld [vmem:[%s7456_s9 + $0x2c8] sm:$0xff] }
 0x74b   : >> { %v7086_v55 = vadd.f32 %v2881_v47, %v2114_v61  ;;  %v4768_v37 = vpack.c.bf16 %v2899_v35, %v2898_v43  ;;  %v4158_v61 = vld [vmem:[%s7456_s9 + $0x2c0] sm:$0xff]  ;;  %v4771_v47 = vpack.c.bf16 %v2901_v41, %v2900_v39  ;;  %v3373_v35 = vld [vmem:[%s7458_s11 + $0x70] sm:$0xff] }
 0x74c   : >> { %v7088_v46 = vadd.f32 %v2880_v48, %v2113_v45  ;;  %v4852_v60 = vpack.c.bf16 %v4159_v53, %v4158_v61  ;;  %v4123_v45 = vld [vmem:[%s7456_s9 + $0x1b0] sm:$0xff]  ;;  %v4124_v48 = vld [vmem:[%s7456_s9 + $0x1b8] sm:$0xff] }
 0x74d   : >> { %v2924_v20 = vrot.slane %v7086_v55, 1  ;;  %v3091_v54 = vrot.slane %v7086_v55, 2  ;;  %v3281_v49 = vrot.slane %v7086_v55, 4  ;;  %v4801_v50 = vpack.c.bf16 %v4124_v48, %v4123_v45 }
 0x74e   : >> { %v2923_v63 = vrot.slane %v7088_v46, 1  ;;  %v3090_v0 = vrot.slane %v7088_v46, 2  ;;  %v3280_v52 = vrot.slane %v7088_v46, 4 }
 0x74f   : >> { %4102 = vmatprep.mubr.msk.f32.mxu1 %vm2926_vm0, %v2924_v20  ;;  %4122 = vmatprep.mubr.msk.f32.mxu0 %vm2926_vm0, %v3091_v54  ;;  %v4126_v20 = vld [vmem:[%s7456_s9 + $0x1c8] sm:$0xff]  ;;  %v3186_v54 = vrot.slane %v7086_v55, 3 }
 0x750   : >> { %2994 = vmatmul.mubr.f32.vlgmr.msra.gmra.mrb[6].mxu1 %v2923_v63  ;;  %3160 = vmatmul.mubr.f32.vlgmr.msra.gmra.mrb[18].mxu0 %v3090_v0  ;;  %v4130_v0 = vld [vmem:[%s7456_s9 + $0x1e8] sm:$0xff] }
 0x751   : >> { %4748 = vmatpush1.bf16.msra.mxu1 %v4747_v56  ;;  %4829 = vmatpush1.bf16.msra.mxu0 %v4828_v58  ;;  %v4804_v56 = vpack.c.bf16 %v4126_v20, %v4125_v25  ;;  %v4127_v58 = vld [vmem:[%s7456_s9 + $0x1d0] sm:$0xff]  ;;  %v3450_v20 = vld [vmem:[%s7460_s13] sm:$0xff] }
 0x752   : >> { %4103 = vmatprep.mubr.msk.f32.mxu1 %vm2926_vm0, %v7086_v55  ;;  %4160 = vmatprep.mubr.msk.f32.mxu0 %vm2926_vm0, %v3281_v49  ;;  %v4807_v63 = vpack.c.bf16 %v4128_v62, %v4127_v58  ;;  %v4129_v55 = vld [vmem:[%s7456_s9 + $0x1e0] sm:$0xff]  ;;  %v4813_v49 = vpack.c.bf16 %v4132_v6, %v4131_v3  ;;  %v3455_v3 = vld [vmem:[%s7460_s13 + $0x28] sm:$0xff] }
 0x753   : >> { %4749 = vmatprep.subr.bf16.mxu1 %v5094_v42  ;;  %4830 = vmatprep.subr.bf16.mxu0 %v5094_v42  ;;  %v4810_v1 = vpack.c.bf16 %v4130_v0, %v4129_v55  ;;  %v3453_v55 = vld [vmem:[%s7460_s13 + $0x18] sm:$0xff] }
 0x755   : >> { %4751 = vmatpush1.bf16.msra.mxu1 %v4750_v40  ;;  %4832 = vmatpush1.bf16.msra.mxu0 %v4831_v8  ;;  %v4133_v40 = vld [vmem:[%s7456_s9 + $0x200] sm:$0xff]  ;;  %v4134_v8 = vld [vmem:[%s7456_s9 + $0x208] sm:$0xff] }
 0x756   : >> { %4752 = vmatprep.subr.bf16.mxu1 %v5094_v42  ;;  %4833 = vmatprep.subr.bf16.mxu0 %v5094_v42  ;;  %v4816_v9 = vpack.c.bf16 %v4134_v8, %v4133_v40  ;;  %v3457_v40 = vld [vmem:[%s7460_s13 + $0x38] sm:$0xff] }
 0x759   : >> { %4754 = vmatpush1.bf16.msra.mxu1 %v4753_v44  ;;  %4835 = vmatpush1.bf16.msra.mxu0 %v4834_v21  ;;  %v4137_v44 = vld [vmem:[%s7456_s9 + $0x220] sm:$0xff]  ;;  %v4138_v21 = vld [vmem:[%s7456_s9 + $0x228] sm:$0xff] }
 0x75a   : >> { %4755 = vmatprep.subr.bf16.mxu1 %v5094_v42  ;;  %4836 = vmatprep.subr.bf16.mxu0 %v5094_v42  ;;  %v4822_v14 = vpack.c.bf16 %v4138_v21, %v4137_v44 }
 0x75d   : >> { %4757 = vmatpush1.bf16.msra.mxu1 %v4756_v5  ;;  %4838 = vmatpush1.bf16.msra.mxu0 %v4837_v12  ;;  %v3185_v5 = vrot.slane %v7088_v46, 3  ;;  %v3359_v12 = vld [vmem:[%s7458_s11] sm:$0xff] }
 0x75e   : >> { %4758 = vmatprep.subr.bf16.mxu1 %v5094_v42  ;;  %4839 = vmatprep.subr.bf16.mxu0 %v5094_v42  ;;  %v4855_v16 = vpack.c.bf16 %v3360_v15, %v3359_v12 }
 0x761   : >> { %4760 = vmatpush1.bf16.msra.mxu1 %v4759_v24  ;;  %4841 = vmatpush1.bf16.msra.mxu0 %v4840_v26  ;;  %v3363_v24 = vld [vmem:[%s7458_s11 + $0x20] sm:$0xff]  ;;  %v3364_v26 = vld [vmem:[%s7458_s11 + $0x28] sm:$0xff] }
 0x762   : >> { %4761 = vmatprep.subr.bf16.mxu1 %v5094_v42  ;;  %4842 = vmatprep.subr.bf16.mxu0 %v5094_v42  ;;  %v4861_v22 = vpack.c.bf16 %v3364_v26, %v3363_v24 }
 0x765   : >> { %4763 = vmatpush1.bf16.msra.mxu1 %v4762_v30  ;;  %4844 = vmatpush1.bf16.msra.mxu0 %v4843_v29  ;;  %v3367_v30 = vld [vmem:[%s7458_s11 + $0x40] sm:$0xff]  ;;  %v3368_v29 = vld [vmem:[%s7458_s11 + $0x48] sm:$0xff] }
 0x766   : >> { %4764 = vmatprep.subr.bf16.mxu1 %v5094_v42  ;;  %4845 = vmatprep.subr.bf16.mxu0 %v5094_v42  ;;  %v4867_v4 = vpack.c.bf16 %v3368_v29, %v3367_v30 }
 0x769   : >> { %4766 = vmatpush1.bf16.msra.mxu1 %v4765_v34  ;;  %4847 = vmatpush1.bf16.msra.mxu0 %v4846_v33  ;;  %v3371_v34 = vld [vmem:[%s7458_s11 + $0x60] sm:$0xff]  ;;  %v3372_v33 = vld [vmem:[%s7458_s11 + $0x68] sm:$0xff] }
 0x76a   : >> { %4767 = vmatprep.subr.bf16.mxu1 %v5094_v42  ;;  %4848 = vmatprep.subr.bf16.mxu0 %v5094_v42  ;;  %v4873_v43 = vpack.c.bf16 %v3372_v33, %v3371_v34 }
 0x76d   : >> { %4769 = vmatpush1.bf16.msra.mxu1 %v4768_v37  ;;  %4850 = vmatpush1.bf16.msra.mxu0 %v4849_v28 }
 0x76e   : >> { %4770 = vmatprep.subr.bf16.mxu1 %v5094_v42  ;;  %4851 = vmatprep.subr.bf16.mxu0 %v5094_v42 }
 0x771   : >> { %4772 = vmatpush1.bf16.msra.mxu1 %v4771_v47  ;;  %4853 = vmatpush1.bf16.msra.mxu0 %v4852_v60 }
 0x772   : >> { %4800 = vmatprep.subr.bf16.mxu1 %v5094_v42 }
 0x774   : >> { %3066 = vmatmul.mubr.f32.vlgmr.msra.gmra.mrb[8].mxu1 %v7088_v46  ;;  %3350 = vmatmul.mubr.f32.vlgmr.msra.gmra.mrb[20].mxu0 %v3280_v52  ;;  %v3362_v46 = vld [vmem:[%s7458_s11 + $0x18] sm:$0xff]  ;;  %v3356_v52 = vld [vmem:[%s7457_s10] sm:$0x1] }
 0x775   : >> { %4802 = vmatpush1.bf16.msra.mxu1 %v4801_v50  ;;  %4141 = vmatprep.mubr.msk.f32.mxu1 %vm2926_vm0, %v3186_v54  ;;  %v4858_v23 = vpack.c.bf16 %v3362_v46, %v3361_v59  ;;  %v3451_v54 = vld [vmem:[%s7460_s13 + $0x8] sm:$0xff] }
 0x776   : >> { %4803 = vmatprep.subr.bf16.mxu1 %v5094_v42  ;;  %v4876_v58 = vpack.c.bf16 %v3451_v54, %v3450_v20 }
 0x779   : >> { %4805 = vmatpush1.bf16.msra.mxu1 %v4804_v56 }
 0x77a   : >> { %4806 = vmatprep.subr.bf16.mxu1 %v5094_v42 }
 0x77d   : >> { %4808 = vmatpush1.bf16.msra.mxu1 %v4807_v63  ;;  %v3452_v63 = vld [vmem:[%s7460_s13 + $0x10] sm:$0xff] }
 0x77e   : >> { %4809 = vmatprep.subr.bf16.mxu1 %v5094_v42  ;;  %v4879_v0 = vpack.c.bf16 %v3453_v55, %v3452_v63 }
 0x781   : >> { %4811 = vmatpush1.bf16.msra.mxu1 %v4810_v1  ;;  %v3454_v1 = vld [vmem:[%s7460_s13 + $0x20] sm:$0xff] }
 0x782   : >> { %4812 = vmatprep.subr.bf16.mxu1 %v5094_v42  ;;  %v4882_v6 = vpack.c.bf16 %v3455_v3, %v3454_v1 }
 0x785   : >> { %4814 = vmatpush1.bf16.msra.mxu1 %v4813_v49  ;;  %v3456_v49 = vld [vmem:[%s7460_s13 + $0x30] sm:$0xff] }
 0x786   : >> { %4815 = vmatprep.subr.bf16.mxu1 %v5094_v42  ;;  %v4885_v8 = vpack.c.bf16 %v3457_v40, %v3456_v49 }
 0x789   : >> { %4817 = vmatpush1.bf16.msra.mxu1 %v4816_v9  ;;  %v3458_v9 = vld [vmem:[%s7460_s13 + $0x40] sm:$0xff] }
 0x78a   : >> { %4818 = vmatprep.subr.bf16.mxu1 %v5094_v42  ;;  %v4888_v11 = vpack.c.bf16 %v3459_v10, %v3458_v9 }
 0x78d   : >> { %4820 = vmatpush1.bf16.msra.mxu1 %v4819_v13  ;;  %v3460_v13 = vld [vmem:[%s7460_s13 + $0x50] sm:$0xf] }
 0x78e   : >> { %4821 = vmatprep.subr.bf16.mxu1 %v5094_v42 }
 0x791   : >> { %4823 = vmatpush1.bf16.msra.mxu1 %v4822_v14 }
 0x792   : >> { %4824 = vmatprep.subr.bf16.mxu1 %v5094_v42 }
 0x795   : >> { %4826 = vmatpush1.bf16.msra.mxu1 %v4825_v18 }
 0x796   : >> { %4854 = vmatprep.subr.bf16.mxu1 %v5094_v42 }
 0x798   : >> { %3255 = vmatmul.mubr.f32.vlgmr.msra.gmra.mrb[10].mxu1 %v3185_v5 }
 0x799   : >> { %4856 = vmatpush3.bf16.msra.mxu1 %v4855_v16  ;;  %4229 = vmatprep.mubr.msk.f32.mxu1 %vm5095_vm1, %v5090_v7 }
 0x79a   : >> { %4857 = vmatprep.subr.bf16.mxu1 %v5094_v42 }
 0x79d   : >> { %4859 = vmatpush3.bf16.msra.mxu1 %v4858_v23 }
 0x79e   : >> { %4860 = vmatprep.subr.bf16.mxu1 %v5094_v42 }
 0x7a1   : >> { %4862 = vmatpush3.bf16.msra.mxu1 %v4861_v22 }
 0x7a2   : >> { %4863 = vmatprep.subr.bf16.mxu1 %v5094_v42 }
 0x7a5   : >> { %4865 = vmatpush3.bf16.msra.mxu1 %v4864_v51 }
 0x7a6   : >> { %4866 = vmatprep.subr.bf16.mxu1 %v5094_v42 }
 0x7a9   : >> { %4868 = vmatpush3.bf16.msra.mxu1 %v4867_v4 }
 0x7aa   : >> { %4869 = vmatprep.subr.bf16.mxu1 %v5094_v42 }
 0x7ad   : >> { %4871 = vmatpush3.bf16.msra.mxu1 %v4870_v32 }
 0x7ae   : >> { %4872 = vmatprep.subr.bf16.mxu1 %v5094_v42 }
 0x7b1   : >> { %4874 = vmatpush3.bf16.msra.mxu1 %v4873_v43 }
 0x7b2   : >> { %4227 = vmatprep.subr.mxu1 %v5090_v7 }
 0x7b5   : >> { %4228 = vmatpush3.msra.mxu1 %v3373_v35 }
 0x7b6   : >> { %4875 = vmatprep.subr.bf16.mxu1 %v5094_v42 }
 0x823   : >> { %v2995_v2 = vpop.f32.mrb[6].mxu1  ;;  %v3161_v36 = vpop.f32.mrb[18].mxu0 }
 0x824   : >> { %v2997_v37 = vpop.f32.mrb[7].mxu1  ;;  %v3163_v28 = vpop.f32.mrb[19].mxu0 }
 0x847   : >> { %v3067_v39 = vpop.f32.mrb[8].mxu1  ;;  %v3351_v41 = vpop.f32.mrb[20].mxu0 }
 0x848   : >> { %v3068_v61 = vadd.f32 %v3067_v39, %v2995_v2  ;;  %v3069_v53 = vpop.f32.mrb[9].mxu1  ;;  %v3353_v47 = vpop.f32.mrb[21].mxu0 }
 0x84a   : >> { %v3165_v60 = vadd.f32 %v3161_v36, %v3068_v61 }
 0x86b   : >> { %v3256_v45 = vpop.f32.mrb[10].mxu1 }
 0x86c   : >> { %v3260_v48 = vadd.f32 %v3256_v45, %v3165_v60  ;;  %v3258_v50 = vpop.f32.mrb[11].mxu1 }
 0x86e   : >> { %v3355_v25 = vadd.f32 %v3351_v41, %v3260_v48 }
 0x870   : >> { %v3357_v56 = vadd.f32 %v3356_v52, %v3355_v25 }
 0x872   : >> { %v3358_v62 = vmax.f32 %v3357_v56, 0.0 }
 0x874   : >> { %4230 = vmatmul.mubr.msk.f32.vlgmr.msra.gmra.mrb[12].mxu1 %vm3375_vm3, %v3358_v62 }
 0x875   : >> { %4877 = vmatpush3.bf16.msra.mxu1 %v4876_v58  ;;  %4254 = vmatprep.mubr.msk.f32.mxu1 %vm5095_vm1, %v5090_v7 }
 0x876   : >> { %4878 = vmatprep.subr.bf16.mxu1 %v5094_v42 }
 0x879   : >> { %4880 = vmatpush3.bf16.msra.mxu1 %v4879_v0 }
 0x87a   : >> { %4881 = vmatprep.subr.bf16.mxu1 %v5094_v42 }
 0x87d   : >> { %4883 = vmatpush3.bf16.msra.mxu1 %v4882_v6 }
 0x87e   : >> { %4884 = vmatprep.subr.bf16.mxu1 %v5094_v42 }
 0x881   : >> { %4886 = vmatpush3.bf16.msra.mxu1 %v4885_v8 }
 0x882   : >> { %4887 = vmatprep.subr.bf16.mxu1 %v5094_v42  ;;  %v3374_v42 = vld [vmem:[%s7459_s12] sm:$0x1] }
 0x885   : >> { %4889 = vmatpush3.bf16.msra.mxu1 %v4888_v11 }
 0x886   : >> { %4252 = vmatprep.subr.mxu1 %v5090_v7  ;;  %v3461_v7 = vld [vmem:[%s7461_s14] sm:$0x1] }
 0x889   : >> { %4253 = vmatpush3.msk.msra.mxu1 %vm988_vm2, %v3460_v13 }
 0x947   : >> { %v3445_v44 = vpop.f32.mrb[12].mxu1 }
 0x948   : >> { %v3446_v21 = vadd.f32 %v3445_v44, %v3374_v42  ;;  %v4231_v14 = vpop.f32.mrb[13].mxu1 }
 0x94a   : >> { %v3449_v57 = vmax.f32 %v3446_v21, 0.0 }
 0x94c   : >> { %4255 = vmatmul.mubr.msk.f32.vlgmr.msra.gmra.mrb[14].mxu1 %vm3462_vm4, %v3449_v57 }
 0xa1f   : >> { %v3535_v17 = vpop.f32.mrb[14].mxu1 }
 0xa20   : >> { %v3536_v18 = vadd.f32 %v3535_v17, %v3461_v7  ;;  %v4256_v5 = vpop.f32.mrb[15].mxu1 }
 0xa22   : >> { %v3539_v12 = vsel %vm2025_vm12, %v3536_v18, -inf }
 0xa23   : >> { %3540 = vmax.xlane.f32.xlu1 %v3539_v12 }
 0xab0   : >> { %v3541_v15 = vpop.xlane.xlu1 %3540 }
 0xab1   : >> { %v3542_v59 = vsub.f32 %v3536_v18, %v3541_v15 }
 0xab3   : >> { %v3543_v16 = vmul.f32 1.442695, %v3542_v59 }
 0xab5   : >> { %5014 = vpow2.f32 %v3543_v16 }
 0xabf   : >> { %v5015_v46 = vpop.eup %5014 }
 0xac0   : >> { %v3545_v23 = vsel %vm2025_vm12, %v5015_v46, 0.0 }
 0xac1   : >> { %3546 = vadd.xlane.f32.xlu0 %v3545_v23 }
 0xb4e   : >> { %v3547_v24 = vpop.xlane.xlu0 %3546 }
 0xb4f   : >> { %5016 = vlog2.f32 %v3547_v24 }
 0xb58   : > { %503 = sbr.rel (!%p501_p11) target bundleno = 31 (0x1f), region = 140 }
 0xb59   : >> { %v5017_v26 = vpop.eup %5016 }
 0xb5a   : >> { %v3549_v22 = vmul.f32 0.6931472, %v5017_v26 }
 0xb5c   : >> { %v3550_v38 = vsub.f32 %v3542_v59, %v3549_v22 }
 0xb5e   : >> { %3552 = vst [vmem:[%s3551_s23] sm:$0x1] %v3550_v38 }
 0xb5f   : > { %5031 = shalt.err (!%p5028_p4)
}
 0xb60   : > { %s5032_s17 = scalar_lea.hbm %s7398_s0, 128  ;;  %s5036_s20 = scalar_lea.hbm %s7462_s15, 256 }
 0xb61   : > { %p5033_p7 = scmp.ne.s32.totalorder %s7398_s0, %s5032_s17  ;;  %p5037_p10 = scmp.lt.u32.totalorder %s7398_s0, %s7462_s15 }
 0xb62   : > { %p5038_p11 = scmp.lt.u32.totalorder %s5036_s20, %s5032_s17  ;;  %p5040_p13 = scmp.lt.u32.totalorder %s5032_s17, %s7398_s0 }
 0xb63   : > { %p5034_p8 = pnand %p5033_p7, %p5217_p5 }
 0xb64   : > { %p5039_p12 = por %p5038_p11, %p5037_p10 }
 0xb65   : > { %p5035_p9 = pneg %p5034_p8 }
 0xb66   : > { %p5041_p0 = por %p5040_p13, %p5039_p12 }
 0xb68   : > { %p5042_p1 = pnand %p5041_p0, %p5035_p9 }
 0xb6a   : > { %5045 = shalt.err (!%p5042_p1)
}
 0xb6b   : > { %s5097_s21 = smov 16   ;;  %s5098_s29 = smov 1  }
 0xb6c   : > { %4954 = dma.vmem_to_hbm [thread:$0]  (%p5217_p5), %s7402_s26, 128, %s7398_s0, %s7406_s24, %s5097_s21, %s5097_s21, %s5098_s29  }
 0xb6d PF: > { %s7487_s27 = sld [smem:[#allocation7_spill]]  ;;  %s7488_s22 = sld [smem:[#allocation5_spill]] }
 0xb73   : > { %p4960_p2 = scmp.ge.s32.totalorder %s7487_s27, 2  ;;  %s3582_s18 = sand.u32 1, %s7488_s22  }
 0xb74   : > { %s3583_s17 = scalar_lea.sflag [#allocation3], %s3582_s18 }
 0xb75   : > { %p4957_p3 = pnand %p4960_p2, %p5221_p6 }
 0xb77   : > { %5067 = dma.done.wait (!%p4957_p3), %s3583_s17, 128  }
 0xb78   : > { %5069 = vsyncadd (!%p4957_p3), %s3583_s17, 4294967168  ;;  %s7490_s21 = sld [smem:[#allocation8_spill]]  ;;  %s7491_s16 = sld [smem:[#allocation6_spill]] }
 0xb79   : > { %s7492_s20 = sld [smem:[#allocation9_spill]]  ;;  %s7493_s18 = smov %s5076_s19 }
 0xb7e   : > { %p25_p4 = scmp.ge.s32.totalorder %s7490_s21, 4   ;;  %s7494_s19 = smov %s7491_s16 }
 0xb80   :  { %27 = sbr.rel (!%p25_p4) target bundleno = 6 (0x6), region = 151 }
 0xb87   :  { %3588 = vsyncpa [#allocation3], 1 }
 0xb88   :  { %3590 = vsyncpa [#allocation3 + $0x1], 1 }

</bundles_post_ra>
